<compile_context>
chip_gen: v5e
topology: v5e:2x2
jax: 0.10.0
libtpu: 0.0.40
codegen_flags: <defaults>
</compile_context>

<pallas_src>
import math

import jax
import jax.numpy as jnp
from jax.experimental import pallas as pl
from jax.experimental.pallas import tpu as pltpu


# ----------------------------------------------------------------------------
# In-kernel helpers
# ----------------------------------------------------------------------------
def _lstm_cell(x_t, h, c, w_ref, b_ref, hdim):
    """One LSTM step.  x_t: (B, I) bf16; h/c: (B, H) f32.
    w_ref: (I+H, 4H) bf16 ref holding [W_ih^T ; W_hh^T]; b_ref: (1, 4H) f32 ref
    holding b_ih + b_hh.  PyTorch gate order: i, f, g, o."""
    xh = jnp.concatenate([x_t, h.astype(jnp.bfloat16)], axis=-1)       # (B, I+H) bf16
    gates = (jnp.dot(xh, w_ref[...], preferred_element_type=jnp.float32)
             + b_ref[...])                                             # (B, 4H) f32
    i_g = jax.nn.sigmoid(gates[:, 0 * hdim:1 * hdim])
    f_g = jax.nn.sigmoid(gates[:, 1 * hdim:2 * hdim])
    g_g = jnp.tanh(gates[:, 2 * hdim:3 * hdim])
    o_g = jax.nn.sigmoid(gates[:, 3 * hdim:4 * hdim])
    c_new = f_g * c + i_g * g_g
    h_new = o_g * jnp.tanh(c_new)
    return h_new, c_new


def _run_steps(num_steps, step, init):
    """Static-unrolled Python loop for short T (full LLO visibility), fori otherwise."""
    if num_steps <= 16:
        carry = init
        for t in range(num_steps):
            carry = step(t, carry)
        return carry
    return jax.lax.fori_loop(0, num_steps, step, init)


# ----------------------------------------------------------------------------
# Pallas kernels
# ----------------------------------------------------------------------------
def _bilstm_dir_kernel(x_ref, w_ref, b_ref, out_ref):
    """One grid step == one direction (d=0 fwd, d=1 bwd).  Whole sequence resides in
    VMEM; the time loop runs in-kernel; each direction writes its lane-half block of
    the (T, B, 2H) output (lane-dense, no masked stores for H multiple of 128)."""
    d = pl.program_id(0)
    T, B, _ = x_ref.shape
    H = out_ref.shape[-1]
    reverse = d == 1

    def step(t, carry):
        h, c = carry
        tt = jnp.where(reverse, T - 1 - t, t)
        h, c = _lstm_cell(x_ref[tt], h, c, w_ref, b_ref, H)
        out_ref[tt] = h
        return h, c

    zeros = jnp.zeros((B, H), jnp.float32)         # zero initial (h0, c0), as in the module
    _run_steps(T, step, (zeros, zeros))


def _char_bilstm_cout_kernel(x_ref, wf_ref, bf_ref, wb_ref, bb_ref,
                             wc_ref, bc_ref, out_ref):
    """Char BiLSTM where only output[-1] is consumed downstream:
    full forward recurrence + ONE backward step over x[T-1] (zero init; this is
    exactly PyTorch's bidirectional output[-1] backward half), then the fused
    c_out Linear + ReLU epilogue."""
    T, B, _ = x_ref.shape
    H = wc_ref.shape[0] // 2
    zeros = jnp.zeros((B, H), jnp.float32)

    def fwd_step(t, carry):
        h, c = carry
        return _lstm_cell(x_ref[t], h, c, wf_ref, bf_ref, H)

    h_f, _ = _run_steps(T, fwd_step, (zeros, zeros))
    h_b, _ = _lstm_cell(x_ref[T - 1], zeros, zeros, wb_ref, bb_ref, H)

    feat = jnp.concatenate([h_f, h_b], axis=-1).astype(jnp.bfloat16)   # (B, 2H)
    y = (jnp.dot(feat, wc_ref[...], preferred_element_type=jnp.float32)
         + bc_ref[...])
    out_ref[...] = jnp.maximum(y, 0.0)


def _linear_logsoftmax_kernel(x_ref, w_ref, b_ref, o_ref):
    """Linear + numerically-stable log_softmax over a 128-lane-padded class axis
    (pad columns carry bias -1e30 -> exp underflows to 0, softmax unaffected)."""
    y = (jnp.dot(x_ref[...], w_ref[...], preferred_element_type=jnp.float32)
         + b_ref[...])
    m = jnp.max(y, axis=-1, keepdims=True)
    z = y - m
    lse = jnp.log(jnp.sum(jnp.exp(z), axis=-1, keepdims=True))
    o_ref[...] = z - lse


# ----------------------------------------------------------------------------
# Wrappers (pallas_call plumbing)
# ----------------------------------------------------------------------------
def bilstm_seq(x_bf16, w_stacked, b_stacked):
    """Bidirectional LSTM, zero init.  x: (T, B, I) bf16; w: (2, I+H, 4H) bf16;
    b: (2, 1, 4H) f32  ->  (T, B, 2H) f32 (fwd in lanes [:H], bwd in lanes [H:])."""
    T, B, I = x_bf16.shape
    H = w_stacked.shape[1] - I
    return pl.pallas_call(
        _bilstm_dir_kernel,
        out_shape=jax.ShapeDtypeStruct((T, B, 2 * H), jnp.float32),
        grid=(2,),                                               # direction axis
        in_specs=[
            pl.BlockSpec((T, B, I), lambda d: (0, 0, 0)),        # whole sequence
            pl.BlockSpec((None, I + H, 4 * H), lambda d: (d, 0, 0)),   # this dir's W
            pl.BlockSpec((None, 1, 4 * H), lambda d: (d, 0, 0)),       # this dir's bias
        ],
        out_specs=pl.BlockSpec((T, B, H), lambda d: (0, 0, d)),  # lane-half per dir
        compiler_params=pltpu.CompilerParams(
            dimension_semantics=("parallel",)),   # independent recurrences (2 TCs on v7x)
    )(x_bf16, w_stacked, b_stacked)


def char_bilstm_cout(x_bf16, p):
    """Char BiLSTM (last-position output only) fused with c_out Linear+ReLU.
    x: (T, B, I) bf16 -> (B, n_fac) f32."""
    T, B, I = x_bf16.shape
    H = p["wc"].shape[0] // 2
    nf = p["wc"].shape[1]
    return pl.pallas_call(
        _char_bilstm_cout_kernel,
        out_shape=jax.ShapeDtypeStruct((B, nf), jnp.float32),
        grid=(1,),
        in_specs=[
            pl.BlockSpec((T, B, I), lambda i: (0, 0, 0)),
            pl.BlockSpec((I + H, 4 * H), lambda i: (0, 0)),
            pl.BlockSpec((1, 4 * H), lambda i: (0, 0)),
            pl.BlockSpec((I + H, 4 * H), lambda i: (0, 0)),
            pl.BlockSpec((1, 4 * H), lambda i: (0, 0)),
            pl.BlockSpec((2 * H, nf), lambda i: (0, 0)),
            pl.BlockSpec((1, nf), lambda i: (0, 0)),
        ],
        out_specs=pl.BlockSpec((B, nf), lambda i: (0, 0)),
        compiler_params=pltpu.CompilerParams(dimension_semantics=("arbitrary",)),
    )(x_bf16, p["wf"], p["bf"], p["wb"], p["bb"], p["wc"], p["bc"])


def linear_logsoftmax(x_bf16, w_pad, b_pad, n_classes):
    """Classifier: (M, K) @ (K, 128-padded) + log_softmax, tiled over M, sliced back."""
    M, K = x_bf16.shape
    Np = w_pad.shape[1]
    tm = 256 if (M > 256 and M % 256 == 0) else M
    out = pl.pallas_call(
        _linear_logsoftmax_kernel,
        out_shape=jax.ShapeDtypeStruct((M, Np), jnp.float32),
        grid=(M // tm,),
        in_specs=[pl.BlockSpec((tm, K), lambda i: (i, 0)),
                  pl.BlockSpec((K, Np), lambda i: (0, 0)),
                  pl.BlockSpec((1, Np), lambda i: (0, 0))],
        out_specs=pl.BlockSpec((tm, Np), lambda i: (i, 0)),
        compiler_params=pltpu.CompilerParams(dimension_semantics=("parallel",)),
    )(x_bf16, w_pad, b_pad)
    return out[:, :n_classes]


# ----------------------------------------------------------------------------
# Parameters (deterministic synthetic init) and forward pass
# ----------------------------------------------------------------------------
def init_params(key, vocab_size, char_size, n_fac, hidden_char, hidden_dim,
                n_classes, n_pad):
    def u(k, shape, scale):
        return jax.random.uniform(k, shape, jnp.float32, -scale, scale)

    ks = jax.random.split(key, 14)
    s_c = 1.0 / math.sqrt(hidden_char)
    s_w = 1.0 / math.sqrt(hidden_dim)
    bf16 = jnp.bfloat16

    out_w = jnp.zeros((2 * hidden_dim, n_pad), jnp.float32)
    out_w = out_w.at[:, :n_classes].set(u(ks[12], (2 * hidden_dim, n_classes), s_w))
    out_b = jnp.full((1, n_pad), -1e30, jnp.float32)   # pad logits -> exp() underflows to 0
    out_b = out_b.at[:, :n_classes].set(u(ks[13], (1, n_classes), s_w))

    return {
        "word_embed": jax.random.normal(ks[0], (vocab_size, n_fac), jnp.float32),
        "char_embed": jax.random.normal(ks[1], (char_size, n_fac), jnp.float32),
        # char LSTM: fused [W_ih^T ; W_hh^T] per direction (bf16), combined bias (f32)
        "char": {
            "wf": u(ks[2], (n_fac + hidden_char, 4 * hidden_char), s_c).astype(bf16),
            "bf": u(ks[3], (1, 4 * hidden_char), s_c),
            "wb": u(ks[4], (n_fac + hidden_char, 4 * hidden_char), s_c).astype(bf16),
            "bb": u(ks[5], (1, 4 * hidden_char), s_c),
            "wc": u(ks[6], (2 * hidden_char, n_fac), s_c).astype(bf16),
            "bc": u(ks[7], (1, n_fac), s_c),
        },
        # word LSTM: directions stacked on a leading axis for the direction grid
        "word_w": jnp.stack(
            [u(ks[8], (2 * n_fac + hidden_dim, 4 * hidden_dim), s_w),
             u(ks[9], (2 * n_fac + hidden_dim, 4 * hidden_dim), s_w)]).astype(bf16),
        "word_b": jnp.stack(
            [u(ks[10], (1, 4 * hidden_dim), s_w),
             u(ks[11], (1, 4 * hidden_dim), s_w)]),
        "out_w": out_w.astype(bf16),
        "out_b": out_b,
    }


def lstm_forward(params, cs, char_sent, max_word_len, n_fac, n_classes):
    bs, seq_len = cs.shape
    # Embedding gathers (plain-JAX glue); cast LSTM matmul operands to bf16.
    char_emb = jnp.take(params["char_embed"], char_sent, axis=0)
    char_emb = char_emb.reshape(max_word_len, bs * seq_len, n_fac).astype(jnp.bfloat16)

    # Char BiLSTM + fused c_out Linear+ReLU (only the last time position is consumed).
    char_feat = char_bilstm_cout(char_emb, params["char"])          # (bs*seq, n_fac) f32

    # Build the word-LSTM input directly in time-major layout (seq, bs, 2*n_fac).
    word_emb_tm = jnp.take(params["word_embed"], cs.T, axis=0)      # (seq, bs, n_fac)
    char_tm = jnp.transpose(char_feat.reshape(bs, seq_len, n_fac), (1, 0, 2))
    x_word = jnp.concatenate([word_emb_tm, char_tm], axis=-1).astype(jnp.bfloat16)

    # Word BiLSTM: lane-dense (seq, bs, 2*Hd) output, both directions in one call.
    out_lstm = bilstm_seq(x_word, params["word_w"], params["word_b"])

    # Output Linear + log_softmax (position-wise, so applied in time-major order);
    # only the tiny (seq, bs, n_classes) result is transposed back to batch-first.
    flat = out_lstm.reshape(seq_len * bs, -1).astype(jnp.bfloat16)
    logp = linear_logsoftmax(flat, params["out_w"], params["out_b"], n_classes)
    return jnp.transpose(logp.reshape(seq_len, bs, n_classes), (1, 0, 2))


if __name__ == "__main__":
    # Small shapes consistent with the module's forward pass (hidden sizes kept at
    # 128 so gate slices / stores stay lane-aligned; n_fac scaled down from 512).
    vocab_size, char_size = 50, 30
    n_fac = 128
    hidden_char = 128   # as in the original module
    hidden_dim = 128
    n_classes = 2
    n_pad = 128         # 128-lane padded class axis for the classifier kernel
    bs, seq_len, max_word_len = 2, 4, 3

    key = jax.random.PRNGKey(0)
    kp, k1, k2 = jax.random.split(key, 3)
    params = init_params(kp, vocab_size, char_size, n_fac, hidden_char, hidden_dim,
                         n_classes, n_pad)

    cs = jax.random.randint(k1, (bs, seq_len), 0, vocab_size, dtype=jnp.int32)
    char_sent = jax.random.randint(k2, (max_word_len, bs * seq_len), 0, char_size,
                                   dtype=jnp.int32)

    fwd = jax.jit(lstm_forward, static_argnums=(3, 4, 5))
    out = fwd(params, cs, char_sent, max_word_len, n_fac, n_classes)
    out = jax.block_until_ready(out)

    assert out.shape == (bs, seq_len, n_classes), out.shape
    assert bool(jnp.all(jnp.isfinite(out)))
    # log_softmax sanity: probabilities over the real classes sum to ~1.
    assert bool(jnp.all(jnp.abs(jnp.sum(jnp.exp(out), axis=-1) - 1.0) < 1e-3))
    print("KERNEL_OK")
</pallas_src>

<mosaic_0001>
module attributes {stable_mosaic.version = 11 : i64} {
  func.func @_linear_logsoftmax_kernel(%arg0: i32, %arg1: memref<8x256xbf16, #tpu.memory_space<vmem>>, %arg2: memref<256x128xbf16, #tpu.memory_space<vmem>>, %arg3: memref<1x128xf32, #tpu.memory_space<vmem>>, %arg4: memref<8x128xf32, #tpu.memory_space<vmem>>) attributes {dimension_semantics = [#tpu.dimension_semantics<parallel>], iteration_bounds = array<i64: 1>, scalar_prefetch = 0 : i64, scratch_operands = 0 : i64, tpu.core_type = #tpu.core_type<tc>, window_params = [{transform_indices = @transform_0, window_bounds = array<i64: 8, 256>}, {pipeline_mode = #tpu.pipeline_mode<synchronous>, transform_indices = @transform_1, window_bounds = array<i64: 256, 128>}, {pipeline_mode = #tpu.pipeline_mode<synchronous>, transform_indices = @transform_2, window_bounds = array<i64: 1, 128>}, {transform_indices = @transform_3, window_bounds = array<i64: 8, 128>}]} {
    %c0 = arith.constant 0 : index
    %c0_0 = arith.constant 0 : index
    %0 = vector.load %arg1[%c0, %c0_0] : memref<8x256xbf16, #tpu.memory_space<vmem>>, vector<8x256xbf16>
    %c0_1 = arith.constant 0 : index
    %c0_2 = arith.constant 0 : index
    %1 = vector.load %arg2[%c0_1, %c0_2] : memref<256x128xbf16, #tpu.memory_space<vmem>>, vector<256x128xbf16>
    %cst = arith.constant dense<0.000000e+00> : vector<8x128xf32>
    %2 = tpu.matmul %0, %1, %cst {dimension_numbers = #tpu.dot_dimension_numbers<[1], [0], [0], [1], [0, 0, 1, 1], [], []>} : vector<8x256xbf16>, vector<256x128xbf16>, vector<8x128xf32> -> vector<8x128xf32>
    %c0_3 = arith.constant 0 : index
    %c0_4 = arith.constant 0 : index
    %3 = vector.load %arg3[%c0_3, %c0_4] : memref<1x128xf32, #tpu.memory_space<vmem>>, vector<1x128xf32>
    %4 = vector.broadcast %3 : vector<1x128xf32> to vector<8x128xf32>
    %5 = arith.addf %2, %4 : vector<8x128xf32>
    %cst_5 = arith.constant dense<0xFF800000> : vector<8xf32>
    %6 = vector.multi_reduction <maximumf>, %5, %cst_5 [1] : vector<8x128xf32> to vector<8xf32>
    %7 = vector.shape_cast %6 : vector<8xf32> to vector<8x1xf32>
    %8 = vector.broadcast %7 : vector<8x1xf32> to vector<8x128xf32>
    %9 = arith.subf %5, %8 : vector<8x128xf32>
    %10 = math.exp %9 : vector<8x128xf32>
    %cst_6 = arith.constant dense<0.000000e+00> : vector<8xf32>
    %11 = vector.multi_reduction <add>, %10, %cst_6 [1] : vector<8x128xf32> to vector<8xf32>
    %12 = vector.shape_cast %11 : vector<8xf32> to vector<8x1xf32>
    %13 = math.log %12 : vector<8x1xf32>
    %14 = vector.broadcast %13 : vector<8x1xf32> to vector<8x128xf32>
    %15 = arith.subf %9, %14 : vector<8x128xf32>
    %c0_7 = arith.constant 0 : index
    %c0_8 = arith.constant 0 : index
    %16 = vector.load %arg4[%c0_7, %c0_8] : memref<8x128xf32, #tpu.memory_space<vmem>>, vector<8x128xf32>
    tpu.vector_store %arg4[%c0_7, %c0_8], %15 {strides = array<i32>} : memref<8x128xf32, #tpu.memory_space<vmem>>, vector<8x128xf32>,
    return
  }
  func.func @transform_0(%arg0: i32) -> (i32, i32) {
    %c0_i32 = arith.constant 0 : i32
    %c0_i32_0 = arith.constant 0 : i32
    return %arg0, %c0_i32 : i32, i32
  }
  func.func @transform_1(%arg0: i32) -> (i32, i32) {
    %c0_i32 = arith.constant 0 : i32
    %c0_i32_0 = arith.constant 0 : i32
    %c0_i32_1 = arith.constant 0 : i32
    return %c0_i32, %c0_i32_0 : i32, i32
  }
  func.func @transform_2(%arg0: i32) -> (i32, i32) {
    %c0_i32 = arith.constant 0 : i32
    %c0_i32_0 = arith.constant 0 : i32
    %c0_i32_1 = arith.constant 0 : i32
    return %c0_i32, %c0_i32_0 : i32, i32
  }
  func.func @transform_3(%arg0: i32) -> (i32, i32) {
    %c0_i32 = arith.constant 0 : i32
    %c0_i32_0 = arith.constant 0 : i32
    return %arg0, %c0_i32 : i32, i32
  }
}

module attributes {stable_mosaic.version = 11 : i64} {
  func.func @_char_bilstm_cout_kernel(%arg0: i32, %arg1: memref<3x8x128xbf16, #tpu.memory_space<vmem>>, %arg2: memref<256x512xbf16, #tpu.memory_space<vmem>>, %arg3: memref<1x512xf32, #tpu.memory_space<vmem>>, %arg4: memref<256x512xbf16, #tpu.memory_space<vmem>>, %arg5: memref<1x512xf32, #tpu.memory_space<vmem>>, %arg6: memref<256x128xbf16, #tpu.memory_space<vmem>>, %arg7: memref<1x128xf32, #tpu.memory_space<vmem>>, %arg8: memref<8x128xf32, #tpu.memory_space<vmem>>) attributes {dimension_semantics = [#tpu.dimension_semantics<arbitrary>], iteration_bounds = array<i64: 1>, scalar_prefetch = 0 : i64, scratch_operands = 0 : i64, tpu.core_type = #tpu.core_type<tc>, window_params = [{pipeline_mode = #tpu.pipeline_mode<synchronous>, transform_indices = @transform_0, window_bounds = array<i64: 3, 8, 128>}, {pipeline_mode = #tpu.pipeline_mode<synchronous>, transform_indices = @transform_1, window_bounds = array<i64: 256, 512>}, {pipeline_mode = #tpu.pipeline_mode<synchronous>, transform_indices = @transform_2, window_bounds = array<i64: 1, 512>}, {pipeline_mode = #tpu.pipeline_mode<synchronous>, transform_indices = @transform_3, window_bounds = array<i64: 256, 512>}, {pipeline_mode = #tpu.pipeline_mode<synchronous>, transform_indices = @transform_4, window_bounds = array<i64: 1, 512>}, {pipeline_mode = #tpu.pipeline_mode<synchronous>, transform_indices = @transform_5, window_bounds = array<i64: 256, 128>}, {pipeline_mode = #tpu.pipeline_mode<synchronous>, transform_indices = @transform_6, window_bounds = array<i64: 1, 128>}, {pipeline_mode = #tpu.pipeline_mode<synchronous>, transform_indices = @transform_7, window_bounds = array<i64: 8, 128>}]} {
    %cst = arith.constant 0.000000e+00 : f32
    %0 = vector.broadcast %cst : f32 to vector<8x128xf32>
    %c0 = arith.constant 0 : index
    %c0_0 = arith.constant 0 : index
    %c0_1 = arith.constant 0 : index
    %1 = vector.load %arg1[%c0, %c0_0, %c0_1] : memref<3x8x128xbf16, #tpu.memory_space<vmem>>, vector<1x8x128xbf16>
    %2 = vector.shape_cast %1 : vector<1x8x128xbf16> to vector<8x128xbf16>
    %3 = arith.truncf %0 : vector<8x128xf32> to vector<8x128xbf16>
    %4 = tpu.concatenate %2, %3 in 1 : vector<8x128xbf16>, vector<8x128xbf16> -> vector<8x256xbf16>
    %c0_2 = arith.constant 0 : index
    %c0_3 = arith.constant 0 : index
    %5 = vector.load %arg2[%c0_2, %c0_3] : memref<256x512xbf16, #tpu.memory_space<vmem>>, vector<256x512xbf16>
    %cst_4 = arith.constant dense<0.000000e+00> : vector<8x512xf32>
    %6 = tpu.matmul %4, %5, %cst_4 {dimension_numbers = #tpu.dot_dimension_numbers<[1], [0], [0], [1], [0, 0, 1, 1], [], []>} : vector<8x256xbf16>, vector<256x512xbf16>, vector<8x512xf32> -> vector<8x512xf32>
    %c0_5 = arith.constant 0 : index
    %c0_6 = arith.constant 0 : index
    %7 = vector.load %arg3[%c0_5, %c0_6] : memref<1x512xf32, #tpu.memory_space<vmem>>, vector<1x512xf32>
    %8 = vector.broadcast %7 : vector<1x512xf32> to vector<8x512xf32>
    %9 = arith.addf %6, %8 : vector<8x512xf32>
    %10 = vector.extract_strided_slice %9 {offsets = [0, 0], sizes = [8, 128], strides = [1, 1]} : vector<8x512xf32> to vector<8x128xf32>
    %11 = arith.negf %10 : vector<8x128xf32>
    %12 = math.exp %11 : vector<8x128xf32>
    %cst_7 = arith.constant 1.000000e+00 : f32
    %13 = vector.broadcast %cst_7 : f32 to vector<8x128xf32>
    %14 = arith.addf %13, %12 : vector<8x128xf32>
    %15 = arith.divf %13, %14 : vector<8x128xf32>
    %16 = vector.extract_strided_slice %9 {offsets = [0, 128], sizes = [8, 128], strides = [1, 1]} : vector<8x512xf32> to vector<8x128xf32>
    %17 = arith.negf %16 : vector<8x128xf32>
    %18 = math.exp %17 : vector<8x128xf32>
    %cst_8 = arith.constant 1.000000e+00 : f32
    %19 = vector.broadcast %cst_8 : f32 to vector<8x128xf32>
    %20 = arith.addf %19, %18 : vector<8x128xf32>
    %21 = arith.divf %19, %20 : vector<8x128xf32>
    %22 = vector.extract_strided_slice %9 {offsets = [0, 256], sizes = [8, 128], strides = [1, 1]} : vector<8x512xf32> to vector<8x128xf32>
    %23 = math.tanh %22 : vector<8x128xf32>
    %24 = vector.extract_strided_slice %9 {offsets = [0, 384], sizes = [8, 128], strides = [1, 1]} : vector<8x512xf32> to vector<8x128xf32>
    %25 = arith.negf %24 : vector<8x128xf32>
    %26 = math.exp %25 : vector<8x128xf32>
    %cst_9 = arith.constant 1.000000e+00 : f32
    %27 = vector.broadcast %cst_9 : f32 to vector<8x128xf32>
    %28 = arith.addf %27, %26 : vector<8x128xf32>
    %29 = arith.divf %27, %28 : vector<8x128xf32>
    %30 = arith.mulf %21, %0 : vector<8x128xf32>
    %31 = arith.mulf %15, %23 : vector<8x128xf32>
    %32 = arith.addf %30, %31 : vector<8x128xf32>
    %33 = math.tanh %32 : vector<8x128xf32>
    %34 = arith.mulf %29, %33 : vector<8x128xf32>
    %c1 = arith.constant 1 : index
    %c0_10 = arith.constant 0 : index
    %c0_11 = arith.constant 0 : index
    %35 = vector.load %arg1[%c1, %c0_10, %c0_11] : memref<3x8x128xbf16, #tpu.memory_space<vmem>>, vector<1x8x128xbf16>
    %36 = vector.shape_cast %35 : vector<1x8x128xbf16> to vector<8x128xbf16>
    %37 = arith.truncf %34 : vector<8x128xf32> to vector<8x128xbf16>
    %38 = tpu.concatenate %36, %37 in 1 : vector<8x128xbf16>, vector<8x128xbf16> -> vector<8x256xbf16>
    %c0_12 = arith.constant 0 : index
    %c0_13 = arith.constant 0 : index
    %39 = vector.load %arg2[%c0_12, %c0_13] : memref<256x512xbf16, #tpu.memory_space<vmem>>, vector<256x512xbf16>
    %cst_14 = arith.constant dense<0.000000e+00> : vector<8x512xf32>
    %40 = tpu.matmul %38, %39, %cst_14 {dimension_numbers = #tpu.dot_dimension_numbers<[1], [0], [0], [1], [0, 0, 1, 1], [], []>} : vector<8x256xbf16>, vector<256x512xbf16>, vector<8x512xf32> -> vector<8x512xf32>
    %c0_15 = arith.constant 0 : index
    %c0_16 = arith.constant 0 : index
    %41 = vector.load %arg3[%c0_15, %c0_16] : memref<1x512xf32, #tpu.memory_space<vmem>>, vector<1x512xf32>
    %42 = vector.broadcast %41 : vector<1x512xf32> to vector<8x512xf32>
    %43 = arith.addf %40, %42 : vector<8x512xf32>
    %44 = vector.extract_strided_slice %43 {offsets = [0, 0], sizes = [8, 128], strides = [1, 1]} : vector<8x512xf32> to vector<8x128xf32>
    %45 = arith.negf %44 : vector<8x128xf32>
    %46 = math.exp %45 : vector<8x128xf32>
    %cst_17 = arith.constant 1.000000e+00 : f32
    %47 = vector.broadcast %cst_17 : f32 to vector<8x128xf32>
    %48 = arith.addf %47, %46 : vector<8x128xf32>
    %49 = arith.divf %47, %48 : vector<8x128xf32>
    %50 = vector.extract_strided_slice %43 {offsets = [0, 128], sizes = [8, 128], strides = [1, 1]} : vector<8x512xf32> to vector<8x128xf32>
    %51 = arith.negf %50 : vector<8x128xf32>
    %52 = math.exp %51 : vector<8x128xf32>
    %cst_18 = arith.constant 1.000000e+00 : f32
    %53 = vector.broadcast %cst_18 : f32 to vector<8x128xf32>
    %54 = arith.addf %53, %52 : vector<8x128xf32>
    %55 = arith.divf %53, %54 : vector<8x128xf32>
    %56 = vector.extract_strided_slice %43 {offsets = [0, 256], sizes = [8, 128], strides = [1, 1]} : vector<8x512xf32> to vector<8x128xf32>
    %57 = math.tanh %56 : vector<8x128xf32>
    %58 = vector.extract_strided_slice %43 {offsets = [0, 384], sizes = [8, 128], strides = [1, 1]} : vector<8x512xf32> to vector<8x128xf32>
    %59 = arith.negf %58 : vector<8x128xf32>
    %60 = math.exp %59 : vector<8x128xf32>
    %cst_19 = arith.constant 1.000000e+00 : f32
    %61 = vector.broadcast %cst_19 : f32 to vector<8x128xf32>
    %62 = arith.addf %61, %60 : vector<8x128xf32>
    %63 = arith.divf %61, %62 : vector<8x128xf32>
    %64 = arith.mulf %55, %32 : vector<8x128xf32>
    %65 = arith.mulf %49, %57 : vector<8x128xf32>
    %66 = arith.addf %64, %65 : vector<8x128xf32>
    %67 = math.tanh %66 : vector<8x128xf32>
    %68 = arith.mulf %63, %67 : vector<8x128xf32>
    %c2 = arith.constant 2 : index
    %c0_20 = arith.constant 0 : index
    %c0_21 = arith.constant 0 : index
    %69 = vector.load %arg1[%c2, %c0_20, %c0_21] : memref<3x8x128xbf16, #tpu.memory_space<vmem>>, vector<1x8x128xbf16>
    %70 = vector.shape_cast %69 : vector<1x8x128xbf16> to vector<8x128xbf16>
    %71 = arith.truncf %68 : vector<8x128xf32> to vector<8x128xbf16>
    %72 = tpu.concatenate %70, %71 in 1 : vector<8x128xbf16>, vector<8x128xbf16> -> vector<8x256xbf16>
    %c0_22 = arith.constant 0 : index
    %c0_23 = arith.constant 0 : index
    %73 = vector.load %arg2[%c0_22, %c0_23] : memref<256x512xbf16, #tpu.memory_space<vmem>>, vector<256x512xbf16>
    %cst_24 = arith.constant dense<0.000000e+00> : vector<8x512xf32>
    %74 = tpu.matmul %72, %73, %cst_24 {dimension_numbers = #tpu.dot_dimension_numbers<[1], [0], [0], [1], [0, 0, 1, 1], [], []>} : vector<8x256xbf16>, vector<256x512xbf16>, vector<8x512xf32> -> vector<8x512xf32>
    %c0_25 = arith.constant 0 : index
    %c0_26 = arith.constant 0 : index
    %75 = vector.load %arg3[%c0_25, %c0_26] : memref<1x512xf32, #tpu.memory_space<vmem>>, vector<1x512xf32>
    %76 = vector.broadcast %75 : vector<1x512xf32> to vector<8x512xf32>
    %77 = arith.addf %74, %76 : vector<8x512xf32>
    %78 = vector.extract_strided_slice %77 {offsets = [0, 0], sizes = [8, 128], strides = [1, 1]} : vector<8x512xf32> to vector<8x128xf32>
    %79 = arith.negf %78 : vector<8x128xf32>
    %80 = math.exp %79 : vector<8x128xf32>
    %cst_27 = arith.constant 1.000000e+00 : f32
    %81 = vector.broadcast %cst_27 : f32 to vector<8x128xf32>
    %82 = arith.addf %81, %80 : vector<8x128xf32>
    %83 = arith.divf %81, %82 : vector<8x128xf32>
    %84 = vector.extract_strided_slice %77 {offsets = [0, 128], sizes = [8, 128], strides = [1, 1]} : vector<8x512xf32> to vector<8x128xf32>
    %85 = arith.negf %84 : vector<8x128xf32>
    %86 = math.exp %85 : vector<8x128xf32>
    %cst_28 = arith.constant 1.000000e+00 : f32
    %87 = vector.broadcast %cst_28 : f32 to vector<8x128xf32>
    %88 = arith.addf %87, %86 : vector<8x128xf32>
    %89 = arith.divf %87, %88 : vector<8x128xf32>
    %90 = vector.extract_strided_slice %77 {offsets = [0, 256], sizes = [8, 128], strides = [1, 1]} : vector<8x512xf32> to vector<8x128xf32>
    %91 = math.tanh %90 : vector<8x128xf32>
    %92 = vector.extract_strided_slice %77 {offsets = [0, 384], sizes = [8, 128], strides = [1, 1]} : vector<8x512xf32> to vector<8x128xf32>
    %93 = arith.negf %92 : vector<8x128xf32>
    %94 = math.exp %93 : vector<8x128xf32>
    %cst_29 = arith.constant 1.000000e+00 : f32
    %95 = vector.broadcast %cst_29 : f32 to vector<8x128xf32>
    %96 = arith.addf %95, %94 : vector<8x128xf32>
    %97 = arith.divf %95, %96 : vector<8x128xf32>
    %98 = arith.mulf %89, %66 : vector<8x128xf32>
    %99 = arith.mulf %83, %91 : vector<8x128xf32>
    %100 = arith.addf %98, %99 : vector<8x128xf32>
    %101 = math.tanh %100 : vector<8x128xf32>
    %102 = arith.mulf %97, %101 : vector<8x128xf32>
    %c2_30 = arith.constant 2 : index
    %c0_31 = arith.constant 0 : index
    %c0_32 = arith.constant 0 : index
    %103 = vector.load %arg1[%c2_30, %c0_31, %c0_32] : memref<3x8x128xbf16, #tpu.memory_space<vmem>>, vector<1x8x128xbf16>
    %104 = vector.shape_cast %103 : vector<1x8x128xbf16> to vector<8x128xbf16>
    %105 = arith.truncf %0 : vector<8x128xf32> to vector<8x128xbf16>
    %106 = tpu.concatenate %104, %105 in 1 : vector<8x128xbf16>, vector<8x128xbf16> -> vector<8x256xbf16>
    %c0_33 = arith.constant 0 : index
    %c0_34 = arith.constant 0 : index
    %107 = vector.load %arg4[%c0_33, %c0_34] : memref<256x512xbf16, #tpu.memory_space<vmem>>, vector<256x512xbf16>
    %cst_35 = arith.constant dense<0.000000e+00> : vector<8x512xf32>
    %108 = tpu.matmul %106, %107, %cst_35 {dimension_numbers = #tpu.dot_dimension_numbers<[1], [0], [0], [1], [0, 0, 1, 1], [], []>} : vector<8x256xbf16>, vector<256x512xbf16>, vector<8x512xf32> -> vector<8x512xf32>
    %c0_36 = arith.constant 0 : index
    %c0_37 = arith.constant 0 : index
    %109 = vector.load %arg5[%c0_36, %c0_37] : memref<1x512xf32, #tpu.memory_space<vmem>>, vector<1x512xf32>
    %110 = vector.broadcast %109 : vector<1x512xf32> to vector<8x512xf32>
    %111 = arith.addf %108, %110 : vector<8x512xf32>
    %112 = vector.extract_strided_slice %111 {offsets = [0, 0], sizes = [8, 128], strides = [1, 1]} : vector<8x512xf32> to vector<8x128xf32>
    %113 = arith.negf %112 : vector<8x128xf32>
    %114 = math.exp %113 : vector<8x128xf32>
    %cst_38 = arith.constant 1.000000e+00 : f32
    %115 = vector.broadcast %cst_38 : f32 to vector<8x128xf32>
    %116 = arith.addf %115, %114 : vector<8x128xf32>
    %117 = arith.divf %115, %116 : vector<8x128xf32>
    %118 = vector.extract_strided_slice %111 {offsets = [0, 128], sizes = [8, 128], strides = [1, 1]} : vector<8x512xf32> to vector<8x128xf32>
    %119 = arith.negf %118 : vector<8x128xf32>
    %120 = math.exp %119 : vector<8x128xf32>
    %cst_39 = arith.constant 1.000000e+00 : f32
    %121 = vector.broadcast %cst_39 : f32 to vector<8x128xf32>
    %122 = arith.addf %121, %120 : vector<8x128xf32>
    %123 = arith.divf %121, %122 : vector<8x128xf32>
    %124 = vector.extract_strided_slice %111 {offsets = [0, 256], sizes = [8, 128], strides = [1, 1]} : vector<8x512xf32> to vector<8x128xf32>
    %125 = math.tanh %124 : vector<8x128xf32>
    %126 = vector.extract_strided_slice %111 {offsets = [0, 384], sizes = [8, 128], strides = [1, 1]} : vector<8x512xf32> to vector<8x128xf32>
    %127 = arith.negf %126 : vector<8x128xf32>
    %128 = math.exp %127 : vector<8x128xf32>
    %cst_40 = arith.constant 1.000000e+00 : f32
    %129 = vector.broadcast %cst_40 : f32 to vector<8x128xf32>
    %130 = arith.addf %129, %128 : vector<8x128xf32>
    %131 = arith.divf %129, %130 : vector<8x128xf32>
    %132 = arith.mulf %123, %0 : vector<8x128xf32>
    %133 = arith.mulf %117, %125 : vector<8x128xf32>
    %134 = arith.addf %132, %133 : vector<8x128xf32>
    %135 = math.tanh %134 : vector<8x128xf32>
    %136 = arith.mulf %131, %135 : vector<8x128xf32>
    %137 = tpu.concatenate %102, %136 in 1 : vector<8x128xf32>, vector<8x128xf32> -> vector<8x256xf32>
    %138 = arith.truncf %137 : vector<8x256xf32> to vector<8x256xbf16>
    %c0_41 = arith.constant 0 : index
    %c0_42 = arith.constant 0 : index
    %139 = vector.load %arg6[%c0_41, %c0_42] : memref<256x128xbf16, #tpu.memory_space<vmem>>, vector<256x128xbf16>
    %cst_43 = arith.constant dense<0.000000e+00> : vector<8x128xf32>
    %140 = tpu.matmul %138, %139, %cst_43 {dimension_numbers = #tpu.dot_dimension_numbers<[1], [0], [0], [1], [0, 0, 1, 1], [], []>} : vector<8x256xbf16>, vector<256x128xbf16>, vector<8x128xf32> -> vector<8x128xf32>
    %c0_44 = arith.constant 0 : index
    %c0_45 = arith.constant 0 : index
    %141 = vector.load %arg7[%c0_44, %c0_45] : memref<1x128xf32, #tpu.memory_space<vmem>>, vector<1x128xf32>
    %142 = vector.broadcast %141 : vector<1x128xf32> to vector<8x128xf32>
    %143 = arith.addf %140, %142 : vector<8x128xf32>
    %cst_46 = arith.constant 0.000000e+00 : f32
    %144 = vector.broadcast %cst_46 : f32 to vector<8x128xf32>
    %145 = arith.maximumf %143, %144 : vector<8x128xf32>
    %c0_47 = arith.constant 0 : index
    %c0_48 = arith.constant 0 : index
    %146 = vector.load %arg8[%c0_47, %c0_48] : memref<8x128xf32, #tpu.memory_space<vmem>>, vector<8x128xf32>
    tpu.vector_store %arg8[%c0_47, %c0_48], %145 {strides = array<i32>} : memref<8x128xf32, #tpu.memory_space<vmem>>, vector<8x128xf32>,
    return
  }
  func.func @transform_0(%arg0: i32) -> (i32, i32, i32) {
    %c0_i32 = arith.constant 0 : i32
    %c0_i32_0 = arith.constant 0 : i32
    %c0_i32_1 = arith.constant 0 : i32
    %c0_i32_2 = arith.constant 0 : i32
    return %c0_i32, %c0_i32_0, %c0_i32_1 : i32, i32, i32
  }
  func.func @transform_1(%arg0: i32) -> (i32, i32) {
    %c0_i32 = arith.constant 0 : i32
    %c0_i32_0 = arith.constant 0 : i32
    %c0_i32_1 = arith.constant 0 : i32
    return %c0_i32, %c0_i32_0 : i32, i32
  }
  func.func @transform_2(%arg0: i32) -> (i32, i32) {
    %c0_i32 = arith.constant 0 : i32
    %c0_i32_0 = arith.constant 0 : i32
    %c0_i32_1 = arith.constant 0 : i32
    return %c0_i32, %c0_i32_0 : i32, i32
  }
  func.func @transform_3(%arg0: i32) -> (i32, i32) {
    %c0_i32 = arith.constant 0 : i32
    %c0_i32_0 = arith.constant 0 : i32
    %c0_i32_1 = arith.constant 0 : i32
    return %c0_i32, %c0_i32_0 : i32, i32
  }
  func.func @transform_4(%arg0: i32) -> (i32, i32) {
    %c0_i32 = arith.constant 0 : i32
    %c0_i32_0 = arith.constant 0 : i32
    %c0_i32_1 = arith.constant 0 : i32
    return %c0_i32, %c0_i32_0 : i32, i32
  }
  func.func @transform_5(%arg0: i32) -> (i32, i32) {
    %c0_i32 = arith.constant 0 : i32
    %c0_i32_0 = arith.constant 0 : i32
    %c0_i32_1 = arith.constant 0 : i32
    return %c0_i32, %c0_i32_0 : i32, i32
  }
  func.func @transform_6(%arg0: i32) -> (i32, i32) {
    %c0_i32 = arith.constant 0 : i32
    %c0_i32_0 = arith.constant 0 : i32
    %c0_i32_1 = arith.constant 0 : i32
    return %c0_i32, %c0_i32_0 : i32, i32
  }
  func.func @transform_7(%arg0: i32) -> (i32, i32) {
    %c0_i32 = arith.constant 0 : i32
    %c0_i32_0 = arith.constant 0 : i32
    %c0_i32_1 = arith.constant 0 : i32
    return %c0_i32, %c0_i32_0 : i32, i32
  }
}

module attributes {stable_mosaic.version = 11 : i64} {
  func.func @_bilstm_dir_kernel(%arg0: i32, %arg1: memref<4x2x256xbf16, #tpu.memory_space<vmem>>, %arg2: memref<1x384x512xbf16, #tpu.memory_space<vmem>>, %arg3: memref<1x1x512xf32, #tpu.memory_space<vmem>>, %arg4: memref<4x2x128xf32, #tpu.memory_space<vmem>>) attributes {dimension_semantics = [#tpu.dimension_semantics<parallel>], iteration_bounds = array<i64: 2>, scalar_prefetch = 0 : i64, scratch_operands = 0 : i64, tpu.core_type = #tpu.core_type<tc>, window_params = [{pipeline_mode = #tpu.pipeline_mode<synchronous>, transform_indices = @transform_0, window_bounds = array<i64: 4, 2, 256>}, {transform_indices = @transform_1, window_bounds = array<i64: 1, 384, 512>}, {transform_indices = @transform_2, window_bounds = array<i64: 1, 1, 512>}, {transform_indices = @transform_3, window_bounds = array<i64: 4, 2, 128>}]} {
    %c1_i32 = arith.constant 1 : i32
    %0 = arith.cmpi eq, %arg0, %c1_i32 : i32
    %cst = arith.constant 0.000000e+00 : f32
    %1 = vector.broadcast %cst : f32 to vector<2x128xf32>
    %c3_i32 = arith.constant 3 : i32
    %c0_i32 = arith.constant 0 : i32
    %2 = arith.select %0, %c3_i32, %c0_i32 : i32
    %3 = arith.index_cast %2 : i32 to index
    %c0 = arith.constant 0 : index
    %c0_0 = arith.constant 0 : index
    %4 = vector.load %arg1[%3, %c0, %c0_0] : memref<4x2x256xbf16, #tpu.memory_space<vmem>>, vector<1x2x256xbf16>
    %5 = vector.shape_cast %4 : vector<1x2x256xbf16> to vector<2x256xbf16>
    %6 = arith.truncf %1 : vector<2x128xf32> to vector<2x128xbf16>
    %7 = tpu.concatenate %5, %6 in 1 : vector<2x256xbf16>, vector<2x128xbf16> -> vector<2x384xbf16>
    %c0_1 = arith.constant 0 : index
    %c0_2 = arith.constant 0 : index
    %c0_3 = arith.constant 0 : index
    %8 = vector.load %arg2[%c0_1, %c0_2, %c0_3] : memref<1x384x512xbf16, #tpu.memory_space<vmem>>, vector<1x384x512xbf16>
    %9 = vector.shape_cast %8 : vector<1x384x512xbf16> to vector<384x512xbf16>
    %cst_4 = arith.constant dense<0.000000e+00> : vector<2x512xf32>
    %10 = tpu.matmul %7, %9, %cst_4 {dimension_numbers = #tpu.dot_dimension_numbers<[1], [0], [0], [1], [0, 0, 1, 1], [], []>} : vector<2x384xbf16>, vector<384x512xbf16>, vector<2x512xf32> -> vector<2x512xf32>
    %c0_5 = arith.constant 0 : index
    %c0_6 = arith.constant 0 : index
    %c0_7 = arith.constant 0 : index
    %11 = vector.load %arg3[%c0_5, %c0_6, %c0_7] : memref<1x1x512xf32, #tpu.memory_space<vmem>>, vector<1x1x512xf32>
    %12 = vector.shape_cast %11 : vector<1x1x512xf32> to vector<1x512xf32>
    %13 = vector.broadcast %12 : vector<1x512xf32> to vector<2x512xf32>
    %14 = arith.addf %10, %13 : vector<2x512xf32>
    %15 = vector.extract_strided_slice %14 {offsets = [0, 0], sizes = [2, 128], strides = [1, 1]} : vector<2x512xf32> to vector<2x128xf32>
    %16 = arith.negf %15 : vector<2x128xf32>
    %17 = math.exp %16 : vector<2x128xf32>
    %cst_8 = arith.constant 1.000000e+00 : f32
    %18 = vector.broadcast %cst_8 : f32 to vector<2x128xf32>
    %19 = arith.addf %18, %17 : vector<2x128xf32>
    %20 = arith.divf %18, %19 : vector<2x128xf32>
    %21 = vector.extract_strided_slice %14 {offsets = [0, 128], sizes = [2, 128], strides = [1, 1]} : vector<2x512xf32> to vector<2x128xf32>
    %22 = arith.negf %21 : vector<2x128xf32>
    %23 = math.exp %22 : vector<2x128xf32>
    %cst_9 = arith.constant 1.000000e+00 : f32
    %24 = vector.broadcast %cst_9 : f32 to vector<2x128xf32>
    %25 = arith.addf %24, %23 : vector<2x128xf32>
    %26 = arith.divf %24, %25 : vector<2x128xf32>
    %27 = vector.extract_strided_slice %14 {offsets = [0, 256], sizes = [2, 128], strides = [1, 1]} : vector<2x512xf32> to vector<2x128xf32>
    %28 = math.tanh %27 : vector<2x128xf32>
    %29 = vector.extract_strided_slice %14 {offsets = [0, 384], sizes = [2, 128], strides = [1, 1]} : vector<2x512xf32> to vector<2x128xf32>
    %30 = arith.negf %29 : vector<2x128xf32>
    %31 = math.exp %30 : vector<2x128xf32>
    %cst_10 = arith.constant 1.000000e+00 : f32
    %32 = vector.broadcast %cst_10 : f32 to vector<2x128xf32>
    %33 = arith.addf %32, %31 : vector<2x128xf32>
    %34 = arith.divf %32, %33 : vector<2x128xf32>
    %35 = arith.mulf %26, %1 : vector<2x128xf32>
    %36 = arith.mulf %20, %28 : vector<2x128xf32>
    %37 = arith.addf %35, %36 : vector<2x128xf32>
    %38 = math.tanh %37 : vector<2x128xf32>
    %39 = arith.mulf %34, %38 : vector<2x128xf32>
    %40 = arith.index_cast %2 : i32 to index
    %c0_11 = arith.constant 0 : index
    %c0_12 = arith.constant 0 : index
    %41 = vector.load %arg4[%40, %c0_11, %c0_12] : memref<4x2x128xf32, #tpu.memory_space<vmem>>, vector<1x2x128xf32>
    %42 = vector.shape_cast %41 : vector<1x2x128xf32> to vector<2x128xf32>
    %43 = vector.shape_cast %39 : vector<2x128xf32> to vector<1x2x128xf32>
    tpu.vector_store %arg4[%40, %c0_11, %c0_12], %43 {strides = array<i32>} : memref<4x2x128xf32, #tpu.memory_space<vmem>>, vector<1x2x128xf32>,
    %c2_i32 = arith.constant 2 : i32
    %c1_i32_13 = arith.constant 1 : i32
    %44 = arith.select %0, %c2_i32, %c1_i32_13 : i32
    %45 = arith.index_cast %44 : i32 to index
    %c0_14 = arith.constant 0 : index
    %c0_15 = arith.constant 0 : index
    %46 = vector.load %arg1[%45, %c0_14, %c0_15] : memref<4x2x256xbf16, #tpu.memory_space<vmem>>, vector<1x2x256xbf16>
    %47 = vector.shape_cast %46 : vector<1x2x256xbf16> to vector<2x256xbf16>
    %48 = arith.truncf %39 : vector<2x128xf32> to vector<2x128xbf16>
    %49 = tpu.concatenate %47, %48 in 1 : vector<2x256xbf16>, vector<2x128xbf16> -> vector<2x384xbf16>
    %c0_16 = arith.constant 0 : index
    %c0_17 = arith.constant 0 : index
    %c0_18 = arith.constant 0 : index
    %50 = vector.load %arg2[%c0_16, %c0_17, %c0_18] : memref<1x384x512xbf16, #tpu.memory_space<vmem>>, vector<1x384x512xbf16>
    %51 = vector.shape_cast %50 : vector<1x384x512xbf16> to vector<384x512xbf16>
    %cst_19 = arith.constant dense<0.000000e+00> : vector<2x512xf32>
    %52 = tpu.matmul %49, %51, %cst_19 {dimension_numbers = #tpu.dot_dimension_numbers<[1], [0], [0], [1], [0, 0, 1, 1], [], []>} : vector<2x384xbf16>, vector<384x512xbf16>, vector<2x512xf32> -> vector<2x512xf32>
    %c0_20 = arith.constant 0 : index
    %c0_21 = arith.constant 0 : index
    %c0_22 = arith.constant 0 : index
    %53 = vector.load %arg3[%c0_20, %c0_21, %c0_22] : memref<1x1x512xf32, #tpu.memory_space<vmem>>, vector<1x1x512xf32>
    %54 = vector.shape_cast %53 : vector<1x1x512xf32> to vector<1x512xf32>
    %55 = vector.broadcast %54 : vector<1x512xf32> to vector<2x512xf32>
    %56 = arith.addf %52, %55 : vector<2x512xf32>
    %57 = vector.extract_strided_slice %56 {offsets = [0, 0], sizes = [2, 128], strides = [1, 1]} : vector<2x512xf32> to vector<2x128xf32>
    %58 = arith.negf %57 : vector<2x128xf32>
    %59 = math.exp %58 : vector<2x128xf32>
    %cst_23 = arith.constant 1.000000e+00 : f32
    %60 = vector.broadcast %cst_23 : f32 to vector<2x128xf32>
    %61 = arith.addf %60, %59 : vector<2x128xf32>
    %62 = arith.divf %60, %61 : vector<2x128xf32>
    %63 = vector.extract_strided_slice %56 {offsets = [0, 128], sizes = [2, 128], strides = [1, 1]} : vector<2x512xf32> to vector<2x128xf32>
    %64 = arith.negf %63 : vector<2x128xf32>
    %65 = math.exp %64 : vector<2x128xf32>
    %cst_24 = arith.constant 1.000000e+00 : f32
    %66 = vector.broadcast %cst_24 : f32 to vector<2x128xf32>
    %67 = arith.addf %66, %65 : vector<2x128xf32>
    %68 = arith.divf %66, %67 : vector<2x128xf32>
    %69 = vector.extract_strided_slice %56 {offsets = [0, 256], sizes = [2, 128], strides = [1, 1]} : vector<2x512xf32> to vector<2x128xf32>
    %70 = math.tanh %69 : vector<2x128xf32>
    %71 = vector.extract_strided_slice %56 {offsets = [0, 384], sizes = [2, 128], strides = [1, 1]} : vector<2x512xf32> to vector<2x128xf32>
    %72 = arith.negf %71 : vector<2x128xf32>
    %73 = math.exp %72 : vector<2x128xf32>
    %cst_25 = arith.constant 1.000000e+00 : f32
    %74 = vector.broadcast %cst_25 : f32 to vector<2x128xf32>
    %75 = arith.addf %74, %73 : vector<2x128xf32>
    %76 = arith.divf %74, %75 : vector<2x128xf32>
    %77 = arith.mulf %68, %37 : vector<2x128xf32>
    %78 = arith.mulf %62, %70 : vector<2x128xf32>
    %79 = arith.addf %77, %78 : vector<2x128xf32>
    %80 = math.tanh %79 : vector<2x128xf32>
    %81 = arith.mulf %76, %80 : vector<2x128xf32>
    %82 = arith.index_cast %44 : i32 to index
    %c0_26 = arith.constant 0 : index
    %c0_27 = arith.constant 0 : index
    %83 = vector.load %arg4[%82, %c0_26, %c0_27] : memref<4x2x128xf32, #tpu.memory_space<vmem>>, vector<1x2x128xf32>
    %84 = vector.shape_cast %83 : vector<1x2x128xf32> to vector<2x128xf32>
    %85 = vector.shape_cast %81 : vector<2x128xf32> to vector<1x2x128xf32>
    tpu.vector_store %arg4[%82, %c0_26, %c0_27], %85 {strides = array<i32>} : memref<4x2x128xf32, #tpu.memory_space<vmem>>, vector<1x2x128xf32>,
    %c1_i32_28 = arith.constant 1 : i32
    %c2_i32_29 = arith.constant 2 : i32
    %86 = arith.select %0, %c1_i32_28, %c2_i32_29 : i32
    %87 = arith.index_cast %86 : i32 to index
    %c0_30 = arith.constant 0 : index
    %c0_31 = arith.constant 0 : index
    %88 = vector.load %arg1[%87, %c0_30, %c0_31] : memref<4x2x256xbf16, #tpu.memory_space<vmem>>, vector<1x2x256xbf16>
    %89 = vector.shape_cast %88 : vector<1x2x256xbf16> to vector<2x256xbf16>
    %90 = arith.truncf %81 : vector<2x128xf32> to vector<2x128xbf16>
    %91 = tpu.concatenate %89, %90 in 1 : vector<2x256xbf16>, vector<2x128xbf16> -> vector<2x384xbf16>
    %c0_32 = arith.constant 0 : index
    %c0_33 = arith.constant 0 : index
    %c0_34 = arith.constant 0 : index
    %92 = vector.load %arg2[%c0_32, %c0_33, %c0_34] : memref<1x384x512xbf16, #tpu.memory_space<vmem>>, vector<1x384x512xbf16>
    %93 = vector.shape_cast %92 : vector<1x384x512xbf16> to vector<384x512xbf16>
    %cst_35 = arith.constant dense<0.000000e+00> : vector<2x512xf32>
    %94 = tpu.matmul %91, %93, %cst_35 {dimension_numbers = #tpu.dot_dimension_numbers<[1], [0], [0], [1], [0, 0, 1, 1], [], []>} : vector<2x384xbf16>, vector<384x512xbf16>, vector<2x512xf32> -> vector<2x512xf32>
    %c0_36 = arith.constant 0 : index
    %c0_37 = arith.constant 0 : index
    %c0_38 = arith.constant 0 : index
    %95 = vector.load %arg3[%c0_36, %c0_37, %c0_38] : memref<1x1x512xf32, #tpu.memory_space<vmem>>, vector<1x1x512xf32>
    %96 = vector.shape_cast %95 : vector<1x1x512xf32> to vector<1x512xf32>
    %97 = vector.broadcast %96 : vector<1x512xf32> to vector<2x512xf32>
    %98 = arith.addf %94, %97 : vector<2x512xf32>
    %99 = vector.extract_strided_slice %98 {offsets = [0, 0], sizes = [2, 128], strides = [1, 1]} : vector<2x512xf32> to vector<2x128xf32>
    %100 = arith.negf %99 : vector<2x128xf32>
    %101 = math.exp %100 : vector<2x128xf32>
    %cst_39 = arith.constant 1.000000e+00 : f32
    %102 = vector.broadcast %cst_39 : f32 to vector<2x128xf32>
    %103 = arith.addf %102, %101 : vector<2x128xf32>
    %104 = arith.divf %102, %103 : vector<2x128xf32>
    %105 = vector.extract_strided_slice %98 {offsets = [0, 128], sizes = [2, 128], strides = [1, 1]} : vector<2x512xf32> to vector<2x128xf32>
    %106 = arith.negf %105 : vector<2x128xf32>
    %107 = math.exp %106 : vector<2x128xf32>
    %cst_40 = arith.constant 1.000000e+00 : f32
    %108 = vector.broadcast %cst_40 : f32 to vector<2x128xf32>
    %109 = arith.addf %108, %107 : vector<2x128xf32>
    %110 = arith.divf %108, %109 : vector<2x128xf32>
    %111 = vector.extract_strided_slice %98 {offsets = [0, 256], sizes = [2, 128], strides = [1, 1]} : vector<2x512xf32> to vector<2x128xf32>
    %112 = math.tanh %111 : vector<2x128xf32>
    %113 = vector.extract_strided_slice %98 {offsets = [0, 384], sizes = [2, 128], strides = [1, 1]} : vector<2x512xf32> to vector<2x128xf32>
    %114 = arith.negf %113 : vector<2x128xf32>
    %115 = math.exp %114 : vector<2x128xf32>
    %cst_41 = arith.constant 1.000000e+00 : f32
    %116 = vector.broadcast %cst_41 : f32 to vector<2x128xf32>
    %117 = arith.addf %116, %115 : vector<2x128xf32>
    %118 = arith.divf %116, %117 : vector<2x128xf32>
    %119 = arith.mulf %110, %79 : vector<2x128xf32>
    %120 = arith.mulf %104, %112 : vector<2x128xf32>
    %121 = arith.addf %119, %120 : vector<2x128xf32>
    %122 = math.tanh %121 : vector<2x128xf32>
    %123 = arith.mulf %118, %122 : vector<2x128xf32>
    %124 = arith.index_cast %86 : i32 to index
    %c0_42 = arith.constant 0 : index
    %c0_43 = arith.constant 0 : index
    %125 = vector.load %arg4[%124, %c0_42, %c0_43] : memref<4x2x128xf32, #tpu.memory_space<vmem>>, vector<1x2x128xf32>
    %126 = vector.shape_cast %125 : vector<1x2x128xf32> to vector<2x128xf32>
    %127 = vector.shape_cast %123 : vector<2x128xf32> to vector<1x2x128xf32>
    tpu.vector_store %arg4[%124, %c0_42, %c0_43], %127 {strides = array<i32>} : memref<4x2x128xf32, #tpu.memory_space<vmem>>, vector<1x2x128xf32>,
    %c0_i32_44 = arith.constant 0 : i32
    %c3_i32_45 = arith.constant 3 : i32
    %128 = arith.select %0, %c0_i32_44, %c3_i32_45 : i32
    %129 = arith.index_cast %128 : i32 to index
    %c0_46 = arith.constant 0 : index
    %c0_47 = arith.constant 0 : index
    %130 = vector.load %arg1[%129, %c0_46, %c0_47] : memref<4x2x256xbf16, #tpu.memory_space<vmem>>, vector<1x2x256xbf16>
    %131 = vector.shape_cast %130 : vector<1x2x256xbf16> to vector<2x256xbf16>
    %132 = arith.truncf %123 : vector<2x128xf32> to vector<2x128xbf16>
    %133 = tpu.concatenate %131, %132 in 1 : vector<2x256xbf16>, vector<2x128xbf16> -> vector<2x384xbf16>
    %c0_48 = arith.constant 0 : index
    %c0_49 = arith.constant 0 : index
    %c0_50 = arith.constant 0 : index
    %134 = vector.load %arg2[%c0_48, %c0_49, %c0_50] : memref<1x384x512xbf16, #tpu.memory_space<vmem>>, vector<1x384x512xbf16>
    %135 = vector.shape_cast %134 : vector<1x384x512xbf16> to vector<384x512xbf16>
    %cst_51 = arith.constant dense<0.000000e+00> : vector<2x512xf32>
    %136 = tpu.matmul %133, %135, %cst_51 {dimension_numbers = #tpu.dot_dimension_numbers<[1], [0], [0], [1], [0, 0, 1, 1], [], []>} : vector<2x384xbf16>, vector<384x512xbf16>, vector<2x512xf32> -> vector<2x512xf32>
    %c0_52 = arith.constant 0 : index
    %c0_53 = arith.constant 0 : index
    %c0_54 = arith.constant 0 : index
    %137 = vector.load %arg3[%c0_52, %c0_53, %c0_54] : memref<1x1x512xf32, #tpu.memory_space<vmem>>, vector<1x1x512xf32>
    %138 = vector.shape_cast %137 : vector<1x1x512xf32> to vector<1x512xf32>
    %139 = vector.broadcast %138 : vector<1x512xf32> to vector<2x512xf32>
    %140 = arith.addf %136, %139 : vector<2x512xf32>
    %141 = vector.extract_strided_slice %140 {offsets = [0, 0], sizes = [2, 128], strides = [1, 1]} : vector<2x512xf32> to vector<2x128xf32>
    %142 = arith.negf %141 : vector<2x128xf32>
    %143 = math.exp %142 : vector<2x128xf32>
    %cst_55 = arith.constant 1.000000e+00 : f32
    %144 = vector.broadcast %cst_55 : f32 to vector<2x128xf32>
    %145 = arith.addf %144, %143 : vector<2x128xf32>
    %146 = arith.divf %144, %145 : vector<2x128xf32>
    %147 = vector.extract_strided_slice %140 {offsets = [0, 128], sizes = [2, 128], strides = [1, 1]} : vector<2x512xf32> to vector<2x128xf32>
    %148 = arith.negf %147 : vector<2x128xf32>
    %149 = math.exp %148 : vector<2x128xf32>
    %cst_56 = arith.constant 1.000000e+00 : f32
    %150 = vector.broadcast %cst_56 : f32 to vector<2x128xf32>
    %151 = arith.addf %150, %149 : vector<2x128xf32>
    %152 = arith.divf %150, %151 : vector<2x128xf32>
    %153 = vector.extract_strided_slice %140 {offsets = [0, 256], sizes = [2, 128], strides = [1, 1]} : vector<2x512xf32> to vector<2x128xf32>
    %154 = math.tanh %153 : vector<2x128xf32>
    %155 = vector.extract_strided_slice %140 {offsets = [0, 384], sizes = [2, 128], strides = [1, 1]} : vector<2x512xf32> to vector<2x128xf32>
    %156 = arith.negf %155 : vector<2x128xf32>
    %157 = math.exp %156 : vector<2x128xf32>
    %cst_57 = arith.constant 1.000000e+00 : f32
    %158 = vector.broadcast %cst_57 : f32 to vector<2x128xf32>
    %159 = arith.addf %158, %157 : vector<2x128xf32>
    %160 = arith.divf %158, %159 : vector<2x128xf32>
    %161 = arith.mulf %152, %121 : vector<2x128xf32>
    %162 = arith.mulf %146, %154 : vector<2x128xf32>
    %163 = arith.addf %161, %162 : vector<2x128xf32>
    %164 = math.tanh %163 : vector<2x128xf32>
    %165 = arith.mulf %160, %164 : vector<2x128xf32>
    %166 = arith.index_cast %128 : i32 to index
    %c0_58 = arith.constant 0 : index
    %c0_59 = arith.constant 0 : index
    %167 = vector.load %arg4[%166, %c0_58, %c0_59] : memref<4x2x128xf32, #tpu.memory_space<vmem>>, vector<1x2x128xf32>
    %168 = vector.shape_cast %167 : vector<1x2x128xf32> to vector<2x128xf32>
    %169 = vector.shape_cast %165 : vector<2x128xf32> to vector<1x2x128xf32>
    tpu.vector_store %arg4[%166, %c0_58, %c0_59], %169 {strides = array<i32>} : memref<4x2x128xf32, #tpu.memory_space<vmem>>, vector<1x2x128xf32>,
    return
  }
  func.func @transform_0(%arg0: i32) -> (i32, i32, i32) {
    %c0_i32 = arith.constant 0 : i32
    %c0_i32_0 = arith.constant 0 : i32
    %c0_i32_1 = arith.constant 0 : i32
    %c0_i32_2 = arith.constant 0 : i32
    return %c0_i32, %c0_i32_0, %c0_i32_1 : i32, i32, i32
  }
  func.func @transform_1(%arg0: i32) -> (i32, i32, i32) {
    %c0_i32 = arith.constant 0 : i32
    %c0_i32_0 = arith.constant 0 : i32
    %c0_i32_1 = arith.constant 0 : i32
    return %arg0, %c0_i32, %c0_i32_0 : i32, i32, i32
  }
  func.func @transform_2(%arg0: i32) -> (i32, i32, i32) {
    %c0_i32 = arith.constant 0 : i32
    %c0_i32_0 = arith.constant 0 : i32
    %c0_i32_1 = arith.constant 0 : i32
    return %arg0, %c0_i32, %c0_i32_0 : i32, i32, i32
  }
  func.func @transform_3(%arg0: i32) -> (i32, i32, i32) {
    %c0_i32 = arith.constant 0 : i32
    %c0_i32_0 = arith.constant 0 : i32
    %c0_i32_1 = arith.constant 0 : i32
    return %c0_i32, %c0_i32_0, %arg0 : i32, i32, i32
  }
}

</mosaic_0001>

<bundles_post_ra>
// kernel: lstm_forward.5
= control target key start
LH: loop header
LB: loop body
LE: loop exit
PB: predicated region body
PF: predicated region fallthrough
CT: control target
= control target key end

     0   :  { %s357_s1 = inlined_call_operand.vmem [shape: bf16[256,128], index: 1, kind: input, shape index: {}]   ;;  %s358_s2 = inlined_call_operand.vmem [shape: f32[1,128], index: 2, kind: input, shape index: {}]   ;;  %s359_s0 = inlined_call_operand.vmem [shape: bf16[8,256], index: 0, kind: input, shape index: {}]   ;;  %s360_s3 = inlined_call_operand.vmem [shape: f32[8,128], index: 3, kind: output, shape index: {}]  }
   0x1   :  { %v266_v0 = vld [vmem:[%s357_s1 + $0x38] sm:$0xff]  ;;  %v265_v2 = vld [vmem:[%s357_s1 + $0x30] sm:$0xff]  ;;  %v264_v4 = vld [vmem:[%s357_s1 + $0x28] sm:$0xff] }
   0x2   :  { %v274_v1 = vld [vmem:[%s357_s1 + $0x78] sm:$0xff]  ;;  %154 = vmatpush.bf16.msra.mxu0 %v266_v0  ;;  %v273_v3 = vld [vmem:[%s357_s1 + $0x70] sm:$0xff]  ;;  %v272_v5 = vld [vmem:[%s357_s1 + $0x68] sm:$0xff] }
   0x3   :  { %167 = vmatpush.bf16.msra.mxu1 %v274_v1  ;;  %v263_v6 = vld [vmem:[%s357_s1 + $0x20] sm:$0xff]  ;;  %v262_v8 = vld [vmem:[%s357_s1 + $0x18] sm:$0xff]  ;;  %v261_v10 = vld [vmem:[%s357_s1 + $0x10] sm:$0xff] }
   0x4   :  { %v271_v7 = vld [vmem:[%s357_s1 + $0x60] sm:$0xff]  ;;  %v270_v9 = vld [vmem:[%s357_s1 + $0x58] sm:$0xff]  ;;  %v269_v11 = vld [vmem:[%s357_s1 + $0x50] sm:$0xff] }
   0x5   :  { %v260_v12 = vld [vmem:[%s357_s1 + $0x8] sm:$0xff]  ;;  %v14_v14 = vld [vmem:[%s359_s0] sm:$0xff] }
   0x6   :  { %155 = vmatpush.bf16.msra.mxu0 %v265_v2  ;;  %v268_v13 = vld [vmem:[%s357_s1 + $0x48] sm:$0xff]  ;;  %v52_v15 = vunpack.c.l.b16 %v14_v14  ;;  %v53_v16 = vunpack.c.h.b16 %v14_v14  ;;  %v259_v17 = vld [vmem:[%s357_s1] sm:$0xff] }
   0x7   :  { %168 = vmatpush.bf16.msra.mxu1 %v273_v3  ;;  %v267_v18 = vld [vmem:[%s357_s1 + $0x40] sm:$0xff] }
   0x8   :  { %v54_v19 = vpack.c.b16 %v52_v15, %v52_v15  ;;  %v55_v20 = vpack.c.b16 %v53_v16, %v53_v16  ;;  %v275_v21 = vld [vmem:[%s358_s2] ss:$0 sm:$0xff] }
   0xa   :  { %156 = vmatpush.bf16.msra.mxu0 %v264_v4 }
   0xb   :  { %169 = vmatpush.bf16.msra.mxu1 %v272_v5 }
   0xe   :  { %157 = vmatpush.bf16.msra.mxu0 %v263_v6 }
   0xf   :  { %170 = vmatpush.bf16.msra.mxu1 %v271_v7 }
  0x12   :  { %158 = vmatpush.bf16.msra.mxu0 %v262_v8 }
  0x13   :  { %171 = vmatpush.bf16.msra.mxu1 %v270_v9 }
  0x16   :  { %159 = vmatpush.bf16.msra.mxu0 %v261_v10 }
  0x17   :  { %172 = vmatpush.bf16.msra.mxu1 %v269_v11 }
  0x1a   :  { %160 = vmatpush.bf16.msra.mxu0 %v260_v12 }
  0x1b   :  { %173 = vmatpush.bf16.msra.mxu1 %v268_v13 }
  0x1e   :  { %161 = vmatpush.bf16.msra.mxu0 %v259_v17 }
  0x1f   :  { %174 = vmatpush.bf16.msra.mxu1 %v267_v18 }
  0x21   :  { %162 = vmatmul.bf16.vlgmr.msra.gmra.mxu0 %v54_v19 }
  0x22   :  { %175 = vmatmul.bf16.vlgmr.msra.gmra.mxu1 %v55_v20 }
  0x9e   :  { %v163_v22 = vpop.f32.mrf.mxu0 }
  0x9f   :  { %v176_v23 = vpop.f32.mrf.mxu1  ;;  %v164_v24 = vadd.f32 %v275_v21, %v163_v22 }
  0xa1   :  { %v177_v25 = vadd.f32 %v176_v23, %v164_v24 }
  0xa3   :  { %180 = vmax.xlane.f32.xlu0 %v177_v25 }
  0xa6   :  { %v165_v26 = vpop.f32.mrf.mxu0 }
  0xa7   :  { %v178_v27 = vpop.f32.mrf.mxu1 }
 0x116   :  { %v181_v28 = vpop.xlane.xlu0 %180 }
 0x117   :  { %v182_v29 = vsub.f32 %v177_v25, %v181_v28 }
 0x119   :  { %v183_v30 = vmul.f32 1.442695, %v182_v29 }
 0x11b   :  { %276 = vpow2.f32 %v183_v30 }
 0x121   :  { %v277_v31 = vpop.eup %276 }
 0x122   :  { %185 = vadd.xlane.f32.xlu0 %v277_v31 }
 0x195   :  { %v186_v32 = vpop.xlane.xlu0 %185 }
 0x196   :  { %278 = vlog2.f32 %v186_v32 }
 0x19c   :  { %v279_v33 = vpop.eup %278 }
 0x19d   :  { %v188_v34 = vmul.f32 0.6931472, %v279_v33 }
 0x19f   :  { %v189_v35 = vsub.f32 %v182_v29, %v188_v34 }
 0x1a1   :  { %190 = vst [vmem:[%s360_s3] sm:$0xff] %v189_v35 }

// kernel: lstm_forward.3
= control target key start
LH: loop header
LB: loop body
LE: loop exit
PB: predicated region body
PF: predicated region fallthrough
CT: control target
= control target key end

     0   :  { %12 = vsyncpa [#allocation3], 0  ;;  %s3141_s0 = inlined_call_operand.vmem [shape: bf16[3,8,128], index: 0, kind: input, shape index: {}]   ;;  %s3142_s1 = inlined_call_operand.hbm [shape: bf16[256,512], index: 1, kind: input, shape index: {}]   ;;  %s3143_s2 = inlined_call_operand.vmem [shape: f32[1,512], index: 2, kind: input, shape index: {}]   ;;  %s3144_s3 = inlined_call_operand.hbm [shape: bf16[256,512], index: 3, kind: input, shape index: {}]   ;;  %s3145_s4 = inlined_call_operand.vmem [shape: f32[1,512], index: 4, kind: input, shape index: {}]   ;;  %s3146_s5 = inlined_call_operand.vmem [shape: bf16[256,128], index: 5, kind: input, shape index: {}]   ;;  %s3147_s6 = inlined_call_operand.vmem [shape: f32[1,128], index: 6, kind: input, shape index: {}]   ;;  %s3148_s7 = inlined_call_operand.vmem [shape: f32[8,128], index: 7, kind: output, shape index: {}]  }
   0x1   :  { %s20_s26 = sshll.u32 %s3142_s1, 4  ;;  %s21_s26 = int_to_ptr.hbm [resolvable:$true] %s20_s26 }
   0x2   :  { %13 = vsyncpa [#allocation5], 0  ;;  %s2546_s27 = smov [#allocation2]   ;;  %s35_s8 = sshll.u32 %s3144_s3, 4  ;;  %s36_s8 = int_to_ptr.hbm [resolvable:$true] %s35_s8 }
   0x3   :  { %s22_s28 = sshll.u32 %s2546_s27, 4  ;;  %s2547_s9 = smov 256   ;;  %s23_s28 = int_to_ptr.vmem [resolvable:$true] %s22_s28 }
   0x4   :  { %s2548_s10 = smov 16   ;;  %s2549_s11 = smov [#allocation4]  }
   0x5   :  { %28 = dma.hbm_to_vmem [thread:$0]  %s21_s26, 8192, %s23_s28, [#allocation3], %s2547_s9, %s2547_s9, %s2548_s10  }
   0x6   :  { %s37_s12 = sshll.u32 %s2549_s11, 4  ;;  %s38_s12 = int_to_ptr.vmem [resolvable:$true] %s37_s12 }
   0x7   :  { %43 = dma.hbm_to_vmem [thread:$0]  %s36_s8, 8192, %s38_s12, [#allocation5], %s2547_s9, %s2547_s9, %s2548_s10  }
   0x8   :  { %2542 = dma.done.wait [#allocation3], 8192  }
   0x9   :  { %2543 = vsyncadd [#allocation3], 4294959104 }
   0xa   :  { %2544 = dma.done.wait [#allocation5], 8192  }
   0xb   :  { %2545 = vsyncadd [#allocation5], 4294959104  ;;  %v1804_v0 = vld [vmem:[#allocation2 + $0xe0] sm:$0xf]  ;;  %v2310_v1 = vld [vmem:[#allocation2 + $0xec] sm:$0xf0] }
   0xc   :  { %v2308_v2 = vld [vmem:[#allocation2 + $0xe4] sm:$0xf]  ;;  %v2597_v3 = vor.u32 %v2310_v1, %v1804_v0  ;;  %v1806_v4 = vld [vmem:[#allocation2 + $0xf0] sm:$0xf0]  ;;  %v1932_v9 = vld [vmem:[#allocation2 + $0x1e0] sm:$0xf] }
   0xd   :  { %v2340_v5 = vld [vmem:[#allocation2 + $0x1e4] sm:$0xf]  ;;  %v1934_v6 = vld [vmem:[#allocation2 + $0x1f0] sm:$0xf0]  ;;  %v2599_v7 = vor.u32 %v2308_v2, %v1806_v4  ;;  %v2342_v10 = vld [vmem:[#allocation2 + $0x1ec] sm:$0xf0] }
   0xe   :  { %v2601_v8 = vor.u32 %v2340_v5, %v1934_v6  ;;  %v1788_v11 = vld [vmem:[#allocation2 + $0xc0] sm:$0xf]  ;;  %454 = vmatpush.bf16.msra.mxu0 %v2597_v3  ;;  %v2604_v12 = vor.u32 %v2342_v10, %v1932_v9  ;;  %v2306_v13 = vld [vmem:[#allocation2 + $0xcc] sm:$0xf0]  ;;  %v2304_v14 = vld [vmem:[#allocation2 + $0xc4] sm:$0xf] }
   0xf   :  { %v1790_v15 = vld [vmem:[#allocation2 + $0xd0] sm:$0xf0]  ;;  %480 = vmatpush.bf16.msra.mxu2 %v2599_v7  ;;  %v2608_v16 = vor.u32 %v2306_v13, %v1788_v11  ;;  %v2336_v18 = vld [vmem:[#allocation2 + $0x1c4] sm:$0xf]  ;;  %v1916_v20 = vld [vmem:[#allocation2 + $0x1c0] sm:$0xf] }
  0x10   :  { %493 = vmatpush.bf16.msra.mxu3 %v2601_v8  ;;  %v2610_v17 = vor.u32 %v2304_v14, %v1790_v15  ;;  %v1918_v19 = vld [vmem:[#allocation2 + $0x1d0] sm:$0xf0]  ;;  %467 = vmatpush.bf16.msra.mxu1 %v2604_v12  ;;  %v2338_v22 = vld [vmem:[#allocation2 + $0x1cc] sm:$0xf0]  ;;  %v1772_v23 = vld [vmem:[#allocation2 + $0xa0] sm:$0xf] }
  0x11   :  { %v2613_v21 = vor.u32 %v2336_v18, %v1918_v19  ;;  %v2302_v24 = vld [vmem:[#allocation2 + $0xac] sm:$0xf0]  ;;  %v2615_v25 = vor.u32 %v2338_v22, %v1916_v20  ;;  %v2300_v26 = vld [vmem:[#allocation2 + $0xa4] sm:$0xf]  ;;  %v1774_v27 = vld [vmem:[#allocation2 + $0xb0] sm:$0xf0] }
  0x12   :  { %v2332_v28 = vld [vmem:[#allocation2 + $0x1a4] sm:$0xf]  ;;  %455 = vmatpush.bf16.msra.mxu0 %v2608_v16  ;;  %v2618_v29 = vor.u32 %v2302_v24, %v1772_v23  ;;  %v1902_v30 = vld [vmem:[#allocation2 + $0x1b0] sm:$0xf0]  ;;  %v1900_v31 = vld [vmem:[#allocation2 + $0x1a0] sm:$0xf]  ;;  %v2622_v33 = vor.u32 %v2300_v26, %v1774_v27 }
  0x13   :  { %v2334_v32 = vld [vmem:[#allocation2 + $0x1ac] sm:$0xf0]  ;;  %481 = vmatpush.bf16.msra.mxu2 %v2610_v17  ;;  %v2624_v34 = vor.u32 %v2332_v28, %v1902_v30  ;;  %v1756_v35 = vld [vmem:[#allocation2 + $0x80] sm:$0xf]  ;;  %v2296_v37 = vld [vmem:[#allocation2 + $0x84] sm:$0xf] }
  0x14   :  { %494 = vmatpush.bf16.msra.mxu3 %v2613_v21  ;;  %v2298_v36 = vld [vmem:[#allocation2 + $0x8c] sm:$0xf0]  ;;  %468 = vmatpush.bf16.msra.mxu1 %v2615_v25  ;;  %v2627_v38 = vor.u32 %v2334_v32, %v1900_v31  ;;  %v1758_v39 = vld [vmem:[#allocation2 + $0x90] sm:$0xf0]  ;;  %v2328_v40 = vld [vmem:[#allocation2 + $0x184] sm:$0xf] }
  0x15   :  { %v1886_v41 = vld [vmem:[#allocation2 + $0x190] sm:$0xf0]  ;;  %v1884_v42 = vld [vmem:[#allocation2 + $0x180] sm:$0xf]  ;;  %v2330_v43 = vld [vmem:[#allocation2 + $0x18c] sm:$0xf0]  ;;  %v2630_v44 = vor.u32 %v2298_v36, %v1756_v35  ;;  %v2634_v45 = vor.u32 %v2296_v37, %v1758_v39 }
  0x16   :  { %456 = vmatpush.bf16.msra.mxu0 %v2618_v29  ;;  %v2636_v46 = vor.u32 %v2328_v40, %v1886_v41  ;;  %v1740_v47 = vld [vmem:[#allocation2 + $0x60] sm:$0xf]  ;;  %v2294_v48 = vld [vmem:[#allocation2 + $0x6c] sm:$0xf0]  ;;  %v2292_v49 = vld [vmem:[#allocation2 + $0x64] sm:$0xf]  ;;  %v2639_v50 = vor.u32 %v2330_v43, %v1884_v42 }
  0x17   :  { %482 = vmatpush.bf16.msra.mxu2 %v2622_v33  ;;  %v1742_v51 = vld [vmem:[#allocation2 + $0x70] sm:$0xf0]  ;;  %v2324_v52 = vld [vmem:[#allocation2 + $0x164] sm:$0xf]  ;;  %v1868_v54 = vld [vmem:[#allocation2 + $0x160] sm:$0xf]  ;;  %v2642_v56 = vor.u32 %v2294_v48, %v1740_v47 }
  0x18   :  { %495 = vmatpush.bf16.msra.mxu3 %v2624_v34  ;;  %469 = vmatpush.bf16.msra.mxu1 %v2627_v38  ;;  %v1870_v53 = vld [vmem:[#allocation2 + $0x170] sm:$0xf0]  ;;  %v2326_v55 = vld [vmem:[#allocation2 + $0x16c] sm:$0xf0]  ;;  %v2646_v57 = vor.u32 %v2292_v49, %v1742_v51  ;;  %v1724_v59 = vld [vmem:[#allocation2 + $0x40] sm:$0xf] }
  0x19   :  { %v2648_v58 = vor.u32 %v2324_v52, %v1870_v53  ;;  %v2290_v60 = vld [vmem:[#allocation2 + $0x4c] sm:$0xf0]  ;;  %v2288_v61 = vld [vmem:[#allocation2 + $0x44] sm:$0xf]  ;;  %v2651_v62 = vor.u32 %v2326_v55, %v1868_v54  ;;  %v1726_v63 = vld [vmem:[#allocation2 + $0x50] sm:$0xf0] }
  0x1a   :  { %457 = vmatpush.bf16.msra.mxu0 %v2630_v44  ;;  %v2320_v0 = vld [vmem:[#allocation2 + $0x144] sm:$0xf]  ;;  %v1854_v1 = vld [vmem:[#allocation2 + $0x150] sm:$0xf0]  ;;  %v1852_v2 = vld [vmem:[#allocation2 + $0x140] sm:$0xf]  ;;  %v2654_v5 = vor.u32 %v2290_v60, %v1724_v59  ;;  %v2658_v6 = vor.u32 %v2288_v61, %v1726_v63 }
  0x1b   :  { %483 = vmatpush.bf16.msra.mxu2 %v2634_v45  ;;  %v2322_v4 = vld [vmem:[#allocation2 + $0x14c] sm:$0xf0]  ;;  %v2660_v9 = vor.u32 %v2320_v0, %v1854_v1  ;;  %v1708_v10 = vld [vmem:[#allocation2 + $0x20] sm:$0xf]  ;;  %v2284_v13 = vld [vmem:[#allocation2 + $0x24] sm:$0xf] }
  0x1c   :  { %496 = vmatpush.bf16.msra.mxu3 %v2636_v46  ;;  %470 = vmatpush.bf16.msra.mxu1 %v2639_v50  ;;  %v2286_v11 = vld [vmem:[#allocation2 + $0x2c] sm:$0xf0]  ;;  %v2663_v14 = vor.u32 %v2322_v4, %v1852_v2  ;;  %v1710_v15 = vld [vmem:[#allocation2 + $0x30] sm:$0xf0]  ;;  %v2316_v18 = vld [vmem:[#allocation2 + $0x124] sm:$0xf] }
  0x1d   :  { %v1838_v19 = vld [vmem:[#allocation2 + $0x130] sm:$0xf0]  ;;  %v1836_v20 = vld [vmem:[#allocation2 + $0x120] sm:$0xf]  ;;  %v2318_v22 = vld [vmem:[#allocation2 + $0x12c] sm:$0xf0]  ;;  %v2666_v23 = vor.u32 %v2286_v11, %v1708_v10  ;;  %v2670_v27 = vor.u32 %v2284_v13, %v1710_v15 }
  0x1e   :  { %458 = vmatpush.bf16.msra.mxu0 %v2642_v56  ;;  %v1692_v24 = vld [vmem:[#allocation2] sm:$0xf]  ;;  %v2282_v26 = vld [vmem:[#allocation2 + $0xc] sm:$0xf0]  ;;  %v2672_v28 = vor.u32 %v2316_v18, %v1838_v19  ;;  %v2280_v30 = vld [vmem:[#allocation2 + $0x4] sm:$0xf]  ;;  %v2675_v35 = vor.u32 %v2318_v22, %v1836_v20 }
  0x1f   :  { %484 = vmatpush.bf16.msra.mxu2 %v2646_v57  ;;  %v1694_v31 = vld [vmem:[#allocation2 + $0x10] sm:$0xf0]  ;;  %v2312_v32 = vld [vmem:[#allocation2 + $0x104] sm:$0xf]  ;;  %v1812_v37 = vld [vmem:[#allocation2 + $0xe8] sm:$0xf]  ;;  %v2678_v43 = vor.u32 %v2282_v26, %v1692_v24 }
  0x20   :  { %497 = vmatpush.bf16.msra.mxu3 %v2648_v58  ;;  %471 = vmatpush.bf16.msra.mxu1 %v2651_v62  ;;  %3196 = vst [vmem:[#allocation8_spill] sm:$0xff] %v2672_v28  ;;  %v1822_v36 = vld [vmem:[#allocation2 + $0x110] sm:$0xf0]  ;;  %v2311_v39 = vld [vmem:[#allocation2 + $0xf4] sm:$0xf0]  ;;  %v2682_v51 = vor.u32 %v2280_v30, %v1694_v31 }
  0x21   :  { %3197 = vst [vmem:[#allocation9_spill] sm:$0xff] %v2675_v35  ;;  %v2309_v40 = vld [vmem:[#allocation2 + $0xec] sm:$0xf]  ;;  %v1814_v41 = vld [vmem:[#allocation2 + $0xf8] sm:$0xf0]  ;;  %v2684_v52 = vor.u32 %v2312_v32, %v1822_v36  ;;  %v2687_v55 = vor.u32 %v2311_v39, %v1812_v37  ;;  %v3149_v39 = vmov 0  }
  0x22   :  { %459 = vmatpush.bf16.msra.mxu0 %v2654_v5  ;;  %v2341_v42 = vld [vmem:[#allocation2 + $0x1ec] sm:$0xf]  ;;  %v1942_v47 = vld [vmem:[#allocation2 + $0x1f8] sm:$0xf0]  ;;  %v1820_v48 = vld [vmem:[#allocation2 + $0x100] sm:$0xf]  ;;  %v2689_v59 = vor.u32 %v2309_v40, %v1814_v41 }
  0x23   :  { %485 = vmatpush.bf16.msra.mxu2 %v2658_v6  ;;  %v2314_v49 = vld [vmem:[#allocation2 + $0x10c] sm:$0xf0]  ;;  %3198 = vst [vmem:[#allocation10_spill] sm:$0xff] %v2684_v52  ;;  %v1940_v53 = vld [vmem:[#allocation2 + $0x1e8] sm:$0xf]  ;;  %v2691_v61 = vor.u32 %v2341_v42, %v1942_v47 }
  0x24   :  { %498 = vmatpush.bf16.msra.mxu3 %v2660_v9  ;;  %472 = vmatpush.bf16.msra.mxu1 %v2663_v14  ;;  %v2343_v54 = vld [vmem:[#allocation2 + $0x1f4] sm:$0xf0]  ;;  %v1796_v60 = vld [vmem:[#allocation2 + $0xc8] sm:$0xf]  ;;  %v2693_v63 = vor.u32 %v2314_v49, %v1820_v48  ;;  %v2305_v1 = vld [vmem:[#allocation2 + $0xcc] sm:$0xf] }
  0x25   :  { %3199 = vst [vmem:[#allocation11_spill] sm:$0xff] %v2691_v61  ;;  %v2307_v0 = vld [vmem:[#allocation2 + $0xd4] sm:$0xf0]  ;;  %v1798_v2 = vld [vmem:[#allocation2 + $0xd8] sm:$0xf0]  ;;  %v2696_v4 = vor.u32 %v2343_v54, %v1940_v53 }
  0x26   :  { %460 = vmatpush.bf16.msra.mxu0 %v2666_v23  ;;  %3200 = vst [vmem:[#allocation12_spill] sm:$0xff] %v2693_v63  ;;  %v2337_v10 = vld [vmem:[#allocation2 + $0x1cc] sm:$0xf]  ;;  %v1926_v11 = vld [vmem:[#allocation2 + $0x1d8] sm:$0xf0]  ;;  %v2707_v19 = vor.u32 %v2307_v0, %v1796_v60  ;;  %v2709_v20 = vor.u32 %v2305_v1, %v1798_v2 }
  0x27   :  { %486 = vmatpush.bf16.msra.mxu2 %v2670_v27  ;;  %3201 = vst [vmem:[#allocation13_spill] sm:$0xff] %v2696_v4  ;;  %v2703_v13 = vld [vmem:[%s3141_s0] sm:$0xf]  ;;  %v1924_v15 = vld [vmem:[#allocation2 + $0x1c8] sm:$0xf]  ;;  %v2713_v24 = vor.u32 %v2337_v10, %v1926_v11 }
  0x28   :  { %499 = vmatpush.bf16.msra.mxu3 %v2672_v28  ;;  %473 = vmatpush.bf16.msra.mxu1 %v2675_v35  ;;  %v2339_v18 = vld [vmem:[#allocation2 + $0x1d4] sm:$0xf0]  ;;  %v1780_v22 = vld [vmem:[#allocation2 + $0xa8] sm:$0xf]  ;;  %v2301_v30 = vld [vmem:[#allocation2 + $0xac] sm:$0xf] }
  0x29   :  { %3202 = vst [vmem:[#allocation14_spill] sm:$0xff] %v2713_v24  ;;  %v2303_v26 = vld [vmem:[#allocation2 + $0xb4] sm:$0xf0]  ;;  %v1782_v31 = vld [vmem:[#allocation2 + $0xb8] sm:$0xf0]  ;;  %v2717_v32 = vor.u32 %v2339_v18, %v1924_v15 }
  0x2a   :  { %461 = vmatpush.bf16.msra.mxu0 %v2678_v43  ;;  %v2333_v36 = vld [vmem:[#allocation2 + $0x1ac] sm:$0xf]  ;;  %v1910_v37 = vld [vmem:[#allocation2 + $0x1b8] sm:$0xf0]  ;;  %v1908_v40 = vld [vmem:[#allocation2 + $0x1a8] sm:$0xf]  ;;  %v2723_v42 = vor.u32 %v2303_v26, %v1780_v22  ;;  %v2725_v47 = vor.u32 %v2301_v30, %v1782_v31 }
  0x2b   :  { %487 = vmatpush.bf16.msra.mxu2 %v2682_v51  ;;  %3203 = vst [vmem:[#allocation15_spill] sm:$0xff] %v2717_v32  ;;  %v2335_v41 = vld [vmem:[#allocation2 + $0x1b4] sm:$0xf0]  ;;  %v1764_v48 = vld [vmem:[#allocation2 + $0x88] sm:$0xf]  ;;  %v2728_v49 = vor.u32 %v2333_v36, %v1910_v37 }
  0x2c   :  { %500 = vmatpush.bf16.msra.mxu3 %v2684_v52  ;;  %474 = vmatpush.bf16.msra.mxu1 %v2693_v63  ;;  %3204 = vst [vmem:[#allocation16_spill] sm:$0xff] %v2723_v42  ;;  %v2299_v53 = vld [vmem:[#allocation2 + $0x94] sm:$0xf0]  ;;  %v2297_v54 = vld [vmem:[#allocation2 + $0x8c] sm:$0xf]  ;;  %v2732_v0 = vor.u32 %v2335_v41, %v1908_v40 }
  0x2d   :  { %462 = vmatmul.bf16.vlgmr.msra.gmra.mxu0 %v2703_v13  ;;  %3205 = vst [vmem:[#allocation17_spill] sm:$0xff] %v2728_v49  ;;  %v1766_v60 = vld [vmem:[#allocation2 + $0x98] sm:$0xf0]  ;;  %v2329_v1 = vld [vmem:[#allocation2 + $0x18c] sm:$0xf]  ;;  %v2736_v15 = vor.u32 %v2299_v53, %v1764_v48 }
  0x2e   :  { %506 = vmatpush.bf16.msrb.mxu0 %v2687_v55  ;;  %488 = vmatmul.bf16.vlgmr.msra.gmra.mxu2 %v2703_v13  ;;  %3206 = vst [vmem:[#allocation18_spill] sm:$0xff] %v2732_v0  ;;  %v1894_v2 = vld [vmem:[#allocation2 + $0x198] sm:$0xf0]  ;;  %v1892_v10 = vld [vmem:[#allocation2 + $0x188] sm:$0xf]  ;;  %v2738_v18 = vor.u32 %v2297_v54, %v1766_v60 }
  0x2f   :  { %532 = vmatpush.bf16.msrb.mxu2 %v2689_v59  ;;  %501 = vmatmul.bf16.vlgmr.msra.gmra.mxu3 %v3149_v39  ;;  %v2331_v11 = vld [vmem:[#allocation2 + $0x194] sm:$0xf0]  ;;  %3207 = vst [vmem:[#allocation19_spill] sm:$0xff] %v2736_v15  ;;  %v1748_v22 = vld [vmem:[#allocation2 + $0x68] sm:$0xf]  ;;  %v2741_v26 = vor.u32 %v2329_v1, %v1894_v2 }
  0x30   :  { %545 = vmatpush.bf16.msrb.mxu3 %v2691_v61  ;;  %519 = vmatpush.bf16.msrb.mxu1 %v2696_v4  ;;  %3208 = vst [vmem:[#allocation20_spill] sm:$0xff] %v2738_v18  ;;  %v2295_v30 = vld [vmem:[#allocation2 + $0x74] sm:$0xf0]  ;;  %v2293_v31 = vld [vmem:[#allocation2 + $0x6c] sm:$0xf]  ;;  %v2744_v37 = vor.u32 %v2331_v11, %v1892_v10 }
  0x31   :  { %475 = vmatmul.bf16.vlgmr.msra.gmra.mxu1 %v3149_v39  ;;  %3209 = vst [vmem:[#allocation21_spill] sm:$0xff] %v2741_v26  ;;  %v1750_v36 = vld [vmem:[#allocation2 + $0x78] sm:$0xf0]  ;;  %v2325_v40 = vld [vmem:[#allocation2 + $0x16c] sm:$0xf]  ;;  %v2748_v48 = vor.u32 %v2295_v30, %v1748_v22 }
  0x32   :  { %507 = vmatpush.bf16.msrb.mxu0 %v2707_v19  ;;  %3210 = vst [vmem:[#allocation22_spill] sm:$0xff] %v2744_v37  ;;  %v1878_v41 = vld [vmem:[#allocation2 + $0x178] sm:$0xf0]  ;;  %v1876_v39 = vld [vmem:[#allocation2 + $0x168] sm:$0xf]  ;;  %v2750_v53 = vor.u32 %v2293_v31, %v1750_v36 }
  0x33   :  { %533 = vmatpush.bf16.msrb.mxu2 %v2709_v20  ;;  %3211 = vst [vmem:[#allocation23_spill] sm:$0xff] %v2748_v48  ;;  %v1732_v54 = vld [vmem:[#allocation2 + $0x48] sm:$0xf]  ;;  %v2753_v60 = vor.u32 %v2325_v40, %v1878_v41  ;;  %v2291_v1 = vld [vmem:[#allocation2 + $0x54] sm:$0xf0] }
  0x34   :  { %546 = vmatpush.bf16.msrb.mxu3 %v2713_v24  ;;  %520 = vmatpush.bf16.msrb.mxu1 %v2717_v32  ;;  %3212 = vst [vmem:[#allocation24_spill] sm:$0xff] %v2750_v53  ;;  %v2289_v2 = vld [vmem:[#allocation2 + $0x4c] sm:$0xf]  ;;  %v1734_v10 = vld [vmem:[#allocation2 + $0x58] sm:$0xf0]  ;;  %v2760_v22 = vor.u32 %v2291_v1, %v1732_v54 }
  0x35   :  { %3213 = vst [vmem:[#allocation25_spill] sm:$0xff] %v2753_v60  ;;  %v2762_v30 = vor.u32 %v2289_v2, %v1734_v10  ;;  %v1716_v31 = vld [vmem:[#allocation2 + $0x28] sm:$0xf]  ;;  %v2287_v40 = vld [vmem:[#allocation2 + $0x34] sm:$0xf0] }
  0x36   :  { %508 = vmatpush.bf16.msrb.mxu0 %v2723_v42  ;;  %v2327_v42 = vld [vmem:[#allocation2 + $0x174] sm:$0xf0]  ;;  %3215 = vst [vmem:[#allocation27_spill] sm:$0xff] %v2760_v22  ;;  %v2772_v54 = vor.u32 %v2287_v40, %v1716_v31 }
  0x37   :  { %534 = vmatpush.bf16.msrb.mxu2 %v2725_v47  ;;  %v2756_v11 = vor.u32 %v2327_v42, %v1876_v39  ;;  %3216 = vst [vmem:[#allocation28_spill] sm:$0xff] %v2762_v30  ;;  %v2285_v39 = vld [vmem:[#allocation2 + $0x2c] sm:$0xf]  ;;  %v1718_v42 = vld [vmem:[#allocation2 + $0x38] sm:$0xf0] }
  0x38   :  { %547 = vmatpush.bf16.msrb.mxu3 %v2728_v49  ;;  %521 = vmatpush.bf16.msrb.mxu1 %v2732_v0  ;;  %v2321_v49 = vld [vmem:[#allocation2 + $0x14c] sm:$0xf]  ;;  %v1860_v0 = vld [vmem:[#allocation2 + $0x148] sm:$0xf]  ;;  %v2774_v1 = vor.u32 %v2285_v39, %v1718_v42  ;;  %v2283_v2 = vld [vmem:[#allocation2 + $0x14] sm:$0xf0] }
  0x39   :  { %3214 = vst [vmem:[#allocation26_spill] sm:$0xff] %v2756_v11  ;;  %v3231_v42 = vld [vmem:[#allocation21_spill] sm:$0xff] }
  0x3a   :  { %509 = vmatpush.bf16.msrb.mxu0 %v2736_v15  ;;  %v1862_v15 = vld [vmem:[#allocation2 + $0x158] sm:$0xf0] }
  0x3b   :  { %535 = vmatpush.bf16.msrb.mxu2 %v2738_v18  ;;  %v2323_v18 = vld [vmem:[#allocation2 + $0x154] sm:$0xf0]  ;;  %v2765_v36 = vor.u32 %v2321_v49, %v1862_v15  ;;  %v1700_v49 = vld [vmem:[#allocation2 + $0x8] sm:$0xf]  ;;  %v3230_v39 = vld [vmem:[#allocation24_spill] sm:$0xff] }
  0x3c   :  { %548 = vmatpush.bf16.msrb.mxu3 %v2741_v26  ;;  %522 = vmatpush.bf16.msrb.mxu1 %v2744_v37  ;;  %v2768_v41 = vor.u32 %v2323_v18, %v1860_v0  ;;  %v2317_v26 = vld [vmem:[#allocation2 + $0x12c] sm:$0xf]  ;;  %v1844_v37 = vld [vmem:[#allocation2 + $0x128] sm:$0xf]  ;;  %v1702_v18 = vld [vmem:[#allocation2 + $0x18] sm:$0xf0]  ;;  %v2784_v31 = vor.u32 %v2283_v2, %v1700_v49 }
  0x3d   :  { %3217 = vst [vmem:[#allocation29_spill] sm:$0xff] %v2765_v36  ;;  %v2281_v0 = vld [vmem:[#allocation2 + $0xc] sm:$0xf]  ;;  %v3232_v49 = vld [vmem:[#allocation23_spill] sm:$0xff] }
  0x3e   :  { %510 = vmatpush.bf16.msrb.mxu0 %v2748_v48  ;;  %3218 = vst [vmem:[#allocation30_spill] sm:$0xff] %v2768_v41  ;;  %v1846_v48 = vld [vmem:[#allocation2 + $0x138] sm:$0xf0]  ;;  %v2786_v40 = vor.u32 %v2281_v0, %v1702_v18  ;;  %v3234_v0 = vld [vmem:[#allocation28_spill] sm:$0xff]  ;;  %v3235_v18 = vld [vmem:[#allocation25_spill] sm:$0xff] }
  0x3f   :  { %536 = vmatpush.bf16.msrb.mxu2 %v2750_v53  ;;  %v2319_v53 = vld [vmem:[#allocation2 + $0x134] sm:$0xf0]  ;;  %v2777_v15 = vor.u32 %v2317_v26, %v1846_v48  ;;  %v3223_v48 = vmov 0  }
  0x40   :  { %549 = vmatpush.bf16.msrb.mxu3 %v2753_v60  ;;  %523 = vmatpush.bf16.msrb.mxu1 %v2756_v11  ;;  %v2780_v10 = vor.u32 %v2319_v53, %v1844_v37  ;;  %v2313_v60 = vld [vmem:[#allocation2 + $0x10c] sm:$0xf]  ;;  %v1828_v11 = vld [vmem:[#allocation2 + $0x108] sm:$0xf]  ;;  %v3225_v53 = vld [vmem:[#allocation18_spill] sm:$0xff] }
  0x41   :  { %3219 = vst [vmem:[#allocation31_spill] sm:$0xff] %v2777_v15  ;;  %v3233_v2 = vld [vmem:[#allocation26_spill] sm:$0xff] }
  0x42   :  { %511 = vmatpush.bf16.msrb.mxu0 %v2760_v22  ;;  %3220 = vst [vmem:[#allocation32_spill] sm:$0xff] %v2780_v10  ;;  %v1830_v22 = vld [vmem:[#allocation2 + $0x118] sm:$0xf0] }
  0x43   :  { %537 = vmatpush.bf16.msrb.mxu2 %v2762_v30  ;;  %v2315_v30 = vld [vmem:[#allocation2 + $0x114] sm:$0xf0]  ;;  %v2789_v26 = vor.u32 %v2313_v60, %v1830_v22  ;;  %v3226_v60 = vld [vmem:[#allocation20_spill] sm:$0xff] }
  0x44   :  { %550 = vmatpush.bf16.msrb.mxu3 %v2765_v36  ;;  %524 = vmatpush.bf16.msrb.mxu1 %v2768_v41  ;;  %v2792_v37 = vor.u32 %v2315_v30, %v1828_v11  ;;  %v3227_v11 = vld [vmem:[#allocation17_spill] sm:$0xff]  ;;  %v3228_v22 = vld [vmem:[#allocation19_spill] sm:$0xff]  ;;  %v3229_v30 = vld [vmem:[#allocation22_spill] sm:$0xff] }
  0x45   :  { %3221 = vst [vmem:[#allocation33_spill] sm:$0xff] %v2789_v26 }
  0x46   :  { %512 = vmatpush.bf16.msrb.mxu0 %v2772_v54  ;;  %3222 = vst [vmem:[#allocation34_spill] sm:$0xff] %v2792_v37 }
  0x47   :  { %538 = vmatpush.bf16.msrb.mxu2 %v2774_v1 }
  0x48   :  { %551 = vmatpush.bf16.msrb.mxu3 %v2777_v15  ;;  %525 = vmatpush.bf16.msrb.mxu1 %v2780_v10 }
  0x4a   :  { %513 = vmatpush.bf16.msrb.mxu0 %v2784_v31 }
  0x4b   :  { %539 = vmatpush.bf16.msrb.mxu2 %v2786_v40 }
  0x4c   :  { %552 = vmatpush.bf16.msrb.mxu3 %v2789_v26  ;;  %526 = vmatpush.bf16.msrb.mxu1 %v2792_v37 }
  0x4d   :  { %514 = vmatmul.bf16.vlgmr.msrb.gmra.mxu0 %v2703_v13 }
  0x4e   :  { %624 = vmatpush.bf16.msra.mxu0 %v2597_v3  ;;  %540 = vmatmul.bf16.vlgmr.msrb.gmra.mxu2 %v2703_v13  ;;  %v3224_v13 = vld [vmem:[#allocation16_spill] sm:$0xff] }
  0x4f   :  { %650 = vmatpush.bf16.msra.mxu2 %v2599_v7  ;;  %553 = vmatmul.bf16.vlgmr.msrb.gmra.mxu3 %v3223_v48 }
  0x50   :  { %637 = vmatpush.bf16.msra.mxu1 %v2604_v12  ;;  %663 = vmatpush.bf16.msra.mxu3 %v2601_v8 }
  0x51   :  { %527 = vmatmul.bf16.vlgmr.msrb.gmra.mxu1 %v3223_v48  ;;  %v3236_v48 = vld [vmem:[#allocation27_spill] sm:$0xff] }
  0x52   :  { %625 = vmatpush.bf16.msra.mxu0 %v2608_v16 }
  0x53   :  { %651 = vmatpush.bf16.msra.mxu2 %v2610_v17 }
  0x54   :  { %638 = vmatpush.bf16.msra.mxu1 %v2615_v25  ;;  %664 = vmatpush.bf16.msra.mxu3 %v2613_v21 }
  0x56   :  { %626 = vmatpush.bf16.msra.mxu0 %v2618_v29 }
  0x57   :  { %652 = vmatpush.bf16.msra.mxu2 %v2622_v33 }
  0x58   :  { %639 = vmatpush.bf16.msra.mxu1 %v2627_v38  ;;  %665 = vmatpush.bf16.msra.mxu3 %v2624_v34 }
  0x5a   :  { %627 = vmatpush.bf16.msra.mxu0 %v2630_v44 }
  0x5b   :  { %653 = vmatpush.bf16.msra.mxu2 %v2634_v45 }
  0x5c   :  { %640 = vmatpush.bf16.msra.mxu1 %v2639_v50  ;;  %666 = vmatpush.bf16.msra.mxu3 %v2636_v46 }
  0x5e   :  { %628 = vmatpush.bf16.msra.mxu0 %v2642_v56 }
  0x5f   :  { %654 = vmatpush.bf16.msra.mxu2 %v2646_v57 }
  0x60   :  { %641 = vmatpush.bf16.msra.mxu1 %v2651_v62  ;;  %667 = vmatpush.bf16.msra.mxu3 %v2648_v58 }
  0x62   :  { %629 = vmatpush.bf16.msra.mxu0 %v2654_v5 }
  0x63   :  { %655 = vmatpush.bf16.msra.mxu2 %v2658_v6 }
  0x64   :  { %642 = vmatpush.bf16.msra.mxu1 %v2663_v14  ;;  %668 = vmatpush.bf16.msra.mxu3 %v2660_v9 }
  0x66   :  { %630 = vmatpush.bf16.msra.mxu0 %v2666_v23 }
  0x67   :  { %656 = vmatpush.bf16.msra.mxu2 %v2670_v27 }
  0x68   :  { %643 = vmatpush.bf16.msra.mxu1 %v2675_v35  ;;  %669 = vmatpush.bf16.msra.mxu3 %v2672_v28 }
  0x6a   :  { %631 = vmatpush.bf16.msra.mxu0 %v2678_v43 }
  0x6b   :  { %657 = vmatpush.bf16.msra.mxu2 %v2682_v51 }
  0x6c   :  { %644 = vmatpush.bf16.msra.mxu1 %v2693_v63  ;;  %670 = vmatpush.bf16.msra.mxu3 %v2684_v52 }
  0x6e   :  { %676 = vmatpush.bf16.msrb.mxu0 %v2687_v55 }
  0x6f   :  { %702 = vmatpush.bf16.msrb.mxu2 %v2689_v59 }
  0x70   :  { %689 = vmatpush.bf16.msrb.mxu1 %v2696_v4  ;;  %715 = vmatpush.bf16.msrb.mxu3 %v2691_v61 }
  0x72   :  { %677 = vmatpush.bf16.msrb.mxu0 %v2707_v19 }
  0x73   :  { %703 = vmatpush.bf16.msrb.mxu2 %v2709_v20 }
  0x74   :  { %690 = vmatpush.bf16.msrb.mxu1 %v2717_v32  ;;  %716 = vmatpush.bf16.msrb.mxu3 %v2713_v24 }
  0x76   :  { %678 = vmatpush.bf16.msrb.mxu0 %v3224_v13 }
  0x77   :  { %704 = vmatpush.bf16.msrb.mxu2 %v2725_v47 }
  0x78   :  { %691 = vmatpush.bf16.msrb.mxu1 %v3225_v53  ;;  %717 = vmatpush.bf16.msrb.mxu3 %v3227_v11 }
  0x7a   :  { %679 = vmatpush.bf16.msrb.mxu0 %v3228_v22 }
  0x7b   :  { %705 = vmatpush.bf16.msrb.mxu2 %v3226_v60 }
  0x7c   :  { %692 = vmatpush.bf16.msrb.mxu1 %v3229_v30  ;;  %718 = vmatpush.bf16.msrb.mxu3 %v3231_v42 }
  0x7e   :  { %680 = vmatpush.bf16.msrb.mxu0 %v3232_v49 }
  0x7f   :  { %706 = vmatpush.bf16.msrb.mxu2 %v3230_v39 }
  0x80   :  { %693 = vmatpush.bf16.msrb.mxu1 %v3233_v2  ;;  %719 = vmatpush.bf16.msrb.mxu3 %v3235_v18 }
  0x82   :  { %681 = vmatpush.bf16.msrb.mxu0 %v3236_v48 }
  0x83   :  { %707 = vmatpush.bf16.msrb.mxu2 %v3234_v0 }
  0x84   :  { %694 = vmatpush.bf16.msrb.mxu1 %v2768_v41  ;;  %720 = vmatpush.bf16.msrb.mxu3 %v2765_v36  ;;  %v124_v41 = vld [vmem:[%s3143_s2] sm:$0xf] }
  0x85   :  { %v2869_v18 = vperm.slane %v124_v41, 0 }
  0x86   :  { %682 = vmatpush.bf16.msrb.mxu0 %v2772_v54 }
  0x87   :  { %708 = vmatpush.bf16.msrb.mxu2 %v2774_v1  ;;  %3237 = vst [vmem:[#allocation16_spill] sm:$0xff] %v2869_v18 }
  0x88   :  { %695 = vmatpush.bf16.msrb.mxu1 %v2780_v10  ;;  %721 = vmatpush.bf16.msrb.mxu3 %v2777_v15  ;;  %v2872_v10 = vperm.slane %v124_v41, 1 }
  0x8a   :  { %683 = vmatpush.bf16.msrb.mxu0 %v2784_v31  ;;  %3238 = vst [vmem:[#allocation20_spill] sm:$0xff] %v2872_v10 }
  0x8b   :  { %709 = vmatpush.bf16.msrb.mxu2 %v2786_v40 }
  0x8c   :  { %696 = vmatpush.bf16.msrb.mxu1 %v2792_v37  ;;  %722 = vmatpush.bf16.msrb.mxu3 %v2789_v26 }
  0xaa   :  { %v463_v36 = vpop.f32.mrf.mxu0 }
  0xab   :  { %v464_v2 = vadd.f32 %v463_v36, %v2869_v18 }
  0xae   :  { %v476_v42 = vpop.f32.mrf.mxu1 }
  0xaf   :  { %v477_v30 = vadd.f32 %v476_v42, %v464_v2 }
  0xb1   :  { %v489_v15 = vpop.f32.mrf.mxu2  ;;  %v1946_v11 = vmul.f32 -1.442695, %v477_v30 }
  0xb2   :  { %v490_v53 = vadd.f32 %v489_v15, %v2872_v10  ;;  %v502_v37 = vpop.f32.mrf.mxu3  ;;  %v465_v26 = vpop.f32.mrf.mxu0  ;;  %v1949_v15 = vld [vmem:[%s3141_s0 + $0x4] sm:$0xf] }
  0xb3   :  { %2430 = vpow2.f32 %v1946_v11  ;;  %658 = vmatmul.bf16.vlgmr.msra.gmra.mxu2 %v1949_v15  ;;  %632 = vmatmul.bf16.vlgmr.msra.gmra.mxu0 %v1949_v15 }
  0xb4   :  { %v503_v24 = vadd.f32 %v502_v37, %v490_v53  ;;  %820 = vmatpush.bf16.msra.mxu2 %v2599_v7  ;;  %794 = vmatpush.bf16.msra.mxu0 %v2597_v3 }
  0xb6   :  { %v1947_v32 = vmul.f32 -1.442695, %v503_v24  ;;  %v478_v61 = vpop.f32.mrf.mxu1 }
  0xb8   :  { %2432 = vpow2.f32 %v1947_v32  ;;  %821 = vmatpush.bf16.msra.mxu2 %v2610_v17  ;;  %795 = vmatpush.bf16.msra.mxu0 %v2608_v16 }
  0xb9   :  { %v491_v4 = vpop.f32.mrf.mxu2  ;;  %v2431_v52 = vpop.eup %2430 }
  0xba   :  { %v504_v63 = vpop.f32.mrf.mxu3  ;;  %v561_v28 = vadd.f32 1.0, %v2431_v52  ;;  %v2885_v4 = vperm.slane %v124_v41, 3 }
  0xbb   :  { %v2883_v63 = vperm.slane %v124_v41, 2 }
  0xbc   :  { %2434 = vrcp.f32 %v561_v28  ;;  %822 = vmatpush.bf16.msra.mxu2 %v2622_v33  ;;  %796 = vmatpush.bf16.msra.mxu0 %v2618_v29  ;;  %vm567_vm0 = vweird.f32 %v561_v28 }
  0xbe   :  { %v2433_v36 = vpop.eup %2432 }
  0xbf   :  { %v580_v18 = vadd.f32 1.0, %v2433_v36 }
  0xc0   :  { %823 = vmatpush.bf16.msra.mxu2 %v2634_v45  ;;  %797 = vmatpush.bf16.msra.mxu0 %v2630_v44 }
  0xc1   :  { %2436 = vrcp.f32 %v580_v18  ;;  %vm586_vm2 = vweird.f32 %v580_v18 }
  0xc2   :  { %v2875_v42 = vpop.eup %2434 }
  0xc3   :  { %v563_v52 = vmul.f32 %v2875_v42, %v561_v28  ;;  %vm568_vm1 = vweird.f32 %v2875_v42  ;;  %710 = vmatmul.bf16.vlgmr.msrb.gmra.mxu2 %v1949_v15  ;;  %684 = vmatmul.bf16.vlgmr.msrb.gmra.mxu0 %v1949_v15 }
  0xc4   :  { %vm2898_vm4 = vmor %vm567_vm0, %vm568_vm1  ;;  %824 = vmatpush.bf16.msra.mxu2 %v2646_v57  ;;  %798 = vmatpush.bf16.msra.mxu0 %v2642_v56 }
  0xc5   :  { %v564_v26 = vsub.f32 1.0, %v563_v52  ;;  %v571_v52 = vand.u32 2147483647, %v561_v28 }
  0xc7   :  { %v2437_v24 = vpop.eup %2436  ;;  %v565_v41 = vmul.f32 %v2875_v42, %v564_v26  ;;  %vm572_vm6 = vcmp.eq.f32.partialorder %v571_v52, 8.507059e+37 }
  0xc8   :  { %v582_v32 = vmul.f32 %v2437_v24, %v580_v18  ;;  %vm587_vm3 = vweird.f32 %v2437_v24  ;;  %825 = vmatpush.bf16.msra.mxu2 %v2658_v6  ;;  %799 = vmatpush.bf16.msra.mxu0 %v2654_v5 }
  0xc9   :  { %v566_v33 = vadd.f32 %v2875_v42, %v565_v41  ;;  %vm2902_vm5 = vmor %vm586_vm2, %vm587_vm3 }
  0xca   :  { %v515_v37 = vpop.f32.mrf.mxu0  ;;  %v583_v3 = vsub.f32 1.0, %v582_v32  ;;  %v592_v32 = vand.u32 2147483648, %v580_v18 }
  0xcb   :  { %v516_v11 = vadd.f32 %v515_v37, %v2883_v63  ;;  %v573_v37 = vand.u32 2147483648, %v561_v28  ;;  %v570_v28 = vsel %vm2898_vm4, %v2875_v42, %v566_v33  ;;  %v3263_v33 = vld [vmem:[#allocation16_spill] sm:$0xff] }
  0xcc   :  { %v584_v16 = vmul.f32 %v2437_v24, %v583_v3  ;;  %826 = vmatpush.bf16.msra.mxu2 %v2670_v27  ;;  %800 = vmatpush.bf16.msra.mxu0 %v2666_v23 }
  0xcd   :  { %v574_v45 = vor.u32 1.1754944e-38, %v573_v37 }
  0xce   :  { %v528_v61 = vpop.f32.mrf.mxu1  ;;  %v585_v26 = vadd.f32 %v2437_v24, %v584_v16 }
  0xcf   :  { %v529_v17 = vadd.f32 %v528_v61, %v516_v11  ;;  %v593_v11 = vor.u32 1.1754944e-38, %v592_v32 }
  0xd0   :  { %827 = vmatpush.bf16.msra.mxu2 %v2682_v51  ;;  %801 = vmatpush.bf16.msra.mxu0 %v2678_v43 }
  0xd1   :  { %v541_v53 = vpop.f32.mrf.mxu2 }
  0xd2   :  { %v542_v7 = vadd.f32 %v541_v53, %v2885_v4  ;;  %v554_v30 = vpop.f32.mrf.mxu3  ;;  %v517_v2 = vpop.f32.mrf.mxu0  ;;  %v590_v53 = vand.u32 2147483647, %v580_v18  ;;  %v589_v18 = vsel %vm2902_vm5, %v2437_v24, %v585_v26 }
  0xd4   :  { %v555_v36 = vadd.f32 %v554_v30, %v542_v7  ;;  %vm591_vm7 = vcmp.eq.f32.partialorder %v590_v53, 8.507059e+37  ;;  %v575_v30 = vsel %vm572_vm6, %v574_v45, %v570_v28  ;;  %872 = vmatpush.bf16.msrb.mxu2 %v2689_v59  ;;  %846 = vmatpush.bf16.msrb.mxu0 %v2687_v55 }
  0xd5   :  { %v594_v56 = vsel %vm591_vm7, %v593_v11, %v589_v18  ;;  %v2977_v18 = vld [vmem:[%s3141_s0 + $0x8] sm:$0xf] }
  0xd6   :  { %v530_v10 = vpop.f32.mrf.mxu1  ;;  %v1948_v35 = vmul.f32 -1.442695, %v555_v36  ;;  %v616_v42 = vmul.f32 0.0, %v594_v56  ;;  %828 = vmatmul.bf16.vlgmr.msra.gmra.mxu2 %v2977_v18  ;;  %v2368_v56 = vld [vmem:[#allocation4 + $0xc4] sm:$0xf]  ;;  %802 = vmatmul.bf16.vlgmr.msra.gmra.mxu0 %v2977_v18 }
  0xd7   :  { %v3264_v10 = vld [vmem:[#allocation20_spill] sm:$0xff] }
  0xd8   :  { %2438 = vpow2.f32 %v1948_v35  ;;  %873 = vmatpush.bf16.msrb.mxu2 %v2709_v20  ;;  %847 = vmatpush.bf16.msrb.mxu0 %v2707_v19  ;;  %v3255_v19 = vld [vmem:[#allocation26_spill] sm:$0xff]  ;;  %v3256_v20 = vld [vmem:[#allocation25_spill] sm:$0xff] }
  0xd9   :  { %v543_v29 = vpop.f32.mrf.mxu2  ;;  %2440 = vtanh.f32 %v529_v17 }
  0xda   :  { %v556_v61 = vpop.f32.mrf.mxu3 }
  0xdc   :  { %874 = vmatpush.bf16.msrb.mxu2 %v2725_v47  ;;  %848 = vmatpush.bf16.msrb.mxu0 %v3224_v13  ;;  %v3257_v47 = vld [vmem:[#allocation30_spill] sm:$0xff] }
  0xde   :  { %v2439_v35 = vpop.eup %2438 }
  0xdf   :  { %v600_v15 = vadd.f32 1.0, %v2439_v35  ;;  %v2441_v7 = vpop.eup %2440 }
  0xe0   :  { %v617_v57 = vmul.f32 %v2441_v7, %v575_v30  ;;  %875 = vmatpush.bf16.msrb.mxu2 %v3226_v60  ;;  %849 = vmatpush.bf16.msrb.mxu0 %v3228_v22  ;;  %v2073_v7 = vld [vmem:[#allocation4 + $0xf0] sm:$0xf0] }
  0xe1   :  { %2442 = vrcp.f32 %v600_v15  ;;  %v612_v6 = vand.u32 2147483648, %v600_v15  ;;  %v610_v23 = vand.u32 2147483647, %v600_v15  ;;  %vm606_vm9 = vweird.f32 %v600_v15 }
  0xe2   :  { %v2917_v2 = vadd.f32 %v617_v57, %v616_v42  ;;  %v2057_v42 = vld [vmem:[#allocation4 + $0xd0] sm:$0xf0] }
  0xe3   :  { %v613_v51 = vor.u32 1.1754944e-38, %v612_v6  ;;  %vm611_vm11 = vcmp.eq.f32.partialorder %v610_v23, 8.507059e+37  ;;  %v2060_v23 = vor.u32 %v2368_v56, %v2057_v42 }
  0xe4   :  { %2444 = vtanh.f32 %v2917_v2  ;;  %876 = vmatpush.bf16.msrb.mxu2 %v3230_v39  ;;  %850 = vmatpush.bf16.msrb.mxu0 %v3232_v49 }
  0xe7   :  { %v2443_v3 = vpop.eup %2442 }
  0xe8   :  { %v602_v24 = vmul.f32 %v2443_v3, %v600_v15  ;;  %vm607_vm8 = vweird.f32 %v2443_v3  ;;  %877 = vmatpush.bf16.msrb.mxu2 %v3234_v0  ;;  %851 = vmatpush.bf16.msrb.mxu0 %v3236_v48  ;;  %v3262_v48 = vld [vmem:[#allocation33_spill] sm:$0xff]  ;;  %v2372_v15 = vld [vmem:[#allocation4 + $0xe4] sm:$0xf] }
  0xe9   :  { %vm608_vm10 = vmor %vm606_vm9, %vm607_vm8  ;;  %v2076_v57 = vor.u32 %v2372_v15, %v2073_v7 }
  0xea   :  { %v603_v5 = vsub.f32 1.0, %v602_v24  ;;  %v2445_v59 = vpop.eup %2444  ;;  %v2374_v24 = vld [vmem:[#allocation4 + $0xec] sm:$0xf0] }
  0xec   :  { %v604_v27 = vmul.f32 %v2443_v3, %v603_v5  ;;  %878 = vmatpush.bf16.msrb.mxu2 %v2774_v1  ;;  %852 = vmatpush.bf16.msrb.mxu0 %v2772_v54  ;;  %v3258_v54 = vld [vmem:[#allocation29_spill] sm:$0xff]  ;;  %v3259_v1 = vld [vmem:[#allocation32_spill] sm:$0xff] }
  0xee   :  { %v605_v36 = vadd.f32 %v2443_v3, %v604_v27 }
  0xf0   :  { %v609_v43 = vsel %vm608_vm10, %v2443_v3, %v605_v36  ;;  %879 = vmatpush.bf16.msrb.mxu2 %v2786_v40  ;;  %853 = vmatpush.bf16.msrb.mxu0 %v2784_v31  ;;  %v3260_v31 = vld [vmem:[#allocation31_spill] sm:$0xff]  ;;  %v3261_v40 = vld [vmem:[#allocation34_spill] sm:$0xff]  ;;  %v2071_v3 = vld [vmem:[#allocation4 + $0xe0] sm:$0xf] }
  0xf1   :  { %v614_v41 = vsel %vm611_vm11, %v613_v51, %v609_v43  ;;  %v2072_v6 = vor.u32 %v2374_v24, %v2071_v3  ;;  %v2364_v51 = vld [vmem:[#allocation4 + $0xa4] sm:$0xf]  ;;  %v2041_v43 = vld [vmem:[#allocation4 + $0xb0] sm:$0xf0]  ;;  %v2007_v24 = vld [vmem:[#allocation4 + $0x60] sm:$0xf] }
  0xf2   :  { %v620_v55 = vmul.f32 %v2445_v59, %v614_v41 }
  0xf3   :  { %854 = vmatmul.bf16.vlgmr.msrb.gmra.mxu0 %v2977_v18  ;;  %880 = vmatmul.bf16.vlgmr.msrb.gmra.mxu2 %v2977_v18 }
  0xf4   :  { %v623_v17 = vpack.c.bf16 %v620_v55, %v620_v55  ;;  %1381 = vmatpush.bf16.msra.mxu2 %v2076_v57  ;;  %1355 = vmatpush.bf16.msra.mxu0 %v2072_v6 }
  0xf6   :  { %645 = vmatmul.bf16.vlgmr.msra.gmra.mxu1 %v623_v17  ;;  %671 = vmatmul.bf16.vlgmr.msra.gmra.mxu3 %v623_v17 }
  0xf7   :  { %807 = vmatpush.bf16.msra.mxu1 %v2604_v12  ;;  %833 = vmatpush.bf16.msra.mxu3 %v2601_v8  ;;  %v3243_v8 = vld [vmem:[#allocation9_spill] sm:$0xff]  ;;  %v3244_v12 = vld [vmem:[#allocation8_spill] sm:$0xff] }
  0xf8   :  { %1382 = vmatpush.bf16.msra.mxu2 %v2060_v23  ;;  %v2348_v23 = vld [vmem:[#allocation4 + $0x24] sm:$0xf] }
  0xfb   :  { %808 = vmatpush.bf16.msra.mxu1 %v2615_v25  ;;  %834 = vmatpush.bf16.msra.mxu3 %v2613_v21  ;;  %v3245_v21 = vld [vmem:[#allocation12_spill] sm:$0xff]  ;;  %v3246_v25 = vld [vmem:[#allocation10_spill] sm:$0xff] }
  0xff   :  { %809 = vmatpush.bf16.msra.mxu1 %v2627_v38  ;;  %835 = vmatpush.bf16.msra.mxu3 %v2624_v34  ;;  %v3247_v34 = vld [vmem:[#allocation13_spill] sm:$0xff]  ;;  %v3248_v38 = vld [vmem:[#allocation11_spill] sm:$0xff] }
 0x103   :  { %810 = vmatpush.bf16.msra.mxu1 %v2639_v50  ;;  %836 = vmatpush.bf16.msra.mxu3 %v2636_v46  ;;  %v3249_v46 = vld [vmem:[#allocation15_spill] sm:$0xff]  ;;  %v3250_v50 = vld [vmem:[#allocation14_spill] sm:$0xff] }
 0x106   :  { %697 = vmatmul.bf16.vlgmr.msrb.gmra.mxu1 %v623_v17  ;;  %723 = vmatmul.bf16.vlgmr.msrb.gmra.mxu3 %v623_v17  ;;  %v2044_v17 = vor.u32 %v2364_v51, %v2041_v43 }
 0x107   :  { %811 = vmatpush.bf16.msra.mxu1 %v2651_v62  ;;  %837 = vmatpush.bf16.msra.mxu3 %v2648_v58  ;;  %v3251_v58 = vld [vmem:[#allocation18_spill] sm:$0xff]  ;;  %v3252_v62 = vld [vmem:[#allocation17_spill] sm:$0xff] }
 0x108   :  { %1383 = vmatpush.bf16.msra.mxu2 %v2044_v17  ;;  %v2344_v17 = vld [vmem:[#allocation4 + $0x4] sm:$0xf] }
 0x10b   :  { %812 = vmatpush.bf16.msra.mxu1 %v2663_v14  ;;  %838 = vmatpush.bf16.msra.mxu3 %v2660_v9  ;;  %v3253_v9 = vld [vmem:[#allocation22_spill] sm:$0xff]  ;;  %v3254_v14 = vld [vmem:[#allocation21_spill] sm:$0xff] }
 0x10f   :  { %813 = vmatpush.bf16.msra.mxu1 %v3243_v8  ;;  %839 = vmatpush.bf16.msra.mxu3 %v3244_v12 }
 0x113   :  { %814 = vmatpush.bf16.msra.mxu1 %v3245_v21  ;;  %840 = vmatpush.bf16.msra.mxu3 %v3246_v25 }
 0x117   :  { %859 = vmatpush.bf16.msrb.mxu1 %v3247_v34  ;;  %885 = vmatpush.bf16.msrb.mxu3 %v3248_v38 }
 0x11b   :  { %860 = vmatpush.bf16.msrb.mxu1 %v3249_v46  ;;  %886 = vmatpush.bf16.msrb.mxu3 %v3250_v50  ;;  %v2055_v46 = vld [vmem:[#allocation4 + $0xc0] sm:$0xf]  ;;  %v2370_v50 = vld [vmem:[#allocation4 + $0xcc] sm:$0xf0] }
 0x11f   :  { %861 = vmatpush.bf16.msrb.mxu1 %v3251_v58  ;;  %887 = vmatpush.bf16.msrb.mxu3 %v3252_v62 }
 0x123   :  { %862 = vmatpush.bf16.msrb.mxu1 %v3253_v9  ;;  %888 = vmatpush.bf16.msrb.mxu3 %v3254_v14  ;;  %v2056_v9 = vor.u32 %v2370_v50, %v2055_v46  ;;  %v2360_v14 = vld [vmem:[#allocation4 + $0x84] sm:$0xf] }
 0x125   :  { %1356 = vmatpush.bf16.msra.mxu0 %v2056_v9  ;;  %v1975_v9 = vld [vmem:[#allocation4 + $0x20] sm:$0xf] }
 0x127   :  { %863 = vmatpush.bf16.msrb.mxu1 %v3255_v19  ;;  %889 = vmatpush.bf16.msrb.mxu3 %v3256_v20  ;;  %v2025_v19 = vld [vmem:[#allocation4 + $0x90] sm:$0xf0] }
 0x12b   :  { %864 = vmatpush.bf16.msrb.mxu1 %v3257_v47  ;;  %890 = vmatpush.bf16.msrb.mxu3 %v3258_v54  ;;  %v2028_v47 = vor.u32 %v2360_v14, %v2025_v19  ;;  %v2350_v14 = vld [vmem:[#allocation4 + $0x2c] sm:$0xf0] }
 0x12c   :  { %v1976_v19 = vor.u32 %v2350_v14, %v1975_v9  ;;  %v2363_v9 = vld [vmem:[#allocation4 + $0x94] sm:$0xf0]  ;;  %v2353_v14 = vld [vmem:[#allocation4 + $0x4c] sm:$0xf] }
 0x12d   :  { %1384 = vmatpush.bf16.msra.mxu2 %v2028_v47  ;;  %v2065_v47 = vld [vmem:[#allocation4 + $0xd8] sm:$0xf0] }
 0x12f   :  { %865 = vmatpush.bf16.msrb.mxu1 %v3259_v1  ;;  %891 = vmatpush.bf16.msrb.mxu3 %v3260_v31  ;;  %v2039_v31 = vld [vmem:[#allocation4 + $0xa0] sm:$0xf] }
 0x130   :  { %v633_v13 = vpop.f32.mrf.mxu0 }
 0x131   :  { %v634_v52 = vadd.f32 %v633_v13, %v3263_v33 }
 0x133   :  { %866 = vmatpush.bf16.msrb.mxu1 %v3261_v40  ;;  %892 = vmatpush.bf16.msrb.mxu3 %v3262_v48  ;;  %v2366_v40 = vld [vmem:[#allocation4 + $0xac] sm:$0xf0] }
 0x136   :  { %v659_v60 = vpop.f32.mrf.mxu2 }
 0x137   :  { %v660_v61 = vadd.f32 %v659_v60, %v3264_v10 }
 0x138   :  { %v635_v22 = vpop.f32.mrf.mxu0 }
 0x13e   :  { %v661_v39 = vpop.f32.mrf.mxu2 }
 0x13f   :  { %v2040_v39 = vor.u32 %v2366_v40, %v2039_v31 }
 0x140   :  { %v685_v0 = vpop.f32.mrf.mxu0 }
 0x141   :  { %v686_v34 = vadd.f32 %v685_v0, %v2883_v63  ;;  %v2009_v0 = vld [vmem:[#allocation4 + $0x70] sm:$0xf0]  ;;  %1357 = vmatpush.bf16.msra.mxu0 %v2040_v39  ;;  %v2404_v39 = vld [vmem:[#allocation4 + $0x1e4] sm:$0xf] }
 0x146   :  { %v711_v49 = vpop.f32.mrf.mxu2 }
 0x147   :  { %v712_v59 = vadd.f32 %v711_v49, %v2885_v4  ;;  %v2356_v49 = vld [vmem:[#allocation4 + $0x64] sm:$0xf] }
 0x148   :  { %v687_v37 = vpop.f32.mrf.mxu0 }
 0x14e   :  { %v713_v16 = vpop.f32.mrf.mxu2 }
 0x173   :  { %v646_v29 = vpop.f32.mrf.mxu1 }
 0x174   :  { %v647_v32 = vadd.f32 %v646_v29, %v634_v52  ;;  %v2012_v52 = vor.u32 %v2356_v49, %v2009_v0  ;;  %v1959_v49 = vld [vmem:[#allocation4] sm:$0xf]  ;;  %v2346_v0 = vld [vmem:[#allocation4 + $0xc] sm:$0xf0]  ;;  %v2365_v29 = vld [vmem:[#allocation4 + $0xac] sm:$0xf] }
 0x176   :  { %v1950_v26 = vmul.f32 -1.442695, %v647_v32  ;;  %1385 = vmatpush.bf16.msra.mxu2 %v2012_v52  ;;  %v2375_v52 = vld [vmem:[#allocation4 + $0xf4] sm:$0xf0] }
 0x178   :  { %2446 = vpow2.f32 %v1950_v26 }
 0x179   :  { %v672_v53 = vpop.f32.mrf.mxu3 }
 0x17a   :  { %v673_v45 = vadd.f32 %v672_v53, %v660_v61  ;;  %v2023_v53 = vld [vmem:[#allocation4 + $0x80] sm:$0xf] }
 0x17b   :  { %v648_v44 = vpop.f32.mrf.mxu1 }
 0x17c   :  { %v1951_v28 = vmul.f32 -1.442695, %v673_v45  ;;  %v2362_v45 = vld [vmem:[#allocation4 + $0x8c] sm:$0xf0]  ;;  %v2352_v44 = vld [vmem:[#allocation4 + $0x44] sm:$0xf] }
 0x17d   :  { %v2024_v7 = vor.u32 %v2362_v45, %v2023_v53  ;;  %v2049_v53 = vld [vmem:[#allocation4 + $0xb8] sm:$0xf0] }
 0x17e   :  { %v2447_v35 = vpop.eup %2446  ;;  %2448 = vpow2.f32 %v1951_v28 }
 0x17f   :  { %v2972_v11 = vadd.f32 1.0, %v2447_v35  ;;  %1358 = vmatpush.bf16.msra.mxu0 %v2024_v7  ;;  %v2402_v7 = vld [vmem:[#allocation4 + $0x1cc] sm:$0xf0] }
 0x181   :  { %2450 = vrcp.f32 %v2972_v11  ;;  %v674_v30 = vpop.f32.mrf.mxu3  ;;  %vm737_vm12 = vweird.f32 %v2972_v11  ;;  %v743_v60 = vand.u32 2147483648, %v2972_v11  ;;  %v741_v32 = vand.u32 2147483647, %v2972_v11 }
 0x183   :  { %v698_v5 = vpop.f32.mrf.mxu1  ;;  %v744_v30 = vor.u32 1.1754944e-38, %v743_v60  ;;  %vm742_vm3 = vcmp.eq.f32.partialorder %v741_v32, 8.507059e+37  ;;  %v2199_v60 = vld [vmem:[#allocation4 + $0x1e0] sm:$0xf] }
 0x184   :  { %v2449_v27 = vpop.eup %2448  ;;  %v699_v1 = vadd.f32 %v698_v5, %v686_v34  ;;  %v2358_v5 = vld [vmem:[#allocation4 + $0x6c] sm:$0xf0]  ;;  %v2373_v34 = vld [vmem:[#allocation4 + $0xec] sm:$0xf] }
 0x185   :  { %v2982_v36 = vadd.f32 1.0, %v2449_v27  ;;  %v2008_v27 = vor.u32 %v2358_v5, %v2007_v24  ;;  %v2400_v24 = vld [vmem:[#allocation4 + $0x1c4] sm:$0xf]  ;;  %v2185_v5 = vld [vmem:[#allocation4 + $0x1d0] sm:$0xf0] }
 0x187   :  { %v2985_v41 = vpop.eup %2450  ;;  %2452 = vrcp.f32 %v2982_v36  ;;  %v762_v48 = vand.u32 2147483648, %v2982_v36  ;;  %v760_v37 = vand.u32 2147483647, %v2982_v36  ;;  %vm756_vm0 = vweird.f32 %v2982_v36  ;;  %1359 = vmatpush.bf16.msra.mxu0 %v2008_v27  ;;  %v2033_v27 = vld [vmem:[#allocation4 + $0x98] sm:$0xf0] }
 0x188   :  { %v733_v55 = vmul.f32 %v2985_v41, %v2972_v11  ;;  %vm738_vm13 = vweird.f32 %v2985_v41  ;;  %v1993_v11 = vld [vmem:[#allocation4 + $0x50] sm:$0xf0] }
 0x189   :  { %v724_v8 = vpop.f32.mrf.mxu3  ;;  %vm3005_vm15 = vmor %vm737_vm12, %vm738_vm13  ;;  %v763_v28 = vor.u32 1.1754944e-38, %v762_v48  ;;  %vm761_vm2 = vcmp.eq.f32.partialorder %v760_v37, 8.507059e+37  ;;  %v1996_v57 = vor.u32 %v2352_v44, %v1993_v11  ;;  %v2079_v37 = vld [vmem:[#allocation4 + $0xe8] sm:$0xf] }
 0x18a   :  { %v734_v12 = vsub.f32 1.0, %v733_v55  ;;  %v725_v21 = vadd.f32 %v724_v8, %v712_v59  ;;  %v2354_v55 = vld [vmem:[#allocation4 + $0x4c] sm:$0xf0] }
 0x18b   :  { %v700_v25 = vpop.f32.mrf.mxu1  ;;  %1386 = vmatpush.bf16.msra.mxu2 %v1996_v57  ;;  %v2371_v57 = vld [vmem:[#allocation4 + $0xd4] sm:$0xf0] }
 0x18c   :  { %v1952_v38 = vmul.f32 -1.442695, %v725_v21  ;;  %v735_v62 = vmul.f32 %v2985_v41, %v734_v12  ;;  %v1961_v25 = vld [vmem:[#allocation4 + $0x10] sm:$0xf0] }
 0x18d   :  { %v2453_v58 = vpop.eup %2452  ;;  %v1964_v46 = vor.u32 %v2344_v17, %v1961_v25  ;;  %v2357_v17 = vld [vmem:[#allocation4 + $0x6c] sm:$0xf] }
 0x18e   :  { %v752_v20 = vmul.f32 %v2453_v58, %v2982_v36  ;;  %2454 = vpow2.f32 %v1952_v38  ;;  %v736_v13 = vadd.f32 %v2985_v41, %v735_v62  ;;  %vm757_vm14 = vweird.f32 %v2453_v58  ;;  %v1977_v36 = vld [vmem:[#allocation4 + $0x30] sm:$0xf0]  ;;  %v2081_v38 = vld [vmem:[#allocation4 + $0xf8] sm:$0xf0] }
 0x18f   :  { %2456 = vtanh.f32 %v699_v1  ;;  %vm758_vm1 = vmor %vm756_vm0, %vm757_vm14  ;;  %v1980_v43 = vor.u32 %v2348_v23, %v1977_v36  ;;  %v2084_v50 = vor.u32 %v2373_v34, %v2081_v38  ;;  %v2167_v36 = vld [vmem:[#allocation4 + $0x1a0] sm:$0xf]  ;;  %v2017_v34 = vld [vmem:[#allocation4 + $0x78] sm:$0xf0] }
 0x190   :  { %v753_v54 = vsub.f32 1.0, %v752_v20  ;;  %v740_v35 = vsel %vm3005_vm15, %v2985_v41, %v736_v13  ;;  %v1991_v41 = vld [vmem:[#allocation4 + $0x40] sm:$0xf]  ;;  %v2369_v20 = vld [vmem:[#allocation4 + $0xcc] sm:$0xf]  ;;  %v2020_v38 = vor.u32 %v2357_v17, %v2017_v34 }
 0x191   :  { %v726_v22 = vpop.f32.mrf.mxu3  ;;  %v745_v3 = vsel %vm742_vm3, %v744_v30, %v740_v35  ;;  %1387 = vmatpush.bf16.msra.mxu2 %v1980_v43  ;;  %v1992_v21 = vor.u32 %v2354_v55, %v1991_v41  ;;  %v2068_v31 = vor.u32 %v2369_v20, %v2065_v47  ;;  %v2047_v41 = vld [vmem:[#allocation4 + $0xa8] sm:$0xf]  ;;  %v2367_v55 = vld [vmem:[#allocation4 + $0xb4] sm:$0xf0]  ;;  %v2153_v20 = vld [vmem:[#allocation4 + $0x190] sm:$0xf0] }
 0x192   :  { %v754_v16 = vmul.f32 %v2453_v58, %v753_v54  ;;  %v2406_v22 = vld [vmem:[#allocation4 + $0x1ec] sm:$0xf0]  ;;  %v2048_v25 = vor.u32 %v2367_v55, %v2047_v41  ;;  %v2347_v41 = vld [vmem:[#allocation4 + $0x14] sm:$0xf0]  ;;  %v2376_v55 = vld [vmem:[#allocation4 + $0x104] sm:$0xf] }
 0x193   :  { %1360 = vmatpush.bf16.msra.mxu0 %v1992_v21  ;;  %v2200_v11 = vor.u32 %v2406_v22, %v2199_v60  ;;  %v2169_v21 = vld [vmem:[#allocation4 + $0x1b0] sm:$0xf0]  ;;  %v2015_v60 = vld [vmem:[#allocation4 + $0x68] sm:$0xf]  ;;  %v2359_v22 = vld [vmem:[#allocation4 + $0x74] sm:$0xf0] }
 0x194   :  { %v2455_v61 = vpop.eup %2454  ;;  %v755_v26 = vadd.f32 %v2453_v58, %v754_v16  ;;  %v1960_v16 = vor.u32 %v2346_v0, %v1959_v49  ;;  %v2388_v49 = vld [vmem:[#allocation4 + $0x164] sm:$0xf]  ;;  %v2137_v0 = vld [vmem:[#allocation4 + $0x170] sm:$0xf0]  ;;  %v2405_v34 = vld [vmem:[#allocation4 + $0x1ec] sm:$0xf] }
 0x195   :  { %v3014_v15 = vadd.f32 1.0, %v2455_v61  ;;  %v2457_v51 = vpop.eup %2456  ;;  %1388 = vmatpush.bf16.msra.mxu2 %v1964_v46  ;;  %v2201_v61 = vld [vmem:[#allocation4 + $0x1f0] sm:$0xf0]  ;;  %v2394_v46 = vld [vmem:[#allocation4 + $0x18c] sm:$0xf0] }
 0x196   :  { %v759_v56 = vsel %vm758_vm1, %v2453_v58, %v755_v26  ;;  %v787_v59 = vmul.f32 %v2457_v51, %v745_v3  ;;  %v2080_v26 = vor.u32 %v2375_v52, %v2079_v37  ;;  %v2204_v30 = vor.u32 %v2404_v39, %v2201_v61  ;;  %v2398_v51 = vld [vmem:[#allocation4 + $0x1ac] sm:$0xf0]  ;;  %v2349_v39 = vld [vmem:[#allocation4 + $0x2c] sm:$0xf]  ;;  %v1985_v37 = vld [vmem:[#allocation4 + $0x38] sm:$0xf0] }
 0x197   :  { %v764_v42 = vsel %vm761_vm2, %v763_v28, %v759_v56  ;;  %2458 = vrcp.f32 %v3014_v15  ;;  %v782_v62 = vand.u32 2147483648, %v3014_v15  ;;  %v780_v1 = vand.u32 2147483647, %v3014_v15  ;;  %1361 = vmatpush.bf16.msra.mxu0 %v1976_v19  ;;  %v2063_v56 = vld [vmem:[#allocation4 + $0xc8] sm:$0xf] }
 0x198   :  { %v786_v6 = vmul.f32 %v764_v42, %v2917_v2  ;;  %vm776_vm5 = vweird.f32 %v3014_v15  ;;  %1389 = vmatmul.bf16.vlgmr.msra.gmra.mxu2 %v2977_v18  ;;  %v2052_v28 = vor.u32 %v2365_v29, %v2049_v53  ;;  %v2361_v42 = vld [vmem:[#allocation4 + $0x8c] sm:$0xf]  ;;  %v2392_v19 = vld [vmem:[#allocation4 + $0x184] sm:$0xf]  ;;  %v1988_v52 = vor.u32 %v2349_v39, %v1985_v37  ;;  %v2119_v29 = vld [vmem:[#allocation4 + $0x140] sm:$0xf] }
 0x199   :  { %1433 = vmatpush.bf16.msrb.mxu2 %v2084_v50  ;;  %v783_v13 = vor.u32 1.1754944e-38, %v782_v62  ;;  %vm781_vm7 = vcmp.eq.f32.partialorder %v780_v1, 8.507059e+37  ;;  %v2036_v23 = vor.u32 %v2361_v42, %v2033_v27  ;;  %v2168_v50 = vor.u32 %v2398_v51, %v2167_v36  ;;  %v2031_v62 = vld [vmem:[#allocation4 + $0x88] sm:$0xf]  ;;  %v2105_v27 = vld [vmem:[#allocation4 + $0x130] sm:$0xf0] }
 0x19a   :  { %v3018_v12 = vadd.f32 %v787_v59, %v786_v6  ;;  %v2064_v6 = vor.u32 %v2371_v57, %v2063_v56  ;;  %v2188_v59 = vor.u32 %v2400_v24, %v2185_v5  ;;  %v2032_v47 = vor.u32 %v2363_v9, %v2031_v62  ;;  %v1999_v53 = vld [vmem:[#allocation4 + $0x48] sm:$0xf]  ;;  %v2103_v57 = vld [vmem:[#allocation4 + $0x120] sm:$0xf]  ;;  %v2351_v24 = vld [vmem:[#allocation4 + $0x34] sm:$0xf0] }
 0x19b   :  { %1362 = vmatpush.bf16.msra.mxu0 %v1960_v16  ;;  %v2016_v16 = vor.u32 %v2359_v22, %v2015_v60  ;;  %v1983_v42 = vld [vmem:[#allocation4 + $0x28] sm:$0xf]  ;;  %v2382_v5 = vld [vmem:[#allocation4 + $0x12c] sm:$0xf0]  ;;  %v2087_v36 = vld [vmem:[#allocation4 + $0x100] sm:$0xf] }
 0x19c   :  { %2460 = vtanh.f32 %v3018_v12  ;;  %v2104_v51 = vor.u32 %v2382_v5, %v2103_v57  ;;  %v2089_v17 = vld [vmem:[#allocation4 + $0x110] sm:$0xf0]  ;;  %v2191_v62 = vld [vmem:[#allocation4 + $0x1c8] sm:$0xf]  ;;  %v2403_v9 = vld [vmem:[#allocation4 + $0x1d4] sm:$0xf0] }
 0x19d   :  { %v2459_v8 = vpop.eup %2458  ;;  %1434 = vmatpush.bf16.msrb.mxu2 %v2068_v31  ;;  %v2135_v31 = vld [vmem:[#allocation4 + $0x160] sm:$0xf]  ;;  %v2159_v22 = vld [vmem:[#allocation4 + $0x188] sm:$0xf]  ;;  %v2395_v39 = vld [vmem:[#allocation4 + $0x194] sm:$0xf0] }
 0x19e   :  { %v772_v2 = vmul.f32 %v2459_v8, %v3014_v15  ;;  %vm777_vm4 = vweird.f32 %v2459_v8  ;;  %v2183_v15 = vld [vmem:[#allocation4 + $0x1c0] sm:$0xf]  ;;  %1363 = vmatmul.bf16.vlgmr.msra.gmra.mxu0 %v2977_v18  ;;  %v2379_v5 = vld [vmem:[#allocation4 + $0x114] sm:$0xf0] }
 0x19f   :  { %vm3025_vm6 = vmor %vm776_vm5, %vm777_vm4  ;;  %1407 = vmatpush.bf16.msrb.mxu0 %v2080_v26  ;;  %v2184_v43 = vor.u32 %v2402_v7, %v2183_v15  ;;  %v2140_v26 = vor.u32 %v2388_v49, %v2137_v0  ;;  %v1969_v7 = vld [vmem:[#allocation4 + $0x18] sm:$0xf0]  ;;  %v2393_v49 = vld [vmem:[#allocation4 + $0x18c] sm:$0xf] }
 0x1a0   :  { %v773_v58 = vsub.f32 1.0, %v772_v2  ;;  %v2151_v2 = vld [vmem:[#allocation4 + $0x180] sm:$0xf]  ;;  %v2161_v0 = vld [vmem:[#allocation4 + $0x198] sm:$0xf0] }
 0x1a1   :  { %1435 = vmatpush.bf16.msrb.mxu2 %v2052_v28  ;;  %v2152_v48 = vor.u32 %v2394_v46, %v2151_v2  ;;  %v2384_v28 = vld [vmem:[#allocation4 + $0x144] sm:$0xf]  ;;  %v2092_v46 = vor.u32 %v2376_v55, %v2089_v17  ;;  %v2164_v37 = vor.u32 %v2393_v49, %v2161_v0 }
 0x1a2   :  { %v774_v54 = vmul.f32 %v2459_v8, %v773_v58  ;;  %v2461_v45 = vpop.eup %2460 }
 0x1a3   :  { %1408 = vmatpush.bf16.msrb.mxu0 %v2064_v6  ;;  %v2380_v6 = vld [vmem:[#allocation4 + $0x124] sm:$0xf] }
 0x1a4   :  { %v775_v40 = vadd.f32 %v2459_v8, %v774_v54  ;;  %v2001_v54 = vld [vmem:[#allocation4 + $0x58] sm:$0xf0] }
 0x1a5   :  { %1436 = vmatpush.bf16.msrb.mxu2 %v2036_v23  ;;  %v2004_v1 = vor.u32 %v2353_v14, %v2001_v54  ;;  %v1984_v23 = vor.u32 %v2351_v24, %v1983_v42  ;;  %v2401_v14 = vld [vmem:[#allocation4 + $0x1cc] sm:$0xf]  ;;  %v2175_v54 = vld [vmem:[#allocation4 + $0x1a8] sm:$0xf] }
 0x1a6   :  { %v779_v32 = vsel %vm3025_vm6, %v2459_v8, %v775_v40  ;;  %v2396_v8 = vld [vmem:[#allocation4 + $0x1a4] sm:$0xf]  ;;  %v2390_v40 = vld [vmem:[#allocation4 + $0x16c] sm:$0xf0]  ;;  %v2095_v24 = vld [vmem:[#allocation4 + $0x108] sm:$0xf] }
 0x1a7   :  { %v784_v44 = vsel %vm781_vm7, %v783_v13, %v779_v32  ;;  %v2172_v58 = vor.u32 %v2396_v8, %v2169_v21  ;;  %1409 = vmatpush.bf16.msrb.mxu0 %v2048_v25  ;;  %v2156_v13 = vor.u32 %v2392_v19, %v2153_v20  ;;  %v2386_v32 = vld [vmem:[#allocation4 + $0x14c] sm:$0xf0]  ;;  %v2136_v61 = vor.u32 %v2390_v40, %v2135_v31  ;;  %v2207_v8 = vld [vmem:[#allocation4 + $0x1e8] sm:$0xf]  ;;  %v2407_v25 = vld [vmem:[#allocation4 + $0x1f4] sm:$0xf0] }
 0x1a8   :  { %v790_v35 = vmul.f32 %v2461_v45, %v784_v44  ;;  %v2355_v45 = vld [vmem:[#allocation4 + $0x54] sm:$0xf0]  ;;  %v2345_v44 = vld [vmem:[#allocation4 + $0xc] sm:$0xf]  ;;  %v2193_v19 = vld [vmem:[#allocation4 + $0x1d8] sm:$0xf0]  ;;  %v2192_v20 = vor.u32 %v2403_v9, %v2191_v62 }
 0x1a9   :  { %1437 = vmatpush.bf16.msrb.mxu2 %v2020_v38  ;;  %v2000_v15 = vor.u32 %v2355_v45, %v1999_v53  ;;  %v2209_v38 = vld [vmem:[#allocation4 + $0x1f8] sm:$0xf0]  ;;  %v2397_v31 = vld [vmem:[#allocation4 + $0x1ac] sm:$0xf]  ;;  %v2127_v53 = vld [vmem:[#allocation4 + $0x148] sm:$0xf] }
 0x1aa   :  { %v3032_v3 = vpack.c.bf16 %v790_v35, %v790_v35  ;;  %v2121_v35 = vld [vmem:[#allocation4 + $0x150] sm:$0xf0]  ;;  %v2177_v40 = vld [vmem:[#allocation4 + $0x1b8] sm:$0xf0]  ;;  %v2387_v45 = vld [vmem:[#allocation4 + $0x154] sm:$0xf0] }
 0x1ab   :  { %1410 = vmatpush.bf16.msrb.mxu0 %v2032_v47  ;;  %v2124_v56 = vor.u32 %v2384_v28, %v2121_v35  ;;  %v2196_v47 = vor.u32 %v2401_v14, %v2193_v19  ;;  %v2180_v60 = vor.u32 %v2397_v31, %v2177_v40  ;;  %v2129_v28 = vld [vmem:[#allocation4 + $0x158] sm:$0xf0]  ;;  %v2128_v35 = vor.u32 %v2387_v45, %v2127_v53  ;;  %v2410_v31 = vld [vmem:[%s3146_s5 + $0x10] sm:$0xff] }
 0x1ac   :  { %815 = vmatmul.bf16.vlgmr.msra.gmra.mxu1 %v3032_v3  ;;  %841 = vmatmul.bf16.vlgmr.msra.gmra.mxu3 %v3032_v3 }
 0x1ad   :  { %1368 = vmatpush.bf16.msra.mxu1 %v2200_v11  ;;  %1394 = vmatpush.bf16.msra.mxu3 %v2204_v30  ;;  %v1972_v11 = vor.u32 %v2345_v44, %v1969_v7  ;;  %v2120_v30 = vor.u32 %v2386_v32, %v2119_v29  ;;  %v2391_v29 = vld [vmem:[#allocation4 + $0x174] sm:$0xf0]  ;;  %v2389_v32 = vld [vmem:[#allocation4 + $0x16c] sm:$0xf]  ;;  %v2111_v7 = vld [vmem:[#allocation4 + $0x128] sm:$0xf] }
 0x1ae   :  { %1438 = vmatpush.bf16.msrb.mxu2 %v2004_v1  ;;  %v2399_v1 = vld [vmem:[#allocation4 + $0x1b4] sm:$0xf0]  ;;  %v2385_v44 = vld [vmem:[#allocation4 + $0x14c] sm:$0xf] }
 0x1af   :  { %1411 = vmatpush.bf16.msrb.mxu0 %v2016_v16  ;;  %v2160_v16 = vor.u32 %v2395_v39, %v2159_v22  ;;  %v2409_v39 = vld [vmem:[%s3146_s5 + $0x8] sm:$0xff] }
 0x1b1   :  { %1369 = vmatpush.bf16.msra.mxu1 %v2184_v43  ;;  %1395 = vmatpush.bf16.msra.mxu3 %v2188_v59  ;;  %v2108_v43 = vor.u32 %v2380_v6, %v2105_v27  ;;  %v2378_v59 = vld [vmem:[#allocation4 + $0x10c] sm:$0xf0]  ;;  %v2377_v6 = vld [vmem:[#allocation4 + $0x10c] sm:$0xf]  ;;  %v2097_v27 = vld [vmem:[#allocation4 + $0x118] sm:$0xf0] }
 0x1b2   :  { %1439 = vmatpush.bf16.msrb.mxu2 %v1988_v52  ;;  %v2088_v2 = vor.u32 %v2378_v59, %v2087_v36  ;;  %v2143_v52 = vld [vmem:[#allocation4 + $0x168] sm:$0xf]  ;;  %v2100_v36 = vor.u32 %v2377_v6, %v2097_v27 }
 0x1b3   :  { %1412 = vmatpush.bf16.msrb.mxu0 %v2000_v15  ;;  %v2132_v15 = vor.u32 %v2385_v44, %v2129_v28 }
 0x1b5   :  { %1370 = vmatpush.bf16.msra.mxu1 %v2168_v50  ;;  %1396 = vmatpush.bf16.msra.mxu3 %v2172_v58  ;;  %v2208_v50 = vor.u32 %v2407_v25, %v2207_v8  ;;  %v2212_v58 = vor.u32 %v2405_v34, %v2209_v38  ;;  %v2415_v8 = vld [vmem:[%s3146_s5 + $0x38] sm:$0xff]  ;;  %v2414_v34 = vld [vmem:[%s3146_s5 + $0x30] sm:$0xff] }
 0x1b6   :  { %1440 = vmatpush.bf16.msrb.mxu2 %v1972_v11  ;;  %v2383_v11 = vld [vmem:[#allocation4 + $0x134] sm:$0xf0] }
 0x1b7   :  { %1413 = vmatpush.bf16.msrb.mxu0 %v1984_v23  ;;  %v2112_v57 = vor.u32 %v2383_v11, %v2111_v7  ;;  %v2096_v23 = vor.u32 %v2379_v5, %v2095_v24 }
 0x1b9   :  { %1371 = vmatpush.bf16.msra.mxu1 %v2152_v48  ;;  %1397 = vmatpush.bf16.msra.mxu3 %v2156_v13  ;;  %v3269_v48 = vmov 0   ;;  %v2176_v13 = vor.u32 %v2399_v1, %v2175_v54  ;;  %v2411_v54 = vld [vmem:[%s3146_s5 + $0x18] sm:$0xff] }
 0x1ba   :  { %1441 = vmatmul.bf16.vlgmr.msrb.gmra.mxu2 %v2977_v18 }
 0x1bc   :  { %867 = vmatmul.bf16.vlgmr.msrb.gmra.mxu1 %v3032_v3  ;;  %893 = vmatmul.bf16.vlgmr.msrb.gmra.mxu3 %v3032_v3  ;;  %v1967_v3 = vld [vmem:[#allocation4 + $0x8] sm:$0xf] }
 0x1bd   :  { %1372 = vmatpush.bf16.msra.mxu1 %v2136_v61  ;;  %1398 = vmatpush.bf16.msra.mxu3 %v2140_v26  ;;  %v1968_v21 = vor.u32 %v2347_v41, %v1967_v3  ;;  %v2144_v61 = vor.u32 %v2391_v29, %v2143_v52  ;;  %v2408_v52 = vld [vmem:[%s3146_s5] sm:$0xff] }
 0x1bf   :  { %1414 = vmatpush.bf16.msrb.mxu0 %v1968_v21 }
 0x1c1   :  { %1373 = vmatpush.bf16.msra.mxu1 %v2120_v30  ;;  %1399 = vmatpush.bf16.msra.mxu3 %v2124_v56  ;;  %v2381_v30 = vld [vmem:[#allocation4 + $0x12c] sm:$0xf]  ;;  %v2113_v56 = vld [vmem:[#allocation4 + $0x138] sm:$0xf0] }
 0x1c2   :  { %1415 = vmatmul.bf16.vlgmr.msrb.gmra.mxu0 %v2977_v18  ;;  %v2145_v18 = vld [vmem:[#allocation4 + $0x178] sm:$0xf0]  ;;  %v2116_v42 = vor.u32 %v2381_v30, %v2113_v56 }
 0x1c3   :  { %v2148_v26 = vor.u32 %v2389_v32, %v2145_v18  ;;  %1656 = vmatpush.bf16.msra.mxu0 %v2415_v8  ;;  %v3077_v32 = vld [vmem:[%s3145_s4] sm:$0xf] }
 0x1c4   :  { %v1027_v45 = vperm.slane %v3077_v32, 0  ;;  %v1028_v24 = vperm.slane %v3077_v32, 1 }
 0x1c5   :  { %1374 = vmatpush.bf16.msra.mxu1 %v2104_v51  ;;  %1400 = vmatpush.bf16.msra.mxu3 %v2108_v43  ;;  %v803_v51 = vpop.f32.mrf.mxu0  ;;  %v829_v43 = vpop.f32.mrf.mxu2 }
 0x1c6   :  { %v804_v21 = vadd.f32 %v803_v51, %v3263_v33  ;;  %v2412_v33 = vld [vmem:[%s3146_s5 + $0x20] sm:$0xff] }
 0x1c7   :  { %1657 = vmatpush.bf16.msra.mxu0 %v2414_v34 }
 0x1c9   :  { %1375 = vmatpush.bf16.msra.mxu1 %v2088_v2  ;;  %1401 = vmatpush.bf16.msra.mxu3 %v2092_v46  ;;  %v2413_v46 = vld [vmem:[%s3146_s5 + $0x28] sm:$0xff] }
 0x1cb   :  { %1658 = vmatpush.bf16.msra.mxu0 %v2413_v46 }
 0x1cc   :  { %1402 = vmatmul.bf16.vlgmr.msra.gmra.mxu3 %v3269_v48  ;;  %1376 = vmatmul.bf16.vlgmr.msra.gmra.mxu1 %v3269_v48 }
 0x1cd   :  { %1420 = vmatpush.bf16.msrb.mxu1 %v2208_v50  ;;  %1446 = vmatpush.bf16.msrb.mxu3 %v2212_v58  ;;  %v805_v59 = vpop.f32.mrf.mxu0  ;;  %v831_v3 = vpop.f32.mrf.mxu2  ;;  %v830_v50 = vadd.f32 %v829_v43, %v3264_v10 }
 0x1cf   :  { %1659 = vmatpush.bf16.msra.mxu0 %v2412_v33 }
 0x1d1   :  { %1421 = vmatpush.bf16.msrb.mxu1 %v2192_v20  ;;  %1447 = vmatpush.bf16.msrb.mxu3 %v2196_v47 }
 0x1d3   :  { %1660 = vmatpush.bf16.msra.mxu0 %v2411_v54  ;;  %v2422_v54 = vld [vmem:[%s3146_s5 + $0x70] sm:$0xff] }
 0x1d5   :  { %1422 = vmatpush.bf16.msrb.mxu1 %v2176_v13  ;;  %1448 = vmatpush.bf16.msrb.mxu3 %v2180_v60  ;;  %v855_v41 = vpop.f32.mrf.mxu0  ;;  %v881_v55 = vpop.f32.mrf.mxu2 }
 0x1d6   :  { %v882_v0 = vadd.f32 %v881_v55, %v2885_v4  ;;  %v856_v4 = vadd.f32 %v855_v41, %v2883_v63 }
 0x1d7   :  { %1661 = vmatpush.bf16.msra.mxu0 %v2410_v31 }
 0x1d9   :  { %1423 = vmatpush.bf16.msrb.mxu1 %v2160_v16  ;;  %1449 = vmatpush.bf16.msrb.mxu3 %v2164_v37 }
 0x1db   :  { %1662 = vmatpush.bf16.msra.mxu0 %v2409_v39 }
 0x1dd   :  { %1424 = vmatpush.bf16.msrb.mxu1 %v2144_v61  ;;  %1450 = vmatpush.bf16.msrb.mxu3 %v2148_v26  ;;  %v857_v17 = vpop.f32.mrf.mxu0  ;;  %v883_v25 = vpop.f32.mrf.mxu2 }
 0x1df   :  { %1663 = vmatpush.bf16.msra.mxu0 %v2408_v52 }
 0x1e1   :  { %1425 = vmatpush.bf16.msrb.mxu1 %v2128_v35  ;;  %1451 = vmatpush.bf16.msrb.mxu3 %v2132_v15 }
 0x1e5   :  { %1426 = vmatpush.bf16.msrb.mxu1 %v2112_v57  ;;  %1452 = vmatpush.bf16.msrb.mxu3 %v2116_v42 }
 0x1e9   :  { %1427 = vmatpush.bf16.msrb.mxu1 %v2096_v23  ;;  %1453 = vmatpush.bf16.msrb.mxu3 %v2100_v36 }
 0x1ec   :  { %1428 = vmatmul.bf16.vlgmr.msrb.gmra.mxu1 %v3269_v48  ;;  %1454 = vmatmul.bf16.vlgmr.msrb.gmra.mxu3 %v3269_v48 }
 0x21b   :  { %v3056_v62 = vpop.f32.mrf.mxu2  ;;  %v1364_v14 = vpop.f32.mrf.mxu0 }
 0x21c   :  { %v1365_v30 = vadd.f32 %v1364_v14, %v1027_v45  ;;  %v1391_v8 = vadd.f32 %v3056_v62, %v1028_v24  ;;  %v2416_v24 = vld [vmem:[%s3146_s5 + $0x40] sm:$0xff] }
 0x223   :  { %v1392_v40 = vpop.f32.mrf.mxu2  ;;  %v1366_v13 = vpop.f32.mrf.mxu0 }
 0x229   :  { %v816_v38 = vpop.f32.mrf.mxu1 }
 0x22a   :  { %v817_v2 = vadd.f32 %v816_v38, %v804_v21 }
 0x22c   :  { %v1954_v58 = vmul.f32 -1.442695, %v817_v2 }
 0x22e   :  { %2462 = vpow2.f32 %v1954_v58 }
 0x22f   :  { %v842_v9 = vpop.f32.mrf.mxu3 }
 0x230   :  { %v843_v19 = vadd.f32 %v842_v9, %v830_v50  ;;  %v2423_v50 = vld [vmem:[%s3146_s5 + $0x78] sm:$0xff] }
 0x231   :  { %v818_v20 = vpop.f32.mrf.mxu1  ;;  %1669 = vmatpush.bf16.msra.mxu1 %v2423_v50 }
 0x232   :  { %v1955_v47 = vmul.f32 -1.442695, %v843_v19 }
 0x234   :  { %v2463_v10 = vpop.eup %2462  ;;  %2464 = vpow2.f32 %v1955_v47 }
 0x235   :  { %v901_v1 = vadd.f32 1.0, %v2463_v10  ;;  %1670 = vmatpush.bf16.msra.mxu1 %v2422_v54 }
 0x237   :  { %2466 = vrcp.f32 %v901_v1  ;;  %v844_v48 = vpop.f32.mrf.mxu3  ;;  %v913_v63 = vand.u32 2147483648, %v901_v1  ;;  %vm907_vm10 = vweird.f32 %v901_v1  ;;  %v911_v23 = vand.u32 2147483647, %v901_v1 }
 0x238   :  { %v2421_v48 = vld [vmem:[%s3146_s5 + $0x68] sm:$0xff] }
 0x239   :  { %v868_v60 = vpop.f32.mrf.mxu1  ;;  %v914_v21 = vor.u32 1.1754944e-38, %v913_v63  ;;  %vm912_vm15 = vcmp.eq.f32.partialorder %v911_v23, 8.507059e+37  ;;  %1671 = vmatpush.bf16.msra.mxu1 %v2421_v48 }
 0x23a   :  { %v2465_v22 = vpop.eup %2464  ;;  %v869_v11 = vadd.f32 %v868_v60, %v856_v4 }
 0x23b   :  { %v920_v49 = vadd.f32 1.0, %v2465_v22 }
 0x23d   :  { %v2467_v16 = vpop.eup %2466  ;;  %2468 = vrcp.f32 %v920_v49  ;;  %v3081_v15 = vpop.f32.mrf.mxu2  ;;  %v932_v56 = vand.u32 2147483648, %v920_v49  ;;  %v930_v6 = vand.u32 2147483647, %v920_v49  ;;  %vm926_vm11 = vweird.f32 %v920_v49 }
 0x23e   :  { %v903_v37 = vmul.f32 %v2467_v16, %v901_v1  ;;  %vm908_vm8 = vweird.f32 %v2467_v16 }
 0x23f   :  { %v894_v29 = vpop.f32.mrf.mxu3  ;;  %v3084_v27 = vpop.f32.mrf.mxu0  ;;  %vm3086_vm12 = vmor %vm907_vm10, %vm908_vm8  ;;  %v933_v41 = vor.u32 1.1754944e-38, %v932_v56  ;;  %vm931_vm14 = vcmp.eq.f32.partialorder %v930_v6, 8.507059e+37 }
 0x240   :  { %v904_v18 = vsub.f32 1.0, %v903_v37  ;;  %v895_v61 = vadd.f32 %v894_v29, %v882_v0  ;;  %v2420_v37 = vld [vmem:[%s3146_s5 + $0x60] sm:$0xff] }
 0x241   :  { %v870_v26 = vpop.f32.mrf.mxu1  ;;  %1672 = vmatpush.bf16.msra.mxu1 %v2420_v37 }
 0x242   :  { %v1956_v53 = vmul.f32 -1.442695, %v895_v61  ;;  %v905_v28 = vmul.f32 %v2467_v16, %v904_v18 }
 0x243   :  { %v2469_v44 = vpop.eup %2468 }
 0x244   :  { %v922_v35 = vmul.f32 %v2469_v44, %v920_v49  ;;  %2470 = vpow2.f32 %v1956_v53  ;;  %v906_v57 = vadd.f32 %v2467_v16, %v905_v28  ;;  %vm927_vm9 = vweird.f32 %v2469_v44  ;;  %v2419_v53 = vld [vmem:[%s3146_s5 + $0x58] sm:$0xff]  ;;  %v2418_v28 = vld [vmem:[%s3146_s5 + $0x50] sm:$0xff] }
 0x245   :  { %2472 = vtanh.f32 %v869_v11  ;;  %vm928_vm13 = vmor %vm926_vm11, %vm927_vm9  ;;  %v1444_v2 = vpop.f32.mrf.mxu2  ;;  %1673 = vmatpush.bf16.msra.mxu1 %v2419_v53  ;;  %v1030_v11 = vperm.slane %v3077_v32, 3 }
 0x246   :  { %v923_v7 = vsub.f32 1.0, %v922_v35  ;;  %v910_v55 = vsel %vm3086_vm12, %v2467_v16, %v906_v57 }
 0x247   :  { %v896_v42 = vpop.f32.mrf.mxu3  ;;  %v915_v46 = vsel %vm912_vm15, %v914_v21, %v910_v55  ;;  %v1418_v62 = vpop.f32.mrf.mxu0 }
 0x248   :  { %v924_v5 = vmul.f32 %v2469_v44, %v923_v7  ;;  %v2417_v7 = vld [vmem:[%s3146_s5 + $0x48] sm:$0xff]  ;;  %v1029_v42 = vperm.slane %v3077_v32, 2 }
 0x249   :  { %v1377_v36 = vpop.f32.mrf.mxu1  ;;  %1674 = vmatpush.bf16.msra.mxu1 %v2418_v28 }
 0x24a   :  { %v2471_v51 = vpop.eup %2470  ;;  %v925_v59 = vadd.f32 %v2469_v44, %v924_v5  ;;  %v1378_v3 = vadd.f32 %v1377_v36, %v1365_v30  ;;  %v1443_v5 = vadd.f32 %v3081_v15, %v1030_v11  ;;  %v1417_v23 = vadd.f32 %v3084_v27, %v1029_v42 }
 0x24b   :  { %v940_v17 = vadd.f32 1.0, %v2471_v51  ;;  %v2473_v9 = vpop.eup %2472 }
 0x24c   :  { %v929_v25 = vsel %vm928_vm13, %v2469_v44, %v925_v59  ;;  %v2213_v34 = vmul.f32 -1.442695, %v1378_v3  ;;  %v957_v19 = vmul.f32 %v2473_v9, %v915_v46 }
 0x24d   :  { %v934_v38 = vsel %vm931_vm14, %v933_v41, %v929_v25  ;;  %2474 = vrcp.f32 %v940_v17  ;;  %v952_v60 = vand.u32 2147483648, %v940_v17  ;;  %v950_v49 = vand.u32 2147483647, %v940_v17  ;;  %1675 = vmatpush.bf16.msra.mxu1 %v2417_v7 }
 0x24e   :  { %v956_v58 = vmul.f32 %v934_v38, %v3018_v12  ;;  %2476 = vpow2.f32 %v2213_v34  ;;  %vm946_vm1 = vweird.f32 %v940_v17 }
 0x24f   :  { %v1403_v33 = vpop.f32.mrf.mxu3  ;;  %v953_v29 = vor.u32 1.1754944e-38, %v952_v60  ;;  %vm951_vm3 = vcmp.eq.f32.partialorder %v950_v49, 8.507059e+37 }
 0x250   :  { %v1404_v14 = vadd.f32 %v1403_v33, %v1391_v8  ;;  %v958_v1 = vadd.f32 %v957_v19, %v956_v58 }
 0x251   :  { %v1379_v20 = vpop.f32.mrf.mxu1  ;;  %1676 = vmatpush.bf16.msra.mxu1 %v2416_v24 }
 0x252   :  { %v2214_v47 = vmul.f32 -1.442695, %v1404_v14 }
 0x253   :  { %v2475_v10 = vpop.eup %2474 }
 0x254   :  { %v942_v31 = vmul.f32 %v2475_v10, %v940_v17  ;;  %2478 = vpow2.f32 %v2214_v47  ;;  %v2477_v40 = vpop.eup %2476  ;;  %vm947_vm0 = vweird.f32 %v2475_v10 }
 0x255   :  { %2480 = vtanh.f32 %v958_v1  ;;  %v3103_v22 = vadd.f32 1.0, %v2477_v40  ;;  %vm948_vm2 = vmor %vm946_vm1, %vm947_vm0 }
 0x256   :  { %v943_v12 = vsub.f32 1.0, %v942_v31 }
 0x257   :  { %v1405_v13 = vpop.f32.mrf.mxu3  ;;  %2482 = vrcp.f32 %v3103_v22  ;;  %vm1468_vm4 = vweird.f32 %v3103_v22  ;;  %v1474_v15 = vand.u32 2147483648, %v3103_v22  ;;  %v1472_v8 = vand.u32 2147483647, %v3103_v22 }
 0x258   :  { %v944_v39 = vmul.f32 %v2475_v10, %v943_v12 }
 0x259   :  { %v1475_v2 = vor.u32 1.1754944e-38, %v1474_v15  ;;  %vm1473_vm10 = vcmp.eq.f32.partialorder %v1472_v8, 8.507059e+37 }
 0x25a   :  { %v2479_v0 = vpop.eup %2478  ;;  %v945_v16 = vadd.f32 %v2475_v10, %v944_v39 }
 0x25b   :  { %v1481_v52 = vadd.f32 1.0, %v2479_v0  ;;  %v2481_v61 = vpop.eup %2480 }
 0x25c   :  { %v949_v18 = vsel %vm948_vm2, %v2475_v10, %v945_v16 }
 0x25d   :  { %2484 = vrcp.f32 %v1481_v52  ;;  %v954_v26 = vsel %vm951_vm3, %v953_v29, %v949_v18  ;;  %v2483_v44 = vpop.eup %2482  ;;  %vm1487_vm6 = vweird.f32 %v1481_v52  ;;  %v1493_v55 = vand.u32 2147483648, %v1481_v52 }
 0x25e   :  { %v960_v4 = vmul.f32 %v2481_v61, %v954_v26  ;;  %v1464_v56 = vmul.f32 %v2483_v44, %v3103_v22  ;;  %vm1469_vm5 = vweird.f32 %v2483_v44  ;;  %v1491_v25 = vand.u32 2147483647, %v1481_v52 }
 0x25f   :  { %vm3128_vm8 = vmor %vm1468_vm4, %vm1469_vm5  ;;  %v1494_v38 = vor.u32 1.1754944e-38, %v1493_v55 }
 0x260   :  { %v1522_v45 = vpack.c.bf16 %v960_v4, %v960_v4  ;;  %v1465_v6 = vsub.f32 1.0, %v1464_v56  ;;  %vm1492_vm11 = vcmp.eq.f32.partialorder %v1491_v25, 8.507059e+37 }
 0x262   :  { %1664 = vmatmul.bf16.vlgmr.msra.gmra.mxu0 %v1522_v45  ;;  %v1466_v59 = vmul.f32 %v2483_v44, %v1465_v6 }
 0x263   :  { %v2485_v35 = vpop.eup %2484 }
 0x264   :  { %v1483_v30 = vmul.f32 %v2485_v35, %v1481_v52  ;;  %vm1488_vm7 = vweird.f32 %v2485_v35  ;;  %v1467_v17 = vadd.f32 %v2483_v44, %v1466_v59  ;;  %v2429_v52 = vld [vmem:[%s3147_s6] ss:$0 sm:$0xff] }
 0x265   :  { %vm1489_vm9 = vmor %vm1487_vm6, %vm1488_vm7 }
 0x266   :  { %v1484_v63 = vsub.f32 1.0, %v1483_v30  ;;  %v1471_v46 = vsel %vm3128_vm8, %v2483_v44, %v1467_v17 }
 0x267   :  { %v1476_v14 = vsel %vm1473_vm10, %v1475_v2, %v1471_v46 }
 0x268   :  { %v1485_v43 = vmul.f32 %v2485_v35, %v1484_v63 }
 0x269   :  { %v1429_v57 = vpop.f32.mrf.mxu1 }
 0x26a   :  { %v1430_v41 = vadd.f32 %v1429_v57, %v1417_v23  ;;  %v1486_v21 = vadd.f32 %v2485_v35, %v1485_v43 }
 0x26c   :  { %v1490_v50 = vsel %vm1489_vm9, %v2485_v35, %v1486_v21 }
 0x26d   :  { %v1495_v62 = vsel %vm1492_vm11, %v1494_v38, %v1490_v50 }
 0x26e   :  { %v1517_v19 = vmul.f32 0.0, %v1495_v62 }
 0x26f   :  { %v1455_v36 = vpop.f32.mrf.mxu3 }
 0x270   :  { %v1456_v51 = vadd.f32 %v1455_v36, %v1443_v5 }
 0x271   :  { %v1431_v3 = vpop.f32.mrf.mxu1 }
 0x272   :  { %v2215_v32 = vmul.f32 -1.442695, %v1456_v51 }
 0x274   :  { %2486 = vpow2.f32 %v2215_v32 }
 0x275   :  { %2488 = vtanh.f32 %v1430_v41 }
 0x277   :  { %v1457_v34 = vpop.f32.mrf.mxu3 }
 0x27a   :  { %v2487_v58 = vpop.eup %2486 }
 0x27b   :  { %v1501_v33 = vadd.f32 1.0, %v2487_v58  ;;  %v2489_v9 = vpop.eup %2488 }
 0x27c   :  { %v1518_v20 = vmul.f32 %v2489_v9, %v1476_v14 }
 0x27d   :  { %2490 = vrcp.f32 %v1501_v33  ;;  %v1513_v31 = vand.u32 2147483648, %v1501_v33  ;;  %v1511_v12 = vand.u32 2147483647, %v1501_v33  ;;  %vm1507_vm13 = vweird.f32 %v1501_v33 }
 0x27e   :  { %v1519_v54 = vadd.f32 %v1518_v20, %v1517_v19 }
 0x27f   :  { %v1514_v13 = vor.u32 1.1754944e-38, %v1513_v31  ;;  %vm1512_vm15 = vcmp.eq.f32.partialorder %v1511_v12, 8.507059e+37 }
 0x280   :  { %2492 = vtanh.f32 %v1519_v54 }
 0x283   :  { %v2491_v47 = vpop.eup %2490 }
 0x284   :  { %v1503_v10 = vmul.f32 %v2491_v47, %v1501_v33  ;;  %vm1508_vm12 = vweird.f32 %v2491_v47 }
 0x285   :  { %vm1509_vm14 = vmor %vm1507_vm13, %vm1508_vm12 }
 0x286   :  { %v1504_v1 = vsub.f32 1.0, %v1503_v10  ;;  %v2493_v22 = vpop.eup %2492 }
 0x288   :  { %v1505_v40 = vmul.f32 %v2491_v47, %v1504_v1 }
 0x28a   :  { %v1506_v48 = vadd.f32 %v2491_v47, %v1505_v40 }
 0x28c   :  { %v1510_v60 = vsel %vm1509_vm14, %v2491_v47, %v1506_v48 }
 0x28d   :  { %v1515_v39 = vsel %vm1512_vm15, %v1514_v13, %v1510_v60 }
 0x28e   :  { %v1521_v49 = vmul.f32 %v2493_v22, %v1515_v39 }
 0x290   :  { %v1523_v0 = vpack.c.bf16 %v1521_v49, %v1521_v49 }
 0x292   :  { %1677 = vmatmul.bf16.vlgmr.msra.gmra.mxu1 %v1523_v0 }
 0x2df   :  { %v1665_v16 = vpop.f32.mrf.mxu0 }
 0x2e0   :  { %v1666_v29 = vadd.f32 %v2429_v52, %v1665_v16 }
 0x2e7   :  { %v1667_v37 = vpop.f32.mrf.mxu0 }
 0x30f   :  { %v1678_v18 = vpop.f32.mrf.mxu1 }
 0x310   :  { %v1679_v61 = vadd.f32 %v1678_v18, %v1666_v29 }
 0x312   :  { %v1682_v26 = vmax.f32 %v1679_v61, 0.0 }
 0x314   :  { %1683 = vst [vmem:[%s3148_s7] sm:$0xff] %v1682_v26 }
 0x317   :  { %v1680_v4 = vpop.f32.mrf.mxu1 }
 0x318   :  { %1688 = vsyncpa [#allocation3], 1 }
 0x319   :  { %1689 = vsyncpa [#allocation5], 1 }

// kernel: lstm_forward.4
= control target key start
LH: loop header
LB: loop body
LE: loop exit
PB: predicated region body
PF: predicated region fallthrough
CT: control target
= control target key end

     0   :  { %8 = vsyncpa [#allocation3], 0  ;;  %s6987_s0 = inlined_call_operand.vmem [shape: bf16[4,2,256], index: 0, kind: input, shape index: {}]   ;;  %s6988_s1 = inlined_call_operand.hbm [shape: bf16[2,384,512], index: 1, kind: input, shape index: {}]   ;;  %s6989_s2 = inlined_call_operand.vmem [shape: f32[2,1,512], index: 2, kind: input, shape index: {}]   ;;  %s6990_s3 = inlined_call_operand.vmem [shape: f32[4,2,256], index: 3, kind: output, shape index: {}]  }
   0x1   :  { %10 = vsyncpa [#allocation3 + $0x1], 0  ;;  %s5774_s12 = smov 0   ;;  %s5776_s13 = smov 0  }
   0x2   :  { %s5778_s14 = smov 0   ;;  %s5780_s15 = smov 0  }
   0x3 LB: > { %s5793_s16 = sadd.s32 4294967295, %s5749_s15   ;;  %s5796_s17 = sadd.s32 1, %s5749_s15   ;;  %s5749_s15 = sphi %s5780_s15, %s7007_s15   ;;  %s5745_s14 = sphi %s5778_s14, %s7006_s14   ;;  %s5741_s13 = sphi %s5776_s13, %s7005_s13   ;;  %s5737_s12 = sphi %s5774_s12, %s7004_s12  }
   0x4   : > { %s41_s18 = ssub.s32 %s5749_s15, %s5796_s17  ;;  %s44_s19 = sadd.s32 1, %s5745_s14 }
   0x5   : > { %p42_p0 = scmp.eq.s32.totalorder %s41_s18, 0  ;;  %p51_p1 = scmp.ne.s32.totalorder %s5745_s14, %s5741_s13 }
   0x6   : > { %p52_p2 = scmp.eq.s32.totalorder %s5749_s15, 0  ;;  %p57_p3 = scmp.ne.s32.totalorder %s5741_s13, %s5737_s12 }
   0x7   : > { %s5806_s20 = scalar_select %p42_p0, %s5745_s14, %s44_s19  }
   0x8   : > { %p53_p4 = por %p52_p2, %p51_p1  ;;  %p58_p5 = scmp.eq.s32.totalorder %s5793_s16, 0 }
   0x9   : > { %p107_p6 = scmp.eq.s32.totalorder %s5793_s16, 1  ;;  %p5585_p8 = scmp.lt.s32.totalorder %s5749_s15, 2 }
   0xa   : > { %p5810_p7 = por %p58_p5, %p57_p3  ;;  %s136_s23 = sand.u32 1, %s5745_s14  }
   0xb   : > { %p5817_p9 = por %p107_p6, %p51_p1  ;;  %s5576_s24 = smul.u32 768, %s136_s23 }
   0xc   : > { %s5577_s25 = smul.u32 768, %s5749_s15  ;;  %p5823_p10 = pnand %p5585_p8, %p53_p4 }
   0xd   : > { %s140_s30 = scalar_lea.vmem [#allocation2], %s5576_s24  ;;  %p3633_p11 = scmp.ge.s32.totalorder %s5749_s15, 1 }
   0xe   : > { %s145_s29 = scalar_lea.hbm %s6988_s1, %s5577_s25  ;;  %s148_s4 = sshll.u32 %s140_s30, 4  ;;  %s149_s4 = int_to_ptr.vmem [resolvable:$true] %s148_s4 }
   0xf   : > { %s146_s5 = sshll.u32 %s145_s29, 4  ;;  %s137_s6 = scalar_lea.sflag [#allocation3], %s136_s23  ;;  %s147_s5 = int_to_ptr.hbm [resolvable:$true] %s146_s5 }
  0x10   : > { %s5685_s7 = sshra.s32 %s147_s5, 4  ;;  %p5689_p13 = pneg %p5823_p10  ;;  %s5686_s7 = int_to_ptr.hbm [resolvable:$true] %s5685_s7 }
  0x11   : > { %s5687_s8 = scalar_lea.hbm %s5686_s7, 768  ;;  %s5692_s11 = scalar_lea.hbm %s6988_s1, 1536 }
  0x12   : > { %p5688_p12 = scmp.ne.s32.totalorder %s5686_s7, %s5687_s8  ;;  %p5693_p2 = scmp.lt.s32.totalorder %s5686_s7, %s6988_s1 }
  0x13   : > { %p5694_p3 = scmp.lt.s32.totalorder %s5692_s11, %s5687_s8 }
  0x14   : > { %p5690_p0 = pnand %p5689_p13, %p5688_p12 }
  0x15   : > { %p5695_p4 = por %p5694_p3, %p5693_p2 }
  0x16   : > { %p5691_p1 = pneg %p5690_p0 }
  0x18   : > { %p5696_p5 = pnand %p5695_p4, %p5691_p1 }
  0x1a   : > { %5699 = shalt.err (!%p5696_p5)
}
  0x1b   : > { %s5751_s19 = smov 256   ;;  %s5752_s23 = smov 16  }
  0x1c   : > { %5584 = dma.hbm_to_vmem [thread:$0]  (!%p5823_p10), %s147_s5, 12288, %s149_s4, %s137_s6, %s5751_s19, %s5751_s19, %s5752_s23  }
  0x1d   : > { %p163_p8 = scmp.lt.s32.totalorder %s5749_s15, 3 }
  0x1f   : > { %p164_p12 = pnand %p3633_p11, %p163_p8 }
  0x20   : > { %s5845_s24 = sand.u32 (!%p164_p12), 1, %s5741_s13  }
  0x21   : > { %167 = sbr.rel (%p164_p12) target bundleno = 920 (0x398), region = 32  ;;  %s170_s27 = scalar_lea.sflag (!%p164_p12), [#allocation3], %s5845_s24 }
  0x22   : > { %s5578_s25 = smul.u32 (!%p164_p12), 768, %s5845_s24 }
  0x24   : > { %s5849_s28 = scalar_lea.vmem (!%p164_p12), [#allocation2], %s5578_s25 }
  0x26   : > { %5732 = dma.done.wait (%p5810_p7), %s170_s27, 12288  }
  0x27   : > { %5734 = vsyncadd (%p5810_p7), %s170_s27, 4294955008  ;;  %v3751_v0 = vld [vmem:[%s5849_s28 + $0xe0] sm:$0xf]  ;;  %v5222_v1 = vld [vmem:[%s5849_s28 + $0xec] sm:$0xf0]  ;;  %p200_p7 = scmp.lt.s32.totalorder %s5793_s16, 1 }
  0x28   : > { %v3879_v2 = vld [vmem:[%s5849_s28 + $0x1e0] sm:$0xf]  ;;  %v3752_v3 = vor.u32 %v5222_v1, %v3751_v0  ;;  %v5254_v4 = vld [vmem:[%s5849_s28 + $0x1ec] sm:$0xf0]  ;;  %v5220_v9 = vld [vmem:[%s5849_s28 + $0xe4] sm:$0xf] }
  0x29   : > { %v4007_v5 = vld [vmem:[%s5849_s28 + $0x2e0] sm:$0xf]  ;;  %v5286_v6 = vld [vmem:[%s5849_s28 + $0x2ec] sm:$0xf0]  ;;  %v3880_v7 = vor.u32 %v5254_v4, %v3879_v2  ;;  %v3753_v10 = vld [vmem:[%s5849_s28 + $0xf0] sm:$0xf0] }
  0x2a   : > { %v4008_v8 = vor.u32 %v5286_v6, %v4007_v5  ;;  %v3735_v11 = vld [vmem:[%s5849_s28 + $0xc0] sm:$0xf]  ;;  %802 = vmatpush.bf16.msra.mxu0 %v3752_v3  ;;  %v3756_v12 = vor.u32 %v5220_v9, %v3753_v10  ;;  %v5218_v13 = vld [vmem:[%s5849_s28 + $0xcc] sm:$0xf0]  ;;  %v5216_v20 = vld [vmem:[%s5849_s28 + $0xc4] sm:$0xf] }
  0x2b   : > { %v3863_v14 = vld [vmem:[%s5849_s28 + $0x1c0] sm:$0xf]  ;;  %v5250_v15 = vld [vmem:[%s5849_s28 + $0x1cc] sm:$0xf0]  ;;  %815 = vmatpush.bf16.msra.mxu1 %v3880_v7  ;;  %v3736_v16 = vor.u32 %v5218_v13, %v3735_v11  ;;  %v3737_v22 = vld [vmem:[%s5849_s28 + $0xd0] sm:$0xf0] }
  0x2c   : > { %828 = vmatpush.bf16.msra.mxu2 %v4008_v8  ;;  %v3864_v17 = vor.u32 %v5250_v15, %v3863_v14  ;;  %v3991_v18 = vld [vmem:[%s5849_s28 + $0x2c0] sm:$0xf]  ;;  %v5282_v19 = vld [vmem:[%s5849_s28 + $0x2cc] sm:$0xf0]  ;;  %841 = vmatpush.bf16.msra.mxu3 %v3756_v12  ;;  %v3740_v25 = vor.u32 %v5216_v20, %v3737_v22  ;;  %v5212_v31 = vld [vmem:[%s5849_s28 + $0xa4] sm:$0xf] }
  0x2d   : > { %v3992_v21 = vor.u32 %v5282_v19, %v3991_v18  ;;  %v3719_v23 = vld [vmem:[%s5849_s28 + $0xa0] sm:$0xf]  ;;  %v5214_v24 = vld [vmem:[%s5849_s28 + $0xac] sm:$0xf0]  ;;  %v3721_v32 = vld [vmem:[%s5849_s28 + $0xb0] sm:$0xf0] }
  0x2e   : > { %v3847_v26 = vld [vmem:[%s5849_s28 + $0x1a0] sm:$0xf]  ;;  %v5246_v27 = vld [vmem:[%s5849_s28 + $0x1ac] sm:$0xf0]  ;;  %803 = vmatpush.bf16.msra.mxu0 %v3736_v16  ;;  %v3720_v29 = vor.u32 %v5214_v24, %v3719_v23  ;;  %v3724_v38 = vor.u32 %v5212_v31, %v3721_v32  ;;  %v5208_v42 = vld [vmem:[%s5849_s28 + $0x84] sm:$0xf] }
  0x2f   : > { %v3975_v28 = vld [vmem:[%s5849_s28 + $0x2a0] sm:$0xf]  ;;  %v5278_v30 = vld [vmem:[%s5849_s28 + $0x2ac] sm:$0xf0]  ;;  %816 = vmatpush.bf16.msra.mxu1 %v3864_v17  ;;  %v3848_v33 = vor.u32 %v5246_v27, %v3847_v26  ;;  %v3705_v43 = vld [vmem:[%s5849_s28 + $0x90] sm:$0xf0] }
  0x30   : > { %829 = vmatpush.bf16.msra.mxu2 %v3992_v21  ;;  %v3976_v34 = vor.u32 %v5278_v30, %v3975_v28  ;;  %v3703_v35 = vld [vmem:[%s5849_s28 + $0x80] sm:$0xf]  ;;  %v5210_v36 = vld [vmem:[%s5849_s28 + $0x8c] sm:$0xf0]  ;;  %842 = vmatpush.bf16.msra.mxu3 %v3740_v25  ;;  %v3708_v50 = vor.u32 %v5208_v42, %v3705_v43  ;;  %v5204_v54 = vld [vmem:[%s5849_s28 + $0x64] sm:$0xf] }
  0x31   : > { %v3831_v37 = vld [vmem:[%s5849_s28 + $0x180] sm:$0xf]  ;;  %v5242_v39 = vld [vmem:[%s5849_s28 + $0x18c] sm:$0xf0]  ;;  %v3704_v44 = vor.u32 %v5210_v36, %v3703_v35  ;;  %v3689_v55 = vld [vmem:[%s5849_s28 + $0x70] sm:$0xf0] }
  0x32   : > { %v3959_v40 = vld [vmem:[%s5849_s28 + $0x280] sm:$0xf]  ;;  %v5274_v41 = vld [vmem:[%s5849_s28 + $0x28c] sm:$0xf0]  ;;  %804 = vmatpush.bf16.msra.mxu0 %v3720_v29  ;;  %v3832_v45 = vor.u32 %v5242_v39, %v3831_v37  ;;  %v3692_v62 = vor.u32 %v5204_v54, %v3689_v55  ;;  %v5200_v2 = vld [vmem:[%s5849_s28 + $0x44] sm:$0xf] }
  0x33   : > { %817 = vmatpush.bf16.msra.mxu1 %v3848_v33  ;;  %v3960_v46 = vor.u32 %v5274_v41, %v3959_v40  ;;  %v3687_v47 = vld [vmem:[%s5849_s28 + $0x60] sm:$0xf]  ;;  %v5206_v48 = vld [vmem:[%s5849_s28 + $0x6c] sm:$0xf0]  ;;  %v3673_v3 = vld [vmem:[%s5849_s28 + $0x50] sm:$0xf0] }
  0x34   : > { %830 = vmatpush.bf16.msra.mxu2 %v3976_v34  ;;  %v3815_v49 = vld [vmem:[%s5849_s28 + $0x160] sm:$0xf]  ;;  %843 = vmatpush.bf16.msra.mxu3 %v3724_v38  ;;  %v5238_v51 = vld [vmem:[%s5849_s28 + $0x16c] sm:$0xf0]  ;;  %v3688_v56 = vor.u32 %v5206_v48, %v3687_v47  ;;  %s5905_s15 = scalar_select %p107_p6, 3, 0  ;;  %v3676_v10 = vor.u32 %v5200_v2, %v3673_v3 }
  0x35   : > { %v3943_v52 = vld [vmem:[%s5849_s28 + $0x260] sm:$0xf]  ;;  %v5270_v53 = vld [vmem:[%s5849_s28 + $0x26c] sm:$0xf0]  ;;  %v3816_v57 = vor.u32 %v5238_v51, %v3815_v49  ;;  %v5196_v14 = vld [vmem:[%s5849_s28 + $0x24] sm:$0xf] }
  0x36   : > { %805 = vmatpush.bf16.msra.mxu0 %v3704_v44  ;;  %v3944_v58 = vor.u32 %v5270_v53, %v3943_v52  ;;  %v3671_v59 = vld [vmem:[%s5849_s28 + $0x40] sm:$0xf]  ;;  %v5202_v60 = vld [vmem:[%s5849_s28 + $0x4c] sm:$0xf0]  ;;  %v3657_v15 = vld [vmem:[%s5849_s28 + $0x30] sm:$0xf0] }
  0x37   : > { %818 = vmatpush.bf16.msra.mxu1 %v3832_v45  ;;  %v3799_v61 = vld [vmem:[%s5849_s28 + $0x140] sm:$0xf]  ;;  %v5234_v63 = vld [vmem:[%s5849_s28 + $0x14c] sm:$0xf0]  ;;  %v3672_v4 = vor.u32 %v5202_v60, %v3671_v59  ;;  %s3636_s21 = sshll.u32 %s5905_s15, 1  ;;  %v3660_v24 = vor.u32 %v5196_v14, %v3657_v15  ;;  %s3634_s30 = sshll.u32 %s5845_s24, 3 }
  0x38   : > { %831 = vmatpush.bf16.msra.mxu2 %v3960_v46  ;;  %844 = vmatpush.bf16.msra.mxu3 %v3708_v50  ;;  %v3927_v0 = vld [vmem:[%s5849_s28 + $0x240] sm:$0xf]  ;;  %v5266_v1 = vld [vmem:[%s5849_s28 + $0x24c] sm:$0xf0]  ;;  %v3800_v5 = vor.u32 %v5234_v63, %v3799_v61  ;;  %v5192_v26 = vld [vmem:[%s5849_s28 + $0x4] sm:$0xf]  ;;  %s208_s4 = scalar_lea.vmem %s6987_s0, %s3636_s21 }
  0x39   : > { %v3928_v6 = vor.u32 %v5266_v1, %v3927_v0  ;;  %v3655_v7 = vld [vmem:[%s5849_s28 + $0x20] sm:$0xf]  ;;  %v5198_v8 = vld [vmem:[%s5849_s28 + $0x2c] sm:$0xf0]  ;;  %v3641_v27 = vld [vmem:[%s5849_s28 + $0x10] sm:$0xf0] }
  0x3a   : > { %806 = vmatpush.bf16.msra.mxu0 %v3688_v56  ;;  %v3783_v9 = vld [vmem:[%s5849_s28 + $0x120] sm:$0xf]  ;;  %v5230_v11 = vld [vmem:[%s5849_s28 + $0x12c] sm:$0xf0]  ;;  %v3656_v16 = vor.u32 %v5198_v8, %v3655_v7  ;;  %v5252_v28 = vld [vmem:[%s5849_s28 + $0x1e4] sm:$0xf]  ;;  %v3644_v39 = vor.u32 %v5192_v26, %v3641_v27 }
  0x3b   : > { %819 = vmatpush.bf16.msra.mxu1 %v3816_v57  ;;  %v3911_v12 = vld [vmem:[%s5849_s28 + $0x220] sm:$0xf]  ;;  %v5262_v13 = vld [vmem:[%s5849_s28 + $0x22c] sm:$0xf0]  ;;  %v3784_v19 = vor.u32 %v5230_v11, %v3783_v9  ;;  %v3881_v29 = vld [vmem:[%s5849_s28 + $0x1f0] sm:$0xf0] }
  0x3c   : > { %832 = vmatpush.bf16.msra.mxu2 %v3944_v58  ;;  %845 = vmatpush.bf16.msra.mxu3 %v3692_v62  ;;  %v3639_v17 = vld [vmem:[%s5849_s28] sm:$0xf]  ;;  %v5194_v18 = vld [vmem:[%s5849_s28 + $0xc] sm:$0xf0]  ;;  %v3912_v20 = vor.u32 %v5262_v13, %v3911_v12  ;;  %v5284_v30 = vld [vmem:[%s5849_s28 + $0x2e4] sm:$0xf]  ;;  %v3884_v40 = vor.u32 %v5252_v28, %v3881_v29 }
  0x3d   : > { %v3767_v21 = vld [vmem:[%s5849_s28 + $0x100] sm:$0xf]  ;;  %v5226_v22 = vld [vmem:[%s5849_s28 + $0x10c] sm:$0xf0]  ;;  %v3640_v31 = vor.u32 %v5194_v18, %v3639_v17  ;;  %v4009_v32 = vld [vmem:[%s5849_s28 + $0x2f0] sm:$0xf0] }
  0x3e   : > { %807 = vmatpush.bf16.msra.mxu0 %v3672_v4  ;;  %v3895_v23 = vld [vmem:[%s5849_s28 + $0x200] sm:$0xf]  ;;  %v5258_v25 = vld [vmem:[%s5849_s28 + $0x20c] sm:$0xf0]  ;;  %v3759_v33 = vld [vmem:[%s5849_s28 + $0xe8] sm:$0xf]  ;;  %v3768_v35 = vor.u32 %v5226_v22, %v3767_v21  ;;  %v4012_v42 = vor.u32 %v5284_v30, %v4009_v32 }
  0x3f   : > { %820 = vmatpush.bf16.msra.mxu1 %v3800_v5  ;;  %v5223_v34 = vld [vmem:[%s5849_s28 + $0xf4] sm:$0xf0]  ;;  %v3896_v36 = vor.u32 %v5258_v25, %v3895_v23  ;;  %v3887_v37 = vld [vmem:[%s5849_s28 + $0x1e8] sm:$0xf]  ;;  %s5934_s26 = scalar_select %p107_p6, 2, 1 }
  0x40   : > { %833 = vmatpush.bf16.msra.mxu2 %v3928_v6  ;;  %846 = vmatpush.bf16.msra.mxu3 %v3676_v10  ;;  %v5255_v38 = vld [vmem:[%s5849_s28 + $0x1f4] sm:$0xf0]  ;;  %v5248_v41 = vld [vmem:[%s5849_s28 + $0x1c4] sm:$0xf]  ;;  %v3760_v43 = vor.u32 %v5223_v34, %v3759_v33  ;;  %v3865_v44 = vld [vmem:[%s5849_s28 + $0x1d0] sm:$0xf0] }
  0x41   : > { %v5280_v45 = vld [vmem:[%s5849_s28 + $0x2c4] sm:$0xf]  ;;  %v3993_v46 = vld [vmem:[%s5849_s28 + $0x2d0] sm:$0xf0]  ;;  %v3888_v47 = vor.u32 %v5255_v38, %v3887_v37  ;;  %v3743_v48 = vld [vmem:[%s5849_s28 + $0xc8] sm:$0xf]  ;;  %v3868_v53 = vor.u32 %v5248_v41, %v3865_v44 }
  0x42   : > { %808 = vmatpush.bf16.msra.mxu0 %v3656_v16  ;;  %v5219_v49 = vld [vmem:[%s5849_s28 + $0xd4] sm:$0xf0]  ;;  %v3871_v50 = vld [vmem:[%s5849_s28 + $0x1c8] sm:$0xf]  ;;  %s4024_s5 = sshll.u32 %s5934_s26, 1  ;;  %v3996_v54 = vor.u32 %v5280_v45, %v3993_v46  ;;  %v5753_v63 = vmov 0  }
  0x43   : > { %821 = vmatpush.bf16.msra.mxu1 %v3784_v19  ;;  %v5251_v51 = vld [vmem:[%s5849_s28 + $0x1d4] sm:$0xf0]  ;;  %v3744_v55 = vor.u32 %v5219_v49, %v3743_v48  ;;  %v5244_v56 = vld [vmem:[%s5849_s28 + $0x1a4] sm:$0xf]  ;;  %v3849_v57 = vld [vmem:[%s5849_s28 + $0x1b0] sm:$0xf0]  ;;  %s1025_s8 = scalar_lea.vmem %s6987_s0, %s4024_s5 }
  0x44   : > { %834 = vmatpush.bf16.msra.mxu2 %v3912_v20  ;;  %847 = vmatpush.bf16.msra.mxu3 %v3660_v24  ;;  %v209_v52 = vld [vmem:[%s208_s4] sm:$0x3]  ;;  %v5276_v58 = vld [vmem:[%s5849_s28 + $0x2a4] sm:$0xf]  ;;  %v3872_v59 = vor.u32 %v5251_v51, %v3871_v50  ;;  %v3977_v60 = vld [vmem:[%s5849_s28 + $0x2b0] sm:$0xf0]  ;;  %v3852_v2 = vor.u32 %v5244_v56, %v3849_v57 }
  0x45   : > { %211 = vst [vmem:[#allocation1] ss:$9 sm:$0xff] %v209_v52  ;;  %v3727_v61 = vld [vmem:[%s5849_s28 + $0xa8] sm:$0xf]  ;;  %v5215_v62 = vld [vmem:[%s5849_s28 + $0xb4] sm:$0xf0]  ;;  %v3980_v5 = vor.u32 %v5276_v58, %v3977_v60 }
  0x46   : > { %809 = vmatpush.bf16.msra.mxu0 %v3640_v31  ;;  %v3855_v0 = vld [vmem:[%s5849_s28 + $0x1a8] sm:$0xf]  ;;  %v5247_v1 = vld [vmem:[%s5849_s28 + $0x1b4] sm:$0xf0]  ;;  %v5240_v3 = vld [vmem:[%s5849_s28 + $0x184] sm:$0xf]  ;;  %v3728_v6 = vor.u32 %v5215_v62, %v3727_v61 }
  0x47   : > { %822 = vmatpush.bf16.msra.mxu1 %v3768_v35  ;;  %v3833_v4 = vld [vmem:[%s5849_s28 + $0x190] sm:$0xf0]  ;;  %v5272_v7 = vld [vmem:[%s5849_s28 + $0x284] sm:$0xf]  ;;  %v1026_v9 = vld [vmem:[%s1025_s8] sm:$0x3]  ;;  %v3856_v10 = vor.u32 %v5247_v1, %v3855_v0 }
  0x48   : > { %835 = vmatpush.bf16.msra.mxu2 %v3896_v36  ;;  %848 = vmatpush.bf16.msra.mxu3 %v3644_v39  ;;  %v3961_v8 = vld [vmem:[%s5849_s28 + $0x290] sm:$0xf0]  ;;  %v3711_v11 = vld [vmem:[%s5849_s28 + $0x88] sm:$0xf]  ;;  %v5211_v12 = vld [vmem:[%s5849_s28 + $0x94] sm:$0xf0]  ;;  %v3836_v17 = vor.u32 %v5240_v3, %v3833_v4 }
  0x49   : > { %v3839_v13 = vld [vmem:[%s5849_s28 + $0x188] sm:$0xf]  ;;  %v5243_v14 = vld [vmem:[%s5849_s28 + $0x194] sm:$0xf0]  ;;  %v3964_v18 = vor.u32 %v5272_v7, %v3961_v8  ;;  %v3712_v19 = vor.u32 %v5211_v12, %v3711_v11  ;;  %v5236_v20 = vld [vmem:[%s5849_s28 + $0x164] sm:$0xf] }
  0x4a   : > { %854 = vmatpush.bf16.msrb.mxu0 %v3884_v40  ;;  %v3817_v21 = vld [vmem:[%s5849_s28 + $0x170] sm:$0xf0]  ;;  %v5268_v22 = vld [vmem:[%s5849_s28 + $0x264] sm:$0xf]  ;;  %v3840_v23 = vor.u32 %v5243_v14, %v3839_v13  ;;  %v3695_v25 = vld [vmem:[%s5849_s28 + $0x68] sm:$0xf] }
  0x4b   : > { %867 = vmatpush.bf16.msrb.mxu1 %v4012_v42  ;;  %836 = vmatmul.bf16.vlgmr.msra.gmra.mxu2 %v5753_v63  ;;  %v3945_v24 = vld [vmem:[%s5849_s28 + $0x270] sm:$0xf0]  ;;  %v5207_v26 = vld [vmem:[%s5849_s28 + $0x74] sm:$0xf0]  ;;  %v3823_v27 = vld [vmem:[%s5849_s28 + $0x168] sm:$0xf]  ;;  %v3820_v29 = vor.u32 %v5236_v20, %v3817_v21 }
  0x4c   : > { %880 = vmatpush.bf16.msrb.mxu2 %v3760_v43  ;;  %893 = vmatpush.bf16.msrb.mxu3 %v3888_v47  ;;  %v5972_v15 = vld [vmem:[#allocation1] sm:$0xff]  ;;  %v5974_v16 = vld [vmem:[#allocation1 + $0x9] sm:$0xff]  ;;  %v3948_v30 = vor.u32 %v5268_v22, %v3945_v24  ;;  %v3696_v31 = vor.u32 %v5207_v26, %v3695_v25  ;;  %v3801_v33 = vld [vmem:[%s5849_s28 + $0x150] sm:$0xf0]  ;;  %s6109_s9 = scalar_select %p200_p7, %s5793_s16, 1 }
  0x4d   : > { %823 = vmatmul.bf16.vlgmr.msra.gmra.mxu1 %v5974_v16  ;;  %1029 = vst [vmem:[#allocation1] ss:$9 sm:$0xff] %v1026_v9  ;;  %810 = vmatmul.bf16.vlgmr.msra.gmra.mxu0 %v5972_v15  ;;  %v5239_v28 = vld [vmem:[%s5849_s28 + $0x174] sm:$0xf0]  ;;  %v5232_v32 = vld [vmem:[%s5849_s28 + $0x144] sm:$0xf] }
  0x4e   : > { %855 = vmatpush.bf16.msrb.mxu0 %v3868_v53  ;;  %849 = vmatmul.bf16.vlgmr.msra.gmra.mxu3 %v5972_v15  ;;  %v5264_v34 = vld [vmem:[%s5849_s28 + $0x244] sm:$0xf]  ;;  %v3824_v35 = vor.u32 %v5239_v28, %v3823_v27  ;;  %v3929_v36 = vld [vmem:[%s5849_s28 + $0x250] sm:$0xf0]  ;;  %v3679_v37 = vld [vmem:[%s5849_s28 + $0x48] sm:$0xf]  ;;  %v3804_v41 = vor.u32 %v5232_v32, %v3801_v33 }
  0x4f   : > { %868 = vmatpush.bf16.msrb.mxu1 %v3996_v54  ;;  %v5203_v38 = vld [vmem:[%s5849_s28 + $0x54] sm:$0xf0]  ;;  %v3807_v39 = vld [vmem:[%s5849_s28 + $0x148] sm:$0xf]  ;;  %v3932_v42 = vor.u32 %v5264_v34, %v3929_v36  ;;  %v5228_v44 = vld [vmem:[%s5849_s28 + $0x124] sm:$0xf] }
  0x50   : > { %881 = vmatpush.bf16.msrb.mxu2 %v3744_v55  ;;  %894 = vmatpush.bf16.msrb.mxu3 %v3872_v59  ;;  %v5235_v40 = vld [vmem:[%s5849_s28 + $0x154] sm:$0xf0]  ;;  %v3680_v43 = vor.u32 %v5203_v38, %v3679_v37  ;;  %v3785_v45 = vld [vmem:[%s5849_s28 + $0x130] sm:$0xf0]  ;;  %v5260_v46 = vld [vmem:[%s5849_s28 + $0x224] sm:$0xf] }
  0x51   : > { %v3808_v47 = vor.u32 %v5235_v40, %v3807_v39  ;;  %v3913_v48 = vld [vmem:[%s5849_s28 + $0x230] sm:$0xf0]  ;;  %v3663_v49 = vld [vmem:[%s5849_s28 + $0x28] sm:$0xf]  ;;  %v5199_v50 = vld [vmem:[%s5849_s28 + $0x34] sm:$0xf0]  ;;  %v3788_v53 = vor.u32 %v5228_v44, %v3785_v45 }
  0x52   : > { %856 = vmatpush.bf16.msrb.mxu0 %v3852_v2  ;;  %v3791_v51 = vld [vmem:[%s5849_s28 + $0x128] sm:$0xf]  ;;  %v5231_v52 = vld [vmem:[%s5849_s28 + $0x134] sm:$0xf0]  ;;  %v5224_v54 = vld [vmem:[%s5849_s28 + $0x104] sm:$0xf]  ;;  %v3916_v56 = vor.u32 %v5260_v46, %v3913_v48  ;;  %v3664_v57 = vor.u32 %v5199_v50, %v3663_v49 }
  0x53   : > { %869 = vmatpush.bf16.msrb.mxu1 %v3980_v5  ;;  %v3769_v55 = vld [vmem:[%s5849_s28 + $0x110] sm:$0xf0]  ;;  %v5256_v58 = vld [vmem:[%s5849_s28 + $0x204] sm:$0xf]  ;;  %v3647_v60 = vld [vmem:[%s5849_s28 + $0x8] sm:$0xf]  ;;  %v3792_v61 = vor.u32 %v5231_v52, %v3791_v51 }
  0x54   : > { %882 = vmatpush.bf16.msrb.mxu2 %v3728_v6  ;;  %895 = vmatpush.bf16.msrb.mxu3 %v3856_v10  ;;  %v3897_v59 = vld [vmem:[%s5849_s28 + $0x210] sm:$0xf0]  ;;  %v5195_v62 = vld [vmem:[%s5849_s28 + $0x14] sm:$0xf0]  ;;  %v3775_v0 = vld [vmem:[%s5849_s28 + $0x108] sm:$0xf]  ;;  %v3772_v5 = vor.u32 %v5224_v54, %v3769_v55 }
  0x55   : > { %v5227_v1 = vld [vmem:[%s5849_s28 + $0x114] sm:$0xf0]  ;;  %v4015_v2 = vld [vmem:[%s5849_s28 + $0x2e8] sm:$0xf]  ;;  %v5221_v4 = vld [vmem:[%s5849_s28 + $0xec] sm:$0xf]  ;;  %v3900_v9 = vor.u32 %v5256_v58, %v3897_v59  ;;  %v3648_v10 = vor.u32 %v5195_v62, %v3647_v60 }
  0x56   : > { %857 = vmatpush.bf16.msrb.mxu0 %v3836_v17  ;;  %v5287_v3 = vld [vmem:[%s5849_s28 + $0x2f4] sm:$0xf0]  ;;  %v3761_v6 = vld [vmem:[%s5849_s28 + $0xf8] sm:$0xf0]  ;;  %v5253_v7 = vld [vmem:[%s5849_s28 + $0x1ec] sm:$0xf]  ;;  %v3776_v13 = vor.u32 %v5227_v1, %v3775_v0 }
  0x57   : > { %870 = vmatpush.bf16.msrb.mxu1 %v3964_v18  ;;  %v3889_v8 = vld [vmem:[%s5849_s28 + $0x1f8] sm:$0xf0]  ;;  %v5285_v11 = vld [vmem:[%s5849_s28 + $0x2ec] sm:$0xf]  ;;  %v4016_v14 = vor.u32 %v5287_v3, %v4015_v2  ;;  %v3764_v17 = vor.u32 %v5221_v4, %v3761_v6  ;;  %v5283_v20 = vld [vmem:[%s5849_s28 + $0x2d4] sm:$0xf0] }
  0x58   : > { %883 = vmatpush.bf16.msrb.mxu2 %v3712_v19  ;;  %896 = vmatpush.bf16.msrb.mxu3 %v3840_v23  ;;  %v4017_v12 = vld [vmem:[%s5849_s28 + $0x2f8] sm:$0xf0]  ;;  %v3892_v18 = vor.u32 %v5253_v7, %v3889_v8  ;;  %v3999_v19 = vld [vmem:[%s5849_s28 + $0x2c8] sm:$0xf]  ;;  %v5217_v21 = vld [vmem:[%s5849_s28 + $0xcc] sm:$0xf] }
  0x59   : > { %v4020_v22 = vor.u32 %v5285_v11, %v4017_v12  ;;  %v3745_v23 = vld [vmem:[%s5849_s28 + $0xd8] sm:$0xf0]  ;;  %v5249_v24 = vld [vmem:[%s5849_s28 + $0x1cc] sm:$0xf]  ;;  %v4000_v28 = vor.u32 %v5283_v20, %v3999_v19  ;;  %v5279_v32 = vld [vmem:[%s5849_s28 + $0x2b4] sm:$0xf0] }
  0x5a   : > { %858 = vmatpush.bf16.msrb.mxu0 %v3820_v29  ;;  %v3873_v25 = vld [vmem:[%s5849_s28 + $0x1d8] sm:$0xf0]  ;;  %v5281_v26 = vld [vmem:[%s5849_s28 + $0x2cc] sm:$0xf]  ;;  %v3748_v29 = vor.u32 %v5217_v21, %v3745_v23  ;;  %v5275_v44 = vld [vmem:[%s5849_s28 + $0x294] sm:$0xf0] }
  0x5b   : > { %871 = vmatpush.bf16.msrb.mxu1 %v3948_v30  ;;  %v4001_v27 = vld [vmem:[%s5849_s28 + $0x2d8] sm:$0xf0]  ;;  %v3876_v30 = vor.u32 %v5249_v24, %v3873_v25  ;;  %v5213_v33 = vld [vmem:[%s5849_s28 + $0xac] sm:$0xf]  ;;  %v3951_v55 = vld [vmem:[%s5849_s28 + $0x268] sm:$0xf] }
  0x5c   : > { %884 = vmatpush.bf16.msrb.mxu2 %v3696_v31  ;;  %897 = vmatpush.bf16.msrb.mxu3 %v3824_v35  ;;  %v3983_v31 = vld [vmem:[%s5849_s28 + $0x2a8] sm:$0xf]  ;;  %v4004_v34 = vor.u32 %v5281_v26, %v4001_v27  ;;  %v3729_v35 = vld [vmem:[%s5849_s28 + $0xb8] sm:$0xf0]  ;;  %v5245_v36 = vld [vmem:[%s5849_s28 + $0x1ac] sm:$0xf] }
  0x5d   : > { %v3857_v37 = vld [vmem:[%s5849_s28 + $0x1b8] sm:$0xf0]  ;;  %v5277_v38 = vld [vmem:[%s5849_s28 + $0x2ac] sm:$0xf]  ;;  %v3984_v40 = vor.u32 %v5279_v32, %v3983_v31  ;;  %v3935_v4 = vld [vmem:[%s5849_s28 + $0x248] sm:$0xf] }
  0x5e   : > { %859 = vmatpush.bf16.msrb.mxu0 %v3804_v41  ;;  %v3985_v39 = vld [vmem:[%s5849_s28 + $0x2b8] sm:$0xf0]  ;;  %v3732_v41 = vor.u32 %v5213_v33, %v3729_v35  ;;  %v5209_v45 = vld [vmem:[%s5849_s28 + $0x8c] sm:$0xf]  ;;  %v5263_v19 = vld [vmem:[%s5849_s28 + $0x234] sm:$0xf0] }
  0x5f   : > { %872 = vmatpush.bf16.msrb.mxu1 %v3932_v42  ;;  %v3860_v42 = vor.u32 %v5245_v36, %v3857_v37  ;;  %v3988_v46 = vor.u32 %v5277_v38, %v3985_v39  ;;  %v5241_v48 = vld [vmem:[%s5849_s28 + $0x18c] sm:$0xf]  ;;  %v3841_v49 = vld [vmem:[%s5849_s28 + $0x198] sm:$0xf0]  ;;  %v5259_v31 = vld [vmem:[%s5849_s28 + $0x214] sm:$0xf0] }
  0x60   : > { %885 = vmatpush.bf16.msrb.mxu2 %v3680_v43  ;;  %898 = vmatpush.bf16.msrb.mxu3 %v3808_v47  ;;  %v3967_v43 = vld [vmem:[%s5849_s28 + $0x288] sm:$0xf]  ;;  %v3713_v47 = vld [vmem:[%s5849_s28 + $0x98] sm:$0xf0]  ;;  %v5273_v50 = vld [vmem:[%s5849_s28 + $0x28c] sm:$0xf]  ;;  %v3844_v54 = vor.u32 %v5241_v48, %v3841_v49 }
  0x61   : > { %v3969_v51 = vld [vmem:[%s5849_s28 + $0x298] sm:$0xf0]  ;;  %v3968_v52 = vor.u32 %v5275_v44, %v3967_v43  ;;  %v5237_v60 = vld [vmem:[%s5849_s28 + $0x16c] sm:$0xf]  ;;  %v4139_v39 = vld [vmem:[%s5849_s28 + $0xe0] sm:$0xf] }
  0x62   : > { %860 = vmatpush.bf16.msrb.mxu0 %v3788_v53  ;;  %v3716_v53 = vor.u32 %v5209_v45, %v3713_v47  ;;  %v3972_v58 = vor.u32 %v5273_v50, %v3969_v51  ;;  %v3697_v59 = vld [vmem:[%s5849_s28 + $0x78] sm:$0xf0]  ;;  %v5269_v62 = vld [vmem:[%s5849_s28 + $0x26c] sm:$0xf]  ;;  %v4141_v43 = vld [vmem:[%s5849_s28 + $0xf0] sm:$0xf0] }
  0x63   : > { %873 = vmatpush.bf16.msrb.mxu1 %v3916_v56  ;;  %v5271_v56 = vld [vmem:[%s5849_s28 + $0x274] sm:$0xf0]  ;;  %v3953_v0 = vld [vmem:[%s5849_s28 + $0x278] sm:$0xf0]  ;;  %v5201_v6 = vld [vmem:[%s5849_s28 + $0x4c] sm:$0xf] }
  0x64   : > { %886 = vmatpush.bf16.msrb.mxu2 %v3664_v57  ;;  %899 = vmatpush.bf16.msrb.mxu3 %v3792_v61  ;;  %v5205_v57 = vld [vmem:[%s5849_s28 + $0x6c] sm:$0xf]  ;;  %v3825_v61 = vld [vmem:[%s5849_s28 + $0x178] sm:$0xf0]  ;;  %v3952_v1 = vor.u32 %v5271_v56, %v3951_v55  ;;  %v3956_v7 = vor.u32 %v5269_v62, %v3953_v0  ;;  %v4123_v49 = vld [vmem:[%s5849_s28 + $0xc0] sm:$0xf] }
  0x65   : > { %v3700_v2 = vor.u32 %v5205_v57, %v3697_v59  ;;  %v3828_v3 = vor.u32 %v5237_v60, %v3825_v61  ;;  %v3681_v8 = vld [vmem:[%s5849_s28 + $0x58] sm:$0xf0]  ;;  %v5265_v11 = vld [vmem:[%s5849_s28 + $0x24c] sm:$0xf]  ;;  %v5314_v50 = vld [vmem:[%s5849_s28 + $0xcc] sm:$0xf0] }
  0x66   : > { %861 = vmatpush.bf16.msrb.mxu0 %v3772_v5  ;;  %v5267_v5 = vld [vmem:[%s5849_s28 + $0x254] sm:$0xf0]  ;;  %v3937_v12 = vld [vmem:[%s5849_s28 + $0x258] sm:$0xf0]  ;;  %v5197_v20 = vld [vmem:[%s5849_s28 + $0x2c] sm:$0xf] }
  0x67   : > { %874 = vmatpush.bf16.msrb.mxu1 %v3900_v9  ;;  %v5233_v9 = vld [vmem:[%s5849_s28 + $0x14c] sm:$0xf]  ;;  %v3940_v21 = vor.u32 %v5265_v11, %v3937_v12  ;;  %v3793_v24 = vld [vmem:[%s5849_s28 + $0x138] sm:$0xf0]  ;;  %v5312_v51 = vld [vmem:[%s5849_s28 + $0xc4] sm:$0xf] }
  0x68   : > { %887 = vmatpush.bf16.msrb.mxu2 %v3648_v10  ;;  %900 = vmatpush.bf16.msrb.mxu3 %v3776_v13  ;;  %v3809_v10 = vld [vmem:[%s5849_s28 + $0x158] sm:$0xf0]  ;;  %v3936_v13 = vor.u32 %v5267_v5, %v3935_v4  ;;  %v5229_v23 = vld [vmem:[%s5849_s28 + $0x12c] sm:$0xf]  ;;  %v4107_v55 = vld [vmem:[%s5849_s28 + $0xa0] sm:$0xf] }
  0x69   : > { %862 = vmatmul.bf16.vlgmr.msrb.gmra.mxu0 %v5974_v16  ;;  %v5261_v25 = vld [vmem:[%s5849_s28 + $0x22c] sm:$0xf]  ;;  %v3921_v26 = vld [vmem:[%s5849_s28 + $0x238] sm:$0xf0]  ;;  %v5310_v56 = vld [vmem:[%s5849_s28 + $0xac] sm:$0xf0] }
  0x6a   : > { %906 = vmatpush.bf16.msra.mxu0 %v4016_v14  ;;  %875 = vmatmul.bf16.vlgmr.msrb.gmra.mxu1 %v5753_v63  ;;  %v3684_v14 = vor.u32 %v5201_v6, %v3681_v8  ;;  %v5193_v32 = vld [vmem:[%s5849_s28 + $0xc] sm:$0xf]  ;;  %v3649_v33 = vld [vmem:[%s5849_s28 + $0x18] sm:$0xf0]  ;;  %v5306_v59 = vld [vmem:[%s5849_s28 + $0x8c] sm:$0xf0] }
  0x6b   : > { %919 = vmatpush.bf16.msra.mxu1 %v3764_v17  ;;  %888 = vmatmul.bf16.vlgmr.msrb.gmra.mxu2 %v5972_v15  ;;  %v3812_v17 = vor.u32 %v5233_v9, %v3809_v10  ;;  %v5225_v35 = vld [vmem:[%s5849_s28 + $0x10c] sm:$0xf]  ;;  %v3777_v36 = vld [vmem:[%s5849_s28 + $0x118] sm:$0xf0]  ;;  %v3652_v44 = vor.u32 %v5193_v32, %v3649_v33  ;;  %v5304_v60 = vld [vmem:[%s5849_s28 + $0x84] sm:$0xf] }
  0x6c   : > { %932 = vmatpush.bf16.msra.mxu2 %v3892_v18  ;;  %945 = vmatpush.bf16.msra.mxu3 %v4020_v22  ;;  %v3919_v18 = vld [vmem:[%s5849_s28 + $0x228] sm:$0xf]  ;;  %v3665_v22 = vld [vmem:[%s5849_s28 + $0x38] sm:$0xf0]  ;;  %v5257_v37 = vld [vmem:[%s5849_s28 + $0x20c] sm:$0xf]  ;;  %v3780_v45 = vor.u32 %v5225_v35, %v3777_v36 }
  0x6d   : > { %901 = vmatmul.bf16.vlgmr.msrb.gmra.mxu3 %v5974_v16  ;;  %v3920_v27 = vor.u32 %v5263_v19, %v3919_v18  ;;  %v3905_v38 = vld [vmem:[%s5849_s28 + $0x218] sm:$0xf0]  ;;  %v4093_v62 = vld [vmem:[%s5849_s28 + $0x90] sm:$0xf0]  ;;  %v5298_v8 = vld [vmem:[%s5849_s28 + $0x4c] sm:$0xf0] }
  0x6e   : > { %907 = vmatpush.bf16.msra.mxu0 %v4000_v28  ;;  %v3903_v28 = vld [vmem:[%s5849_s28 + $0x208] sm:$0xf]  ;;  %v4096_v0 = vor.u32 %v5304_v60, %v4093_v62  ;;  %v4077_v5 = vld [vmem:[%s5849_s28 + $0x70] sm:$0xf0]  ;;  %v5296_v9 = vld [vmem:[%s5849_s28 + $0x44] sm:$0xf] }
  0x6f   : > { %920 = vmatpush.bf16.msra.mxu1 %v3748_v29  ;;  %v3668_v29 = vor.u32 %v5197_v20, %v3665_v22  ;;  %v4061_v11 = vld [vmem:[%s5849_s28 + $0x50] sm:$0xf0]  ;;  %s3635_s10 = sshll.u32 %s6109_s9, 2  ;;  %v5348_v33 = vld [vmem:[%s5849_s28 + $0x1e4] sm:$0xf]  ;;  %s6351_s24 = scalar_lea.vmem [#allocation4], %s3634_s30 }
  0x70   : > { %933 = vmatpush.bf16.msra.mxu2 %v3876_v30  ;;  %946 = vmatpush.bf16.msra.mxu3 %v4004_v34  ;;  %v3796_v30 = vor.u32 %v5229_v23, %v3793_v24  ;;  %v3924_v34 = vor.u32 %v5261_v25, %v3921_v26  ;;  %v4064_v12 = vor.u32 %v5296_v9, %v4061_v11  ;;  %v4045_v19 = vld [vmem:[%s5849_s28 + $0x30] sm:$0xf0]  ;;  %v4027_v24 = vld [vmem:[%s5849_s28] sm:$0xf]  ;;  %v5290_v25 = vld [vmem:[%s5849_s28 + $0xc] sm:$0xf0]  ;;  %s6135_s18 = scalar_lea.vmem %s6989_s2, %s3635_s10  ;;  %s1021_s4 = scalar_lea.vmem %s6351_s24, %s3636_s21 [#allocation4] }
  0x71   : > { %v4267_v26 = vld [vmem:[%s5849_s28 + $0x1e0] sm:$0xf]  ;;  %v4275_v35 = vld [vmem:[%s5849_s28 + $0x1e8] sm:$0xf]  ;;  %v4221_v9 = vld [vmem:[%s5849_s28 + $0x190] sm:$0xf0]  ;;  %s1839_s9 = scalar_lea.vmem %s6351_s24, %s4024_s5 [#allocation4] }
  0x72   : > { %908 = vmatpush.bf16.msra.mxu0 %v3984_v40  ;;  %v5318_v40 = vld [vmem:[%s5849_s28 + $0xec] sm:$0xf0]  ;;  %v4243_v62 = vld [vmem:[%s5849_s28 + $0x1a8] sm:$0xf]  ;;  %s6247_s19 = scalar_select %p107_p6, 1, 2 }
  0x73   : > { %921 = vmatpush.bf16.msra.mxu1 %v3732_v41  ;;  %v3904_v41 = vor.u32 %v5259_v31, %v3903_v28  ;;  %v4140_v47 = vor.u32 %v5318_v40, %v4139_v39  ;;  %v5350_v28 = vld [vmem:[%s5849_s28 + $0x1ec] sm:$0xf0]  ;;  %v4251_v39 = vld [vmem:[%s5849_s28 + $0x1c0] sm:$0xf]  ;;  %s6477_s15 = scalar_select %p107_p6, 0, 3 }
  0x74   : > { %934 = vmatpush.bf16.msra.mxu2 %v3860_v42  ;;  %947 = vmatpush.bf16.msra.mxu3 %v3988_v46  ;;  %v5316_v42 = vld [vmem:[%s5849_s28 + $0xe4] sm:$0xf]  ;;  %v3908_v46 = vor.u32 %v5257_v37, %v3905_v38  ;;  %v4268_v31 = vor.u32 %v5350_v28, %v4267_v26  ;;  %v5351_v37 = vld [vmem:[%s5849_s28 + $0x1f4] sm:$0xf0]  ;;  %v5346_v40 = vld [vmem:[%s5849_s28 + $0x1cc] sm:$0xf0] }
  0x75   : > { %v4144_v48 = vor.u32 %v5316_v42, %v4141_v43  ;;  %v4276_v38 = vor.u32 %v5351_v37, %v4275_v35  ;;  %v4252_v42 = vor.u32 %v5346_v40, %v4251_v39  ;;  %v5382_v43 = vld [vmem:[%s5849_s28 + $0x2ec] sm:$0xf0]  ;;  %v4347_v26 = vld [vmem:[%s5849_s28 + $0x280] sm:$0xf]  ;;  %v5332_v28 = vld [vmem:[%s5849_s28 + $0x164] sm:$0xf] }
  0x76   : > { %909 = vmatpush.bf16.msra.mxu0 %v3968_v52  ;;  %v4124_v52 = vor.u32 %v5314_v50, %v4123_v49  ;;  %v4259_v50 = vld [vmem:[%s5849_s28 + $0x1c8] sm:$0xf]  ;;  %v5330_v37 = vld [vmem:[%s5849_s28 + $0x14c] sm:$0xf0]  ;;  %s4412_s23 = sshll.u32 %s6247_s19, 1  ;;  %s4800_s21 = sshll.u32 %s6477_s15, 1 }
  0x77   : > { %922 = vmatpush.bf16.msra.mxu1 %v3716_v53  ;;  %v4125_v53 = vld [vmem:[%s5849_s28 + $0xd0] sm:$0xf0]  ;;  %v5366_v40 = vld [vmem:[%s5849_s28 + $0x26c] sm:$0xf0]  ;;  %s1843_s29 = scalar_lea.vmem %s6987_s0, %s4412_s23  ;;  %s2661_s8 = scalar_lea.vmem %s6987_s0, %s4800_s21 }
  0x78   : > { %935 = vmatpush.bf16.msra.mxu2 %v3844_v54  ;;  %948 = vmatpush.bf16.msra.mxu3 %v3972_v58  ;;  %v4128_v54 = vor.u32 %v5312_v51, %v4125_v53  ;;  %v4091_v58 = vld [vmem:[%s5849_s28 + $0x80] sm:$0xf]  ;;  %v5347_v51 = vld [vmem:[%s5849_s28 + $0x1d4] sm:$0xf0]  ;;  %s2657_s26 = scalar_lea.vmem %s6351_s24, %s4412_s23 [#allocation4]  ;;  %s5189_s5 = sshll.u32 (%p5817_p9), %s5793_s16, 1 }
  0x79   : > { %v4092_v61 = vor.u32 %v5306_v59, %v4091_v58  ;;  %v5340_v58 = vld [vmem:[%s5849_s28 + $0x1a4] sm:$0xf]  ;;  %v4237_v59 = vld [vmem:[%s5849_s28 + $0x1b0] sm:$0xf0]  ;;  %s3485_s12 = scalar_lea.vmem (%p5817_p9), %s6990_s3, %s5189_s5 }
  0x7a   : > { %910 = vmatpush.bf16.msra.mxu0 %v3952_v1  ;;  %v4075_v1 = vld [vmem:[%s5849_s28 + $0x60] sm:$0xf] }
  0x7b   : > { %923 = vmatpush.bf16.msra.mxu1 %v3700_v2  ;;  %v5302_v2 = vld [vmem:[%s5849_s28 + $0x6c] sm:$0xf0] }
  0x7c   : > { %936 = vmatpush.bf16.msra.mxu2 %v3828_v3  ;;  %949 = vmatpush.bf16.msra.mxu3 %v3956_v7  ;;  %v5300_v3 = vld [vmem:[%s5849_s28 + $0x64] sm:$0xf]  ;;  %v4076_v4 = vor.u32 %v5302_v2, %v4075_v1  ;;  %v4059_v7 = vld [vmem:[%s5849_s28 + $0x40] sm:$0xf] }
  0x7d   : > { %v4080_v6 = vor.u32 %v5300_v3, %v4077_v5  ;;  %v4060_v10 = vor.u32 %v5298_v8, %v4059_v7  ;;  %v4219_v3 = vld [vmem:[%s5849_s28 + $0x180] sm:$0xf]  ;;  %v5374_v7 = vld [vmem:[%s5849_s28 + $0x2ac] sm:$0xf0]  ;;  %v5336_v8 = vld [vmem:[%s5849_s28 + $0x184] sm:$0xf] }
  0x7e   : > { %911 = vmatpush.bf16.msra.mxu0 %v3936_v13  ;;  %v4043_v13 = vld [vmem:[%s5849_s28 + $0x20] sm:$0xf]  ;;  %v4224_v11 = vor.u32 %v5336_v8, %v4221_v9 }
  0x7f   : > { %924 = vmatpush.bf16.msra.mxu1 %v3684_v14  ;;  %v5294_v14 = vld [vmem:[%s5849_s28 + $0x2c] sm:$0xf0]  ;;  %v4363_v5 = vld [vmem:[%s5849_s28 + $0x2a0] sm:$0xf] }
  0x80   : > { %937 = vmatpush.bf16.msra.mxu2 %v3812_v17  ;;  %950 = vmatpush.bf16.msra.mxu3 %v3940_v21  ;;  %v5292_v17 = vld [vmem:[%s5849_s28 + $0x24] sm:$0xf]  ;;  %v4044_v18 = vor.u32 %v5294_v14, %v4043_v13  ;;  %v5339_v13 = vld [vmem:[%s5849_s28 + $0x194] sm:$0xf0] }
  0x81   : > { %v4048_v22 = vor.u32 %v5292_v17, %v4045_v19 }
  0x82   : > { %912 = vmatpush.bf16.msra.mxu0 %v3920_v27  ;;  %v4028_v27 = vor.u32 %v5290_v25, %v4027_v24  ;;  %v5334_v24 = vld [vmem:[%s5849_s28 + $0x16c] sm:$0xf0] }
  0x83   : > { %925 = vmatpush.bf16.msra.mxu1 %v3668_v29  ;;  %v5288_v29 = vld [vmem:[%s5849_s28 + $0x4] sm:$0xf] }
  0x84   : > { %938 = vmatpush.bf16.msra.mxu2 %v3796_v30  ;;  %951 = vmatpush.bf16.msra.mxu3 %v3924_v34  ;;  %v4029_v30 = vld [vmem:[%s5849_s28 + $0x10] sm:$0xf0] }
  0x85   : > { %v4032_v32 = vor.u32 %v5288_v29, %v4029_v30  ;;  %v4269_v34 = vld [vmem:[%s5849_s28 + $0x1f0] sm:$0xf0]  ;;  %v4211_v30 = vld [vmem:[%s5849_s28 + $0x168] sm:$0xf] }
  0x86   : > { %913 = vmatpush.bf16.msra.mxu0 %v3904_v41  ;;  %v4272_v36 = vor.u32 %v5348_v33, %v4269_v34  ;;  %v4395_v41 = vld [vmem:[%s5849_s28 + $0x2e0] sm:$0xf]  ;;  %v4205_v29 = vld [vmem:[%s5849_s28 + $0x170] sm:$0xf0] }
  0x87   : > { %926 = vmatpush.bf16.msra.mxu1 %v3652_v44  ;;  %v5344_v44 = vld [vmem:[%s5849_s28 + $0x1c4] sm:$0xf]  ;;  %v4208_v34 = vor.u32 %v5332_v28, %v4205_v29  ;;  %v4405_v28 = vld [vmem:[%s5849_s28 + $0x2f8] sm:$0xf0] }
  0x88   : > { %939 = vmatpush.bf16.msra.mxu2 %v3780_v45  ;;  %952 = vmatpush.bf16.msra.mxu3 %v3908_v46  ;;  %v4253_v45 = vld [vmem:[%s5849_s28 + $0x1d0] sm:$0xf0] }
  0x89   : > { %914 = vmatmul.bf16.vlgmr.msra.gmra.mxu0 %v5753_v63  ;;  %v4256_v49 = vor.u32 %v5344_v44, %v4253_v45  ;;  %v4195_v44 = vld [vmem:[%s5849_s28 + $0x148] sm:$0xf]  ;;  %v5331_v45 = vld [vmem:[%s5849_s28 + $0x154] sm:$0xf0] }
  0x8a   : > { %1620 = vmatpush.bf16.msrb.mxu0 %v4140_v47  ;;  %927 = vmatmul.bf16.vlgmr.msra.gmra.mxu1 %v5972_v15  ;;  %v5308_v15 = vld [vmem:[%s5849_s28 + $0xa4] sm:$0xf] }
  0x8b   : > { %940 = vmatmul.bf16.vlgmr.msra.gmra.mxu2 %v5974_v16  ;;  %953 = vmatmul.bf16.vlgmr.msra.gmra.mxu3 %v5753_v63  ;;  %v4108_v16 = vor.u32 %v5310_v56, %v4107_v55  ;;  %v4109_v63 = vld [vmem:[%s5849_s28 + $0xb0] sm:$0xf0]  ;;  %v4235_v56 = vld [vmem:[%s5849_s28 + $0x1a0] sm:$0xf] }
  0x8c   : > { %1659 = vmatpush.bf16.msrb.mxu3 %v4144_v48  ;;  %v4112_v57 = vor.u32 %v5308_v15, %v4109_v63  ;;  %1633 = vmatpush.bf16.msrb.mxu1 %v4268_v31  ;;  %v4396_v48 = vor.u32 %v5382_v43, %v4395_v41  ;;  %v5342_v15 = vld [vmem:[%s5849_s28 + $0x1ac] sm:$0xf0]  ;;  %v5335_v31 = vld [vmem:[%s5849_s28 + $0x174] sm:$0xf0]  ;;  %v5328_v41 = vld [vmem:[%s5849_s28 + $0x144] sm:$0xf] }
  0x8d   : > { %v4236_v63 = vor.u32 %v5342_v15, %v4235_v56  ;;  %v4212_v35 = vor.u32 %v5335_v31, %v4211_v30  ;;  %v4189_v43 = vld [vmem:[%s5849_s28 + $0x150] sm:$0xf0]  ;;  %v4315_v56 = vld [vmem:[%s5849_s28 + $0x240] sm:$0xf]  ;;  %v5362_v15 = vld [vmem:[%s5849_s28 + $0x24c] sm:$0xf0] }
  0x8e   : > { %1621 = vmatpush.bf16.msrb.mxu0 %v4124_v52  ;;  %v6146_v52 = vld [vmem:[%s6135_s18] sm:$0xf]  ;;  %1646 = vmatpush.bf16.msrb.mxu2 %v4396_v48  ;;  %v4283_v30 = vld [vmem:[%s5849_s28 + $0x200] sm:$0xf]  ;;  %v5354_v31 = vld [vmem:[%s5849_s28 + $0x20c] sm:$0xf0] }
  0x8f   : > { %v314_v1 = vperm.slane %v6146_v52, 0  ;;  %v315_v17 = vperm.slane %v6146_v52, 1 }
  0x90   : > { %1660 = vmatpush.bf16.msrb.mxu3 %v4128_v54  ;;  %v4260_v54 = vor.u32 %v5347_v51, %v4259_v50  ;;  %1634 = vmatpush.bf16.msrb.mxu1 %v4252_v42  ;;  %v4196_v50 = vor.u32 %v5331_v45, %v4195_v44  ;;  %v4171_v51 = vld [vmem:[%s5849_s28 + $0x120] sm:$0xf]  ;;  %v5372_v45 = vld [vmem:[%s5849_s28 + $0x2a4] sm:$0xf] }
  0x92   : > { %1622 = vmatpush.bf16.msrb.mxu0 %v4108_v16  ;;  %v4379_v16 = vld [vmem:[%s5849_s28 + $0x2c0] sm:$0xf] }
  0x94   : > { %1661 = vmatpush.bf16.msrb.mxu3 %v4112_v57  ;;  %v5378_v57 = vld [vmem:[%s5849_s28 + $0x2cc] sm:$0xf0]  ;;  %1635 = vmatpush.bf16.msrb.mxu1 %v4236_v63  ;;  %v4173_v63 = vld [vmem:[%s5849_s28 + $0x130] sm:$0xf0] }
  0x95   : > { %v4380_v60 = vor.u32 %v5378_v57, %v4379_v16  ;;  %v4316_v16 = vor.u32 %v5362_v15, %v4315_v56  ;;  %v4179_v57 = vld [vmem:[%s5849_s28 + $0x128] sm:$0xf] }
  0x96   : > { %1623 = vmatpush.bf16.msrb.mxu0 %v4092_v61  ;;  %v4240_v61 = vor.u32 %v5340_v58, %v4237_v59 }
  0x97   : > { %1647 = vmatpush.bf16.msrb.mxu2 %v4380_v60 }
  0x98   : > { %1662 = vmatpush.bf16.msrb.mxu3 %v4096_v0  ;;  %v5343_v0 = vld [vmem:[%s5849_s28 + $0x1b4] sm:$0xf0] }
  0x99   : > { %v4244_v2 = vor.u32 %v5343_v0, %v4243_v62  ;;  %v4155_v0 = vld [vmem:[%s5849_s28 + $0x100] sm:$0xf] }
  0x9a   : > { %1624 = vmatpush.bf16.msrb.mxu0 %v4076_v4  ;;  %v5338_v4 = vld [vmem:[%s5849_s28 + $0x18c] sm:$0xf0] }
  0x9c   : > { %1663 = vmatpush.bf16.msrb.mxu3 %v4080_v6  ;;  %v4220_v6 = vor.u32 %v5338_v4, %v4219_v3 }
  0x9e   : > { %1625 = vmatpush.bf16.msrb.mxu0 %v4060_v10  ;;  %v4364_v10 = vor.u32 %v5374_v7, %v4363_v5  ;;  %1636 = vmatpush.bf16.msrb.mxu1 %v4220_v6  ;;  %v5358_v5 = vld [vmem:[%s5849_s28 + $0x22c] sm:$0xf0]  ;;  %v5320_v6 = vld [vmem:[%s5849_s28 + $0x104] sm:$0xf]  ;;  %v4157_v7 = vld [vmem:[%s5849_s28 + $0x110] sm:$0xf0] }
  0xa0   : > { %1664 = vmatpush.bf16.msrb.mxu3 %v4064_v12  ;;  %v4227_v12 = vld [vmem:[%s5849_s28 + $0x188] sm:$0xf]  ;;  %1648 = vmatpush.bf16.msrb.mxu2 %v4364_v10 }
  0xa1   : > { %v4228_v19 = vor.u32 %v5339_v13, %v4227_v12  ;;  %v5380_v12 = vld [vmem:[%s5849_s28 + $0x2e4] sm:$0xf]  ;;  %v4397_v13 = vld [vmem:[%s5849_s28 + $0x2f0] sm:$0xf0] }
  0xa2   : > { %1626 = vmatpush.bf16.msrb.mxu0 %v4044_v18 }
  0xa4   : > { %1665 = vmatpush.bf16.msrb.mxu3 %v4048_v22  ;;  %v4203_v22 = vld [vmem:[%s5849_s28 + $0x160] sm:$0xf] }
  0xa5   : > { %v4204_v25 = vor.u32 %v5334_v24, %v4203_v22  ;;  %v5323_v22 = vld [vmem:[%s5849_s28 + $0x114] sm:$0xf0]  ;;  %v4403_v24 = vld [vmem:[%s5849_s28 + $0x2e8] sm:$0xf] }
  0xa6   : > { %1627 = vmatpush.bf16.msrb.mxu0 %v4028_v27  ;;  %v5370_v27 = vld [vmem:[%s5849_s28 + $0x28c] sm:$0xf0] }
  0xa7   : > { %1637 = vmatpush.bf16.msrb.mxu1 %v4204_v25 }
  0xa8   : > { %1666 = vmatpush.bf16.msrb.mxu3 %v4032_v32 }
  0xaa   : > { %1672 = vmatpush.bf16.msra.mxu0 %v4272_v36  ;;  %v4187_v36 = vld [vmem:[%s5849_s28 + $0x140] sm:$0xf] }
  0xab   : > { %v4188_v39 = vor.u32 %v5330_v37, %v4187_v36  ;;  %v5319_v36 = vld [vmem:[%s5849_s28 + $0xf4] sm:$0xf0] }
  0xac   : > { %1711 = vmatpush.bf16.msra.mxu3 %v4276_v38  ;;  %v4331_v38 = vld [vmem:[%s5849_s28 + $0x260] sm:$0xf] }
  0xad   : > { %1638 = vmatpush.bf16.msrb.mxu1 %v4188_v39  ;;  %v4387_v39 = vld [vmem:[%s5849_s28 + $0x2c8] sm:$0xf] }
  0xae   : > { %1673 = vmatpush.bf16.msra.mxu0 %v4256_v49  ;;  %v4192_v49 = vor.u32 %v5328_v41, %v4189_v43  ;;  %v5377_v41 = vld [vmem:[%s5849_s28 + $0x2cc] sm:$0xf] }
  0xb0   : > { %1712 = vmatpush.bf16.msra.mxu3 %v4260_v54 }
  0xb2   : > { %1674 = vmatpush.bf16.msra.mxu0 %v4240_v61  ;;  %v5327_v61 = vld [vmem:[%s5849_s28 + $0x134] sm:$0xf0] }
  0xb3   : > { %v4180_v62 = vor.u32 %v5327_v61, %v4179_v57  ;;  %v5368_v57 = vld [vmem:[%s5849_s28 + $0x284] sm:$0xf]  ;;  %v5311_v61 = vld [vmem:[%s5849_s28 + $0xb4] sm:$0xf0] }
  0xb4   : > { %1713 = vmatpush.bf16.msra.mxu3 %v4244_v2  ;;  %v4299_v2 = vld [vmem:[%s5849_s28 + $0x220] sm:$0xf] }
  0xb5   : > { %v4300_v10 = vor.u32 %v5358_v5, %v4299_v2  ;;  %v5369_v5 = vld [vmem:[%s5849_s28 + $0x28c] sm:$0xf] }
  0xb6   : > { %1675 = vmatpush.bf16.msra.mxu0 %v4224_v11  ;;  %v4160_v11 = vor.u32 %v5320_v6, %v4157_v7  ;;  %v4357_v6 = vld [vmem:[%s5849_s28 + $0x298] sm:$0xf0] }
  0xb8   : > { %1714 = vmatpush.bf16.msra.mxu3 %v4228_v19  ;;  %v4400_v19 = vor.u32 %v5380_v12, %v4397_v13  ;;  %v4099_v12 = vld [vmem:[%s5849_s28 + $0x88] sm:$0xf] }
  0xba   : > { %1676 = vmatpush.bf16.msra.mxu0 %v4208_v34  ;;  %v4381_v34 = vld [vmem:[%s5849_s28 + $0x2d0] sm:$0xf0] }
  0xbc   : > { %1715 = vmatpush.bf16.msra.mxu3 %v4212_v35  ;;  %v4147_v35 = vld [vmem:[%s5849_s28 + $0xe8] sm:$0xf] }
  0xbe   : > { %1677 = vmatpush.bf16.msra.mxu0 %v4192_v49  ;;  %v5315_v49 = vld [vmem:[%s5849_s28 + $0xd4] sm:$0xf0] }
  0xc0   : > { %1716 = vmatpush.bf16.msra.mxu3 %v4196_v50 }
  0xc4   : > { %1717 = vmatpush.bf16.msra.mxu3 %v4180_v62  ;;  %v4355_v62 = vld [vmem:[%s5849_s28 + $0x288] sm:$0xf] }
  0xca   : > { %v6115_v20 = vpop.f32.mrf.mxu1  ;;  %v6120_v23 = vpop.f32.mrf.mxu0 }
  0xcb   : > { %v812_v14 = vadd.f32 %v6120_v23, %v314_v1  ;;  %v4348_v23 = vor.u32 %v5370_v27, %v4347_v26  ;;  %v5322_v1 = vld [vmem:[%s5849_s28 + $0x10c] sm:$0xf0]  ;;  %v5383_v26 = vld [vmem:[%s5849_s28 + $0x2f4] sm:$0xf0]  ;;  %v5381_v27 = vld [vmem:[%s5849_s28 + $0x2ec] sm:$0xf] }
  0xcc   : > { %v4156_v4 = vor.u32 %v5322_v1, %v4155_v0  ;;  %v4408_v29 = vor.u32 %v5381_v27, %v4405_v28  ;;  %v5371_v0 = vld [vmem:[%s5849_s28 + $0x294] sm:$0xf0]  ;;  %v4341_v27 = vld [vmem:[%s5849_s28 + $0x278] sm:$0xf0] }
  0xcd   : > { %v825_v32 = vadd.f32 %v6115_v20, %v812_v14  ;;  %1649 = vmatpush.bf16.msrb.mxu2 %v4348_v23  ;;  %v4332_v20 = vor.u32 %v5366_v40, %v4331_v38  ;;  %v4163_v14 = vld [vmem:[%s5849_s28 + $0x108] sm:$0xf]  ;;  %v4404_v23 = vor.u32 %v5383_v26, %v4403_v24  ;;  %v4148_v38 = vor.u32 %v5319_v36, %v4147_v35  ;;  %v5379_v40 = vld [vmem:[%s5849_s28 + $0x2d4] sm:$0xf0] }
  0xce   : > { %v6117_v21 = vpop.f32.mrf.mxu2  ;;  %v4164_v25 = vor.u32 %v5323_v22, %v4163_v14  ;;  %v5307_v14 = vld [vmem:[%s5849_s28 + $0x94] sm:$0xf0]  ;;  %v317_v36 = vperm.slane %v6146_v52, 3 }
  0xcf   : > { %v4100_v22 = vor.u32 %v5307_v14, %v4099_v12  ;;  %v5367_v24 = vld [vmem:[%s5849_s28 + $0x274] sm:$0xf0]  ;;  %v5353_v14 = vld [vmem:[%s5849_s28 + $0x20c] sm:$0xf] }
  0xd0   : > { %1718 = vmatpush.bf16.msra.mxu3 %v4164_v25  ;;  %v5365_v25 = vld [vmem:[%s5849_s28 + $0x26c] sm:$0xf] }
  0xd1   : > { %v850_v53 = vpop.f32.mrf.mxu3  ;;  %1650 = vmatpush.bf16.msrb.mxu2 %v4332_v20  ;;  %v4389_v20 = vld [vmem:[%s5849_s28 + $0x2d8] sm:$0xf0]  ;;  %v4344_v28 = vor.u32 %v5365_v25, %v4341_v27 }
  0xd2   : > { %v826_v46 = vpop.f32.mrf.mxu1  ;;  %v813_v55 = vpop.f32.mrf.mxu0  ;;  %v851_v33 = vadd.f32 %v850_v53, %v315_v17  ;;  %v5326_v53 = vld [vmem:[%s5849_s28 + $0x12c] sm:$0xf0]  ;;  %v4392_v44 = vor.u32 %v5377_v41, %v4389_v20  ;;  %v316_v41 = vperm.slane %v6146_v52, 2  ;;  %v4307_v52 = vld [vmem:[%s5849_s28 + $0x228] sm:$0xf] }
  0xd3   : > { %v838_v46 = vadd.f32 %v6117_v21, %v825_v32  ;;  %v4172_v55 = vor.u32 %v5326_v53, %v4171_v51  ;;  %v5324_v21 = vld [vmem:[%s5849_s28 + $0x124] sm:$0xf]  ;;  %v4371_v53 = vld [vmem:[%s5849_s28 + $0x2a8] sm:$0xf] }
  0xd4   : > { %v4176_v60 = vor.u32 %v5324_v21, %v4173_v63  ;;  %v5376_v32 = vld [vmem:[%s5849_s28 + $0x2c4] sm:$0xf]  ;;  %v4373_v21 = vld [vmem:[%s5849_s28 + $0x2b8] sm:$0xf0] }
  0xd5   : > { %v4021_v58 = vmul.f32 -1.442695, %v838_v46  ;;  %1639 = vmatpush.bf16.msrb.mxu1 %v4172_v55  ;;  %1651 = vmatpush.bf16.msrb.mxu2 %v4316_v16  ;;  %v4384_v37 = vor.u32 %v5376_v32, %v4381_v34  ;;  %v4365_v46 = vld [vmem:[%s5849_s28 + $0x2b0] sm:$0xf0]  ;;  %v5373_v55 = vld [vmem:[%s5849_s28 + $0x2ac] sm:$0xf] }
  0xd6   : > { %v839_v47 = vpop.f32.mrf.mxu2  ;;  %1678 = vmatpush.bf16.msra.mxu0 %v4176_v60  ;;  %v4368_v50 = vor.u32 %v5372_v45, %v4365_v46  ;;  %v4376_v63 = vor.u32 %v5373_v55, %v4373_v21  ;;  %v5303_v32 = vld [vmem:[%s5849_s28 + $0x74] sm:$0xf0]  ;;  %v4301_v45 = vld [vmem:[%s5849_s28 + $0x230] sm:$0xf0]  ;;  %v4067_v46 = vld [vmem:[%s5849_s28 + $0x48] sm:$0xf] }
  0xd7   : > { %5621 = vpow2.f32 %v4021_v58  ;;  %v4349_v58 = vld [vmem:[%s5849_s28 + $0x290] sm:$0xf0]  ;;  %v5363_v34 = vld [vmem:[%s5849_s28 + $0x254] sm:$0xf0]  ;;  %v5352_v21 = vld [vmem:[%s5849_s28 + $0x204] sm:$0xf] }
  0xd8   : > { %v4352_v60 = vor.u32 %v5368_v57, %v4349_v58  ;;  %v4285_v58 = vld [vmem:[%s5849_s28 + $0x210] sm:$0xf0] }
  0xd9   : > { %v852_v18 = vpop.f32.mrf.mxu3  ;;  %1640 = vmatpush.bf16.msrb.mxu1 %v4156_v4  ;;  %1652 = vmatpush.bf16.msrb.mxu2 %v4300_v10  ;;  %v4356_v4 = vor.u32 %v5371_v0, %v4355_v62  ;;  %v5364_v10 = vld [vmem:[%s5849_s28 + $0x264] sm:$0xf]  ;;  %v4288_v0 = vor.u32 %v5352_v21, %v4285_v58 }
  0xda   : > { %v6206_v18 = vld [vmem:[#allocation1] sm:$0xff]  ;;  %1679 = vmatpush.bf16.msra.mxu0 %v4160_v11  ;;  %v4333_v11 = vld [vmem:[%s5849_s28 + $0x270] sm:$0xf0] }
  0xdb   : > { %1628 = vmatmul.bf16.vlgmr.msrb.gmra.mxu0 %v6206_v18  ;;  %1667 = vmatmul.bf16.vlgmr.msrb.gmra.mxu3 %v6206_v18  ;;  %v4336_v13 = vor.u32 %v5364_v10, %v4333_v11 }
  0xdc   : > { %1763 = vmatpush.bf16.msrb.mxu3 %v4408_v29  ;;  %v4317_v29 = vld [vmem:[%s5849_s28 + $0x250] sm:$0xf0] }
  0xdd   : > { %1685 = vmatpush.bf16.msra.mxu1 %v4400_v19  ;;  %v5622_v56 = vpop.eup %5621  ;;  %v6255_v19 = vld [vmem:[#allocation1 + $0x9] sm:$0xff] }
  0xde   : > { %1724 = vmatpush.bf16.msrb.mxu0 %v4404_v23  ;;  %v6239_v1 = vadd.f32 1.0, %v5622_v56  ;;  %1641 = vmatmul.bf16.vlgmr.msrb.gmra.mxu1 %v6255_v19  ;;  %v5360_v23 = vld [vmem:[%s5849_s28 + $0x244] sm:$0xf]  ;;  %v5357_v56 = vld [vmem:[%s5849_s28 + $0x22c] sm:$0xf] }
  0xe0   : > { %1764 = vmatpush.bf16.msrb.mxu3 %v4392_v44  ;;  %v5356_v44 = vld [vmem:[%s5849_s28 + $0x224] sm:$0xf]  ;;  %vm967_vm0 = vweird.f32 %v6239_v1 }
  0xe1   : > { %1686 = vmatpush.bf16.msra.mxu1 %v4384_v37 }
  0xe4   : > { %1765 = vmatpush.bf16.msrb.mxu3 %v4376_v63 }
  0xe5   : > { %1687 = vmatpush.bf16.msra.mxu1 %v4368_v50  ;;  %v5299_v50 = vld [vmem:[%s5849_s28 + $0x54] sm:$0xf0] }
  0xe6   : > { %v863_v42 = vpop.f32.mrf.mxu0 }
  0xe7   : > { %v864_v47 = vadd.f32 %v863_v42, %v851_v33  ;;  %v876_v48 = vpop.f32.mrf.mxu1  ;;  %v4284_v33 = vor.u32 %v5354_v31, %v4283_v30  ;;  %v4388_v42 = vor.u32 %v5379_v40, %v4387_v39  ;;  %v4083_v30 = vld [vmem:[%s5849_s28 + $0x68] sm:$0xf]  ;;  %v4320_v31 = vor.u32 %v5360_v23, %v4317_v29  ;;  %v5361_v39 = vld [vmem:[%s5849_s28 + $0x24c] sm:$0xf]  ;;  %v4325_v40 = vld [vmem:[%s5849_s28 + $0x258] sm:$0xf0] }
  0xe8   : > { %v4084_v37 = vor.u32 %v5303_v32, %v4083_v30  ;;  %v4328_v20 = vor.u32 %v5361_v39, %v4325_v40  ;;  %v5291_v23 = vld [vmem:[%s5849_s28 + $0x14] sm:$0xf0]  ;;  %v5313_v32 = vld [vmem:[%s5849_s28 + $0xcc] sm:$0xf]  ;;  %v4117_v40 = vld [vmem:[%s5849_s28 + $0xb8] sm:$0xf0] }
  0xe9   : > { %v877_v54 = vadd.f32 %v876_v48, %v864_v47  ;;  %1653 = vmatpush.bf16.msrb.mxu2 %v4284_v33  ;;  %v4131_v47 = vld [vmem:[%s5849_s28 + $0xc8] sm:$0xf]  ;;  %1725 = vmatpush.bf16.msrb.mxu0 %v4388_v42  ;;  %v5309_v39 = vld [vmem:[%s5849_s28 + $0xac] sm:$0xf] }
  0xea   : > { %v4132_v51 = vor.u32 %v5315_v49, %v4131_v47  ;;  %1688 = vmatpush.bf16.msra.mxu1 %v4352_v60  ;;  %v4323_v33 = vld [vmem:[%s5849_s28 + $0x248] sm:$0xf]  ;;  %v4304_v49 = vor.u32 %v5356_v44, %v4301_v45  ;;  %v5295_v60 = vld [vmem:[%s5849_s28 + $0x34] sm:$0xf0] }
  0xeb   : > { %v4022_v59 = vmul.f32 -1.442695, %v877_v54  ;;  %v5375_v54 = vld [vmem:[%s5849_s28 + $0x2b4] sm:$0xf0]  ;;  %1680 = vmatmul.bf16.vlgmr.msra.gmra.mxu0 %v6255_v19  ;;  %1719 = vmatmul.bf16.vlgmr.msra.gmra.mxu3 %v6255_v19 }
  0xec   : > { %v4372_v15 = vor.u32 %v5375_v54, %v4371_v53  ;;  %v4068_v53 = vor.u32 %v5299_v50, %v4067_v46  ;;  %v5359_v54 = vld [vmem:[%s5849_s28 + $0x234] sm:$0xf0]  ;;  %v4101_v50 = vld [vmem:[%s5849_s28 + $0x98] sm:$0xf0] }
  0xed   : > { %5623 = vpow2.f32 %v4022_v59  ;;  %1698 = vmatpush.bf16.msra.mxu2 %v4148_v38  ;;  %v4115_v59 = vld [vmem:[%s5849_s28 + $0xa8] sm:$0xf]  ;;  %v4324_v38 = vor.u32 %v5363_v34, %v4323_v33  ;;  %v4308_v55 = vor.u32 %v5359_v54, %v4307_v52  ;;  %v4133_v33 = vld [vmem:[%s5849_s28 + $0xd8] sm:$0xf0] }
  0xee   : > { %v6196_v3 = vpop.f32.mrf.mxu2  ;;  %v865_v9 = vpop.f32.mrf.mxu0  ;;  %1726 = vmatpush.bf16.msrb.mxu0 %v4372_v15  ;;  %v4116_v2 = vor.u32 %v5311_v61, %v4115_v59  ;;  %5625 = vrcp.f32 %v6239_v1  ;;  %1689 = vmatpush.bf16.msra.mxu1 %v4336_v13  ;;  %v4309_v15 = vld [vmem:[%s5849_s28 + $0x238] sm:$0xf0]  ;;  %v4051_v59 = vld [vmem:[%s5849_s28 + $0x28] sm:$0xf] }
  0xef   : > { %v878_v17 = vpop.f32.mrf.mxu1  ;;  %v4360_v9 = vor.u32 %v5369_v5, %v4357_v6  ;;  %v4312_v57 = vor.u32 %v5357_v56, %v4309_v15  ;;  %v890_v61 = vadd.f32 %v6196_v3, %v316_v41  ;;  %v5355_v5 = vld [vmem:[%s5849_s28 + $0x214] sm:$0xf0]  ;;  %v5317_v6 = vld [vmem:[%s5849_s28 + $0xec] sm:$0xf]  ;;  %v4149_v13 = vld [vmem:[%s5849_s28 + $0xf8] sm:$0xf0] }
  0xf0   : > { %v6201_v8 = vpop.f32.mrf.mxu3  ;;  %v4339_v17 = vld [vmem:[%s5849_s28 + $0x268] sm:$0xf]  ;;  %v4152_v3 = vor.u32 %v5317_v6, %v4149_v13  ;;  %v5289_v13 = vld [vmem:[%s5849_s28 + $0xc] sm:$0xf] }
  0xf1   : > { %1699 = vmatpush.bf16.msra.mxu2 %v4132_v51  ;;  %1766 = vmatpush.bf16.msrb.mxu3 %v4360_v9  ;;  %v4340_v26 = vor.u32 %v5367_v24, %v4339_v17  ;;  %v4293_v17 = vld [vmem:[%s5849_s28 + $0x218] sm:$0xf0]  ;;  %v903_v29 = vadd.f32 %v6201_v8, %v890_v61 }
  0xf2   : > { %1727 = vmatpush.bf16.msrb.mxu0 %v4356_v4  ;;  %1690 = vmatpush.bf16.msra.mxu1 %v4320_v31  ;;  %v4291_v4 = vld [vmem:[%s5849_s28 + $0x208] sm:$0xf]  ;;  %v4296_v24 = vor.u32 %v5353_v14, %v4293_v17  ;;  %v4037_v14 = vld [vmem:[%s5849_s28 + $0x18] sm:$0xf0] }
  0xf3   : > { %v5624_v16 = vpop.eup %5623  ;;  %v4292_v12 = vor.u32 %v5355_v5, %v4291_v4  ;;  %v5293_v4 = vld [vmem:[%s5849_s28 + $0x2c] sm:$0xf]  ;;  %v4053_v5 = vld [vmem:[%s5849_s28 + $0x38] sm:$0xf0]  ;;  %v4040_v17 = vor.u32 %v5289_v13, %v4037_v14 }
  0xf4   : > { %v6243_v7 = vadd.f32 1.0, %v5624_v16  ;;  %v4056_v6 = vor.u32 %v5293_v4, %v4053_v5  ;;  %v4481_v5 = vld [vmem:[%s5849_s28 + $0x90] sm:$0xf0] }
  0xf5   : > { %1700 = vmatpush.bf16.msra.mxu2 %v4116_v2  ;;  %1767 = vmatpush.bf16.msrb.mxu3 %v4344_v28  ;;  %v4052_v2 = vor.u32 %v5295_v60, %v4051_v59  ;;  %v4035_v28 = vld [vmem:[%s5849_s28 + $0x8] sm:$0xf]  ;;  %v5297_v60 = vld [vmem:[%s5849_s28 + $0x4c] sm:$0xf] }
  0xf6   : > { %v891_v43 = vpop.f32.mrf.mxu2  ;;  %5627 = vrcp.f32 %v6243_v7  ;;  %1728 = vmatpush.bf16.msrb.mxu0 %v4340_v26  ;;  %1691 = vmatpush.bf16.msra.mxu1 %v4304_v49  ;;  %v4036_v30 = vor.u32 %v5291_v23, %v4035_v28  ;;  %vm986_vm2 = vweird.f32 %v6243_v7  ;;  %v992_v46 = vand.u32 2147483648, %v6243_v7  ;;  %v5305_v49 = vld [vmem:[%s5849_s28 + $0x8c] sm:$0xf]  ;;  %v4277_v28 = vld [vmem:[%s5849_s28 + $0x1f8] sm:$0xf0] }
  0xf7   : > { %v6282_v43 = vpop.eup %5625  ;;  %v4104_v52 = vor.u32 %v5305_v49, %v4101_v50  ;;  %v5321_v49 = vld [vmem:[%s5849_s28 + $0x10c] sm:$0xf]  ;;  %v4165_v50 = vld [vmem:[%s5849_s28 + $0x118] sm:$0xf0] }
  0xf8   : > { %v904_v48 = vpop.f32.mrf.mxu3  ;;  %v963_v16 = vmul.f32 %v6282_v43, %v6239_v1  ;;  %vm968_vm1 = vweird.f32 %v6282_v43  ;;  %v993_v21 = vor.u32 1.1754944e-38, %v992_v46  ;;  %v4181_v46 = vld [vmem:[%s5849_s28 + $0x138] sm:$0xf0] }
  0xf9   : > { %1701 = vmatpush.bf16.msra.mxu2 %v4100_v22  ;;  %v1844_v48 = vld [vmem:[%s1843_s29] sm:$0x3]  ;;  %1768 = vmatpush.bf16.msrb.mxu3 %v4328_v20  ;;  %v973_v20 = vand.u32 2147483648, %v6239_v1  ;;  %vm6328_vm4 = vmor %vm967_vm0, %vm968_vm1 }
  0xfa   : > { %1847 = vst [vmem:[#allocation1] ss:$9 sm:$0xff] %v1844_v48  ;;  %1729 = vmatpush.bf16.msrb.mxu0 %v4324_v38  ;;  %v964_v25 = vsub.f32 1.0, %v963_v16  ;;  %1692 = vmatpush.bf16.msra.mxu1 %v4288_v0  ;;  %v5301_v16 = vld [vmem:[%s5849_s28 + $0x6c] sm:$0xf] }
  0xfc   : > { %v6287_v47 = vpop.eup %5627  ;;  %v965_v38 = vmul.f32 %v6282_v43, %v964_v25 }
  0xfd   : > { %1702 = vmatpush.bf16.msra.mxu2 %v4084_v37  ;;  %v982_v63 = vmul.f32 %v6287_v47, %v6243_v7  ;;  %1769 = vmatpush.bf16.msrb.mxu3 %v4312_v57  ;;  %vm987_vm3 = vweird.f32 %v6287_v47 }
  0xfe   : > { %1730 = vmatpush.bf16.msrb.mxu0 %v4308_v55  ;;  %1737 = vmatpush.bf16.msrb.mxu1 %v4152_v3  ;;  %v966_v44 = vadd.f32 %v6282_v43, %v965_v38  ;;  %vm988_vm5 = vmor %vm986_vm2, %vm987_vm3  ;;  %v5337_v38 = vld [vmem:[%s5849_s28 + $0x18c] sm:$0xf] }
  0xff   : > { %v983_v26 = vsub.f32 1.0, %v982_v63  ;;  %v4085_v63 = vld [vmem:[%s5849_s28 + $0x78] sm:$0xf0] }
 0x100   : > { %v970_v54 = vsel %vm6328_vm4, %v6282_v43, %v966_v44  ;;  %v4088_v58 = vor.u32 %v5301_v16, %v4085_v63  ;;  %v4513_v63 = vld [vmem:[%s5849_s28 + $0xd0] sm:$0xf0] }
 0x101   : > { %1703 = vmatpush.bf16.msra.mxu2 %v4068_v53  ;;  %1770 = vmatpush.bf16.msrb.mxu3 %v4296_v24  ;;  %v984_v37 = vmul.f32 %v6287_v47, %v983_v26  ;;  %v974_v53 = vor.u32 1.1754944e-38, %v973_v20  ;;  %v4197_v20 = vld [vmem:[%s5849_s28 + $0x158] sm:$0xf0] }
 0x102   : > { %1731 = vmatpush.bf16.msrb.mxu0 %v4292_v12 }
 0x103   : > { %v985_v45 = vadd.f32 %v6287_v47, %v984_v37 }
 0x105   : > { %1704 = vmatpush.bf16.msra.mxu2 %v4052_v2  ;;  %v989_v55 = vsel %vm988_vm5, %v6287_v47, %v985_v45  ;;  %v4069_v47 = vld [vmem:[%s5849_s28 + $0x58] sm:$0xf0]  ;;  %v5325_v45 = vld [vmem:[%s5849_s28 + $0x12c] sm:$0xf] }
 0x106   : > { %v6271_v35 = vpop.f32.mrf.mxu0  ;;  %v4072_v61 = vor.u32 %v5297_v60, %v4069_v47  ;;  %v4184_v48 = vor.u32 %v5325_v45, %v4181_v46  ;;  %v4479_v47 = vld [vmem:[%s5849_s28 + $0x80] sm:$0xf]  ;;  %v4433_v45 = vld [vmem:[%s5849_s28 + $0x30] sm:$0xf0] }
 0x107   : > { %v928_v42 = vpop.f32.mrf.mxu1  ;;  %v916_v34 = vadd.f32 %v6271_v35, %v903_v29  ;;  %v4120_v35 = vor.u32 %v5309_v39, %v4117_v40  ;;  %v5333_v40 = vld [vmem:[%s5849_s28 + $0x16c] sm:$0xf] }
 0x108   : > { %v929_v51 = vadd.f32 %v928_v42, %v317_v36  ;;  %v4136_v36 = vor.u32 %v5313_v32, %v4133_v33  ;;  %v971_v42 = vand.u32 2147483647, %v6239_v1  ;;  %v990_v1 = vand.u32 2147483647, %v6243_v7  ;;  %v4261_v32 = vld [vmem:[%s5849_s28 + $0x1d8] sm:$0xf0] }
 0x109   : > { %1705 = vmatpush.bf16.msra.mxu2 %v4036_v30 }
 0x10a   : > { %1738 = vmatpush.bf16.msrb.mxu1 %v4136_v36  ;;  %vm972_vm6 = vcmp.eq.f32.partialorder %v971_v42, 8.507059e+37  ;;  %vm991_vm7 = vcmp.eq.f32.partialorder %v990_v1, 8.507059e+37  ;;  %v4245_v36 = vld [vmem:[%s5849_s28 + $0x1b8] sm:$0xf0]  ;;  %v5329_v42 = vld [vmem:[%s5849_s28 + $0x14c] sm:$0xf]  ;;  %v4168_v1 = vor.u32 %v5321_v49, %v4165_v50 }
 0x10b   : > { %v975_v7 = vsel %vm972_vm6, %v974_v53, %v970_v54  ;;  %v994_v57 = vsel %vm991_vm7, %v993_v21, %v989_v55  ;;  %v4200_v44 = vor.u32 %v5329_v42, %v4197_v20  ;;  %v4529_v54 = vld [vmem:[%s5849_s28 + $0xf0] sm:$0xf0]  ;;  %v5408_v21 = vld [vmem:[%s5849_s28 + $0xc4] sm:$0xf]  ;;  %v5390_v42 = vld [vmem:[%s5849_s28 + $0x2c] sm:$0xf0] }
 0x10c   : > { %v1016_v59 = vmul.f32 0.0, %v994_v57  ;;  %v4516_v57 = vor.u32 %v5408_v21, %v4513_v63  ;;  %v5388_v20 = vld [vmem:[%s5849_s28 + $0x24] sm:$0xf]  ;;  %v5386_v49 = vld [vmem:[%s5849_s28 + $0xc] sm:$0xf0] }
 0x10d   : > { %v4436_v46 = vor.u32 %v5388_v20, %v4433_v45  ;;  %v4655_v50 = vld [vmem:[%s5849_s28 + $0x1e0] sm:$0xf]  ;;  %v5466_v20 = vld [vmem:[%s5849_s28 + $0x28c] sm:$0xf0]  ;;  %v4593_v45 = vld [vmem:[%s5849_s28 + $0x170] sm:$0xf0] }
 0x10e   : > { %v941_v62 = vpop.f32.mrf.mxu2  ;;  %v954_v10 = vpop.f32.mrf.mxu3  ;;  %1739 = vmatpush.bf16.msrb.mxu1 %v4120_v35 }
 0x10f   : > { %v942_v9 = vadd.f32 %v941_v62, %v929_v51  ;;  %v917_v11 = vpop.f32.mrf.mxu0  ;;  %v930_v22 = vpop.f32.mrf.mxu1 }
 0x111   : > { %v955_v27 = vadd.f32 %v954_v10, %v942_v9 }
 0x112   : > { %1740 = vmatpush.bf16.msrb.mxu1 %v4104_v52  ;;  %v5414_v52 = vld [vmem:[%s5849_s28 + $0xec] sm:$0xf0] }
 0x113   : > { %v4023_v31 = vmul.f32 -1.442695, %v955_v27  ;;  %v5349_v27 = vld [vmem:[%s5849_s28 + $0x1ec] sm:$0xf] }
 0x114   : > { %v4280_v30 = vor.u32 %v5349_v27, %v4277_v28 }
 0x115   : > { %5629 = vpow2.f32 %v4023_v31  ;;  %v5345_v31 = vld [vmem:[%s5849_s28 + $0x1cc] sm:$0xf] }
 0x116   : > { %v943_v8 = vpop.f32.mrf.mxu2  ;;  %v956_v41 = vpop.f32.mrf.mxu3  ;;  %5631 = vtanh.f32 %v916_v34  ;;  %1741 = vmatpush.bf16.msrb.mxu1 %v4088_v58  ;;  %v4264_v33 = vor.u32 %v5345_v31, %v4261_v32  ;;  %v5341_v34 = vld [vmem:[%s5849_s28 + $0x1ac] sm:$0xf]  ;;  %v5404_v58 = vld [vmem:[%s5849_s28 + $0xa4] sm:$0xf]  ;;  %v5398_v31 = vld [vmem:[%s5849_s28 + $0x6c] sm:$0xf0] }
 0x117   : > { %v4248_v37 = vor.u32 %v5341_v34, %v4245_v36  ;;  %v4229_v8 = vld [vmem:[%s5849_s28 + $0x198] sm:$0xf0]  ;;  %v5396_v32 = vld [vmem:[%s5849_s28 + $0x64] sm:$0xf]  ;;  %v4465_v34 = vld [vmem:[%s5849_s28 + $0x70] sm:$0xf0] }
 0x118   : > { %v4232_v39 = vor.u32 %v5337_v38, %v4229_v8  ;;  %v4213_v41 = vld [vmem:[%s5849_s28 + $0x178] sm:$0xf0]  ;;  %v4468_v36 = vor.u32 %v5396_v32, %v4465_v34  ;;  %v5394_v38 = vld [vmem:[%s5849_s28 + $0x4c] sm:$0xf0]  ;;  %v5392_v8 = vld [vmem:[%s5849_s28 + $0x44] sm:$0xf] }
 0x119   : > { %v4216_v35 = vor.u32 %v5333_v40, %v4213_v41  ;;  %v4449_v40 = vld [vmem:[%s5849_s28 + $0x50] sm:$0xf0]  ;;  %v5470_v32 = vld [vmem:[%s5849_s28 + $0x2ac] sm:$0xf0] }
 0x11a   : > { %1742 = vmatpush.bf16.msrb.mxu1 %v4072_v61  ;;  %v5402_v61 = vld [vmem:[%s5849_s28 + $0x8c] sm:$0xf0]  ;;  %v4452_v41 = vor.u32 %v5392_v8, %v4449_v40  ;;  %v4609_v34 = vld [vmem:[%s5849_s28 + $0x190] sm:$0xf0]  ;;  %v5435_v8 = vld [vmem:[%s5849_s28 + $0x194] sm:$0xf0] }
 0x11b   : > { %v5630_v51 = vpop.eup %5629  ;;  %v4480_v4 = vor.u32 %v5402_v61, %v4479_v47  ;;  %v4591_v40 = vld [vmem:[%s5849_s28 + $0x160] sm:$0xf] }
 0x11c   : > { %v1000_v56 = vadd.f32 1.0, %v5630_v51  ;;  %v5632_v15 = vpop.eup %5631  ;;  %v5412_v51 = vld [vmem:[%s5849_s28 + $0xe4] sm:$0xf] }
 0x11d   : > { %v1017_v43 = vmul.f32 %v5632_v15, %v975_v7  ;;  %v4532_v55 = vor.u32 %v5412_v51, %v4529_v54  ;;  %v5410_v15 = vld [vmem:[%s5849_s28 + $0xcc] sm:$0xf0]  ;;  %v4495_v7 = vld [vmem:[%s5849_s28 + $0xa0] sm:$0xf]  ;;  %v4417_v51 = vld [vmem:[%s5849_s28 + $0x10] sm:$0xf0] }
 0x11e   : > { %5633 = vrcp.f32 %v1000_v56  ;;  %v1012_v10 = vand.u32 2147483648, %v1000_v56  ;;  %v1010_v12 = vand.u32 2147483647, %v1000_v56  ;;  %1743 = vmatpush.bf16.msrb.mxu1 %v4056_v6  ;;  %vm1006_vm9 = vweird.f32 %v1000_v56 }
 0x11f   : > { %v6343_v0 = vadd.f32 %v1017_v43, %v1016_v59  ;;  %2477 = vmatpush.bf16.msra.mxu3 %v4532_v55  ;;  %v4497_v43 = vld [vmem:[%s5849_s28 + $0xb0] sm:$0xf0]  ;;  %v5444_v55 = vld [vmem:[%s5849_s28 + $0x1e4] sm:$0xf] }
 0x120   : > { %v1013_v3 = vor.u32 1.1754944e-38, %v1012_v10  ;;  %vm1011_vm11 = vcmp.eq.f32.partialorder %v1010_v12, 8.507059e+37  ;;  %v4500_v60 = vor.u32 %v5404_v58, %v4497_v43  ;;  %v5478_v43 = vld [vmem:[%s5849_s28 + $0x2ec] sm:$0xf0] }
 0x121   : > { %5635 = vtanh.f32 %v6343_v0 }
 0x122   : > { %1744 = vmatpush.bf16.msrb.mxu1 %v4040_v17 }
 0x123   : > { %2478 = vmatpush.bf16.msra.mxu3 %v4516_v57  ;;  %v4783_v57 = vld [vmem:[%s5849_s28 + $0x2e0] sm:$0xf] }
 0x124   : > { %v5634_v62 = vpop.eup %5633  ;;  %v4784_v47 = vor.u32 %v5478_v43, %v4783_v57  ;;  %v5427_v57 = vld [vmem:[%s5849_s28 + $0x154] sm:$0xf0]  ;;  %v4559_v43 = vld [vmem:[%s5849_s28 + $0x120] sm:$0xf] }
 0x125   : > { %v1002_v2 = vmul.f32 %v5634_v62, %v1000_v56  ;;  %vm1007_vm8 = vweird.f32 %v5634_v62  ;;  %v4511_v56 = vld [vmem:[%s5849_s28 + $0xc0] sm:$0xf] }
 0x126   : > { %vm1008_vm10 = vmor %vm1006_vm9, %vm1007_vm8  ;;  %v4512_v16 = vor.u32 %v5410_v15, %v4511_v56  ;;  %v4657_v56 = vld [vmem:[%s5849_s28 + $0x1f0] sm:$0xf0]  ;;  %v4663_v15 = vld [vmem:[%s5849_s28 + $0x1e8] sm:$0xf] }
 0x127   : > { %v1003_v9 = vsub.f32 1.0, %v1002_v2  ;;  %v5636_v25 = vpop.eup %5635  ;;  %2479 = vmatpush.bf16.msra.mxu3 %v4500_v60  ;;  %v4660_v21 = vor.u32 %v5444_v55, %v4657_v56  ;;  %v4641_v60 = vld [vmem:[%s5849_s28 + $0x1d0] sm:$0xf0] }
 0x129   : > { %v1004_v11 = vmul.f32 %v5634_v62, %v1003_v9  ;;  %v6392_v9 = vld [vmem:[%s6135_s18] sm:$0xf] }
 0x12a   : > { %v1133_v13 = vperm.slane %v6392_v9, 1 }
 0x12b   : > { %v1005_v22 = vadd.f32 %v5634_v62, %v1004_v11  ;;  %v1132_v11 = vperm.slane %v6392_v9, 0 }
 0x12d   : > { %v1009_v24 = vsel %vm1008_vm10, %v5634_v62, %v1005_v22  ;;  %v5400_v62 = vld [vmem:[%s5849_s28 + $0x84] sm:$0xf] }
 0x12e   : > { %v1014_v26 = vsel %vm1011_vm11, %v1013_v3, %v1009_v24  ;;  %v4484_v6 = vor.u32 %v5400_v62, %v4481_v5  ;;  %v4647_v62 = vld [vmem:[%s5849_s28 + $0x1c8] sm:$0xf]  ;;  %v4623_v5 = vld [vmem:[%s5849_s28 + $0x1a0] sm:$0xf] }
 0x12f   : > { %v1020_v23 = vmul.f32 %v5636_v25, %v1014_v26 }
 0x130   : > { %2480 = vmatpush.bf16.msra.mxu3 %v4484_v6  ;;  %v5438_v6 = vld [vmem:[%s5849_s28 + $0x1ac] sm:$0xf0] }
 0x131   : > { %1022 = vst [vmem:[%s1021_s4] sm:$0x3] %v1020_v23  ;;  %v1027_v29 = vpack.c.bf16 %v1020_v23, %v1020_v23 }
 0x133   : > { %1654 = vmatmul.bf16.vlgmr.msrb.gmra.mxu2 %v1027_v29  ;;  %1693 = vmatmul.bf16.vlgmr.msra.gmra.mxu1 %v1027_v29 }
 0x134   : > { %1732 = vmatmul.bf16.vlgmr.msrb.gmra.mxu0 %v1027_v29  ;;  %1771 = vmatmul.bf16.vlgmr.msrb.gmra.mxu3 %v1027_v29 }
 0x135   : > { %1750 = vmatpush.bf16.msrb.mxu2 %v4280_v30  ;;  %v4463_v30 = vld [vmem:[%s5849_s28 + $0x60] sm:$0xf]  ;;  %2481 = vmatpush.bf16.msra.mxu3 %v4468_v36 }
 0x139   : > { %1751 = vmatpush.bf16.msrb.mxu2 %v4264_v33  ;;  %v4464_v33 = vor.u32 %v5398_v31, %v4463_v30  ;;  %2482 = vmatpush.bf16.msra.mxu3 %v4452_v41  ;;  %v4751_v30 = vld [vmem:[%s5849_s28 + $0x2a0] sm:$0xf]  ;;  %v5430_v41 = vld [vmem:[%s5849_s28 + $0x16c] sm:$0xf0] }
 0x13a   : > { %v4752_v36 = vor.u32 %v5470_v32, %v4751_v30  ;;  %v5416_v30 = vld [vmem:[%s5849_s28 + $0x104] sm:$0xf]  ;;  %v4545_v32 = vld [vmem:[%s5849_s28 + $0x110] sm:$0xf0] }
 0x13d   : > { %1752 = vmatpush.bf16.msrb.mxu2 %v4248_v37  ;;  %v4447_v37 = vld [vmem:[%s5849_s28 + $0x40] sm:$0xf]  ;;  %2483 = vmatpush.bf16.msra.mxu3 %v4436_v46 }
 0x141   : > { %1753 = vmatpush.bf16.msrb.mxu2 %v4232_v39  ;;  %v4448_v39 = vor.u32 %v5394_v38, %v4447_v37  ;;  %v4615_v38 = vld [vmem:[%s5849_s28 + $0x188] sm:$0xf] }
 0x143   : > { %1706 = vmatmul.bf16.vlgmr.msra.gmra.mxu2 %v6206_v18  ;;  %1745 = vmatmul.bf16.vlgmr.msrb.gmra.mxu1 %v6206_v18  ;;  %v4527_v18 = vld [vmem:[%s5849_s28 + $0xe0] sm:$0xf] }
 0x144   : > { %v4528_v53 = vor.u32 %v5414_v52, %v4527_v18  ;;  %v5446_v18 = vld [vmem:[%s5849_s28 + $0x1ec] sm:$0xf0]  ;;  %v5384_v52 = vld [vmem:[%s5849_s28 + $0x4] sm:$0xf] }
 0x145   : > { %1754 = vmatpush.bf16.msrb.mxu2 %v4216_v35  ;;  %v4431_v35 = vld [vmem:[%s5849_s28 + $0x20] sm:$0xf]  ;;  %v4420_v54 = vor.u32 %v5384_v52, %v4417_v51  ;;  %v5426_v51 = vld [vmem:[%s5849_s28 + $0x14c] sm:$0xf0] }
 0x146   : > { %2438 = vmatpush.bf16.msra.mxu0 %v4528_v53  ;;  %v4656_v53 = vor.u32 %v5446_v18, %v4655_v50  ;;  %v5431_v50 = vld [vmem:[%s5849_s28 + $0x174] sm:$0xf0]  ;;  %v4575_v52 = vld [vmem:[%s5849_s28 + $0x140] sm:$0xf] }
 0x147   : > { %2484 = vmatpush.bf16.msra.mxu3 %v4420_v54  ;;  %v4576_v56 = vor.u32 %v5426_v51, %v4575_v52  ;;  %v5472_v51 = vld [vmem:[%s5849_s28 + $0x2c4] sm:$0xf] }
 0x148   : > { %2451 = vmatpush.bf16.msra.mxu1 %v4656_v53  ;;  %v4719_v53 = vld [vmem:[%s5849_s28 + $0x260] sm:$0xf] }
 0x149   : > { %1755 = vmatpush.bf16.msrb.mxu2 %v4200_v44  ;;  %v4432_v44 = vor.u32 %v5390_v42, %v4431_v35  ;;  %v4735_v35 = vld [vmem:[%s5849_s28 + $0x280] sm:$0xf]  ;;  %v4592_v42 = vor.u32 %v5430_v41, %v4591_v40  ;;  %v5419_v40 = vld [vmem:[%s5849_s28 + $0x114] sm:$0xf0] }
 0x14a   : > { %2439 = vmatpush.bf16.msra.mxu0 %v4512_v16  ;;  %v5447_v16 = vld [vmem:[%s5849_s28 + $0x1f4] sm:$0xf0]  ;;  %v4736_v46 = vor.u32 %v5466_v20, %v4735_v35 }
 0x14b   : > { %v4664_v63 = vor.u32 %v5447_v16, %v4663_v15  ;;  %v5462_v15 = vld [vmem:[%s5849_s28 + $0x26c] sm:$0xf0]  ;;  %v4577_v16 = vld [vmem:[%s5849_s28 + $0x150] sm:$0xf0]  ;;  %v5479_v20 = vld [vmem:[%s5849_s28 + $0x2f4] sm:$0xf0] }
 0x14d   : > { %1756 = vmatpush.bf16.msrb.mxu2 %v4184_v48  ;;  %v4415_v48 = vld [vmem:[%s5849_s28] sm:$0xf]  ;;  %2529 = vmatpush.bf16.msrb.mxu3 %v4664_v63  ;;  %v4720_v63 = vor.u32 %v5462_v15, %v4719_v53  ;;  %v4769_v53 = vld [vmem:[%s5849_s28 + $0x2d0] sm:$0xf0] }
 0x14e   : > { %v4772_v15 = vor.u32 %v5472_v51, %v4769_v53  ;;  %v5403_v51 = vld [vmem:[%s5849_s28 + $0x94] sm:$0xf0]  ;;  %v4727_v53 = vld [vmem:[%s5849_s28 + $0x268] sm:$0xf] }
 0x151   : > { %1757 = vmatpush.bf16.msrb.mxu2 %v4168_v1  ;;  %v4416_v1 = vor.u32 %v5386_v49, %v4415_v48  ;;  %v4599_v49 = vld [vmem:[%s5849_s28 + $0x168] sm:$0xf] }
 0x154   : > { %1758 = vmatmul.bf16.vlgmr.msrb.gmra.mxu2 %v6255_v19  ;;  %v5406_v19 = vld [vmem:[%s5849_s28 + $0xac] sm:$0xf0] }
 0x155   : > { %v4496_v59 = vor.u32 %v5406_v19, %v4495_v7  ;;  %v4639_v7 = vld [vmem:[%s5849_s28 + $0x1c0] sm:$0xf]  ;;  %v5442_v19 = vld [vmem:[%s5849_s28 + $0x1cc] sm:$0xf0]  ;;  %2464 = vmatpush.bf16.msra.mxu2 %v4784_v47 }
 0x156   : > { %v4640_v58 = vor.u32 %v5442_v19, %v4639_v7  ;;  %v4583_v19 = vld [vmem:[%s5849_s28 + $0x148] sm:$0xf]  ;;  %v4703_v47 = vld [vmem:[%s5849_s28 + $0x240] sm:$0xf] }
 0x157   : > { %2440 = vmatpush.bf16.msra.mxu0 %v4496_v59  ;;  %v5440_v59 = vld [vmem:[%s5849_s28 + $0x1c4] sm:$0xf] }
 0x158   : > { %v1629_v2 = vpop.f32.mrf.mxu0  ;;  %v4644_v61 = vor.u32 %v5440_v59, %v4641_v60  ;;  %2452 = vmatpush.bf16.msra.mxu1 %v4640_v58  ;;  %v5422_v59 = vld [vmem:[%s5849_s28 + $0x12c] sm:$0xf0] }
 0x159   : > { %v1630_v14 = vadd.f32 %v1629_v2, %v1132_v11  ;;  %v5443_v2 = vld [vmem:[%s5849_s28 + $0x1d4] sm:$0xf0]  ;;  %v4624_v11 = vor.u32 %v5438_v6, %v4623_v5  ;;  %v4560_v60 = vor.u32 %v5422_v59, %v4559_v43  ;;  %v4561_v5 = vld [vmem:[%s5849_s28 + $0x130] sm:$0xf0]  ;;  %v4567_v6 = vld [vmem:[%s5849_s28 + $0x128] sm:$0xf] }
 0x15a   : > { %v1134_v43 = vperm.slane %v6392_v9, 2 }
 0x15b   : > { %2441 = vmatpush.bf16.msra.mxu0 %v4480_v4  ;;  %v1642_v3 = vpop.f32.mrf.mxu1  ;;  %v4648_v4 = vor.u32 %v5443_v2, %v4647_v62  ;;  %v5420_v62 = vld [vmem:[%s5849_s28 + $0x124] sm:$0xf] }
 0x15c   : > { %v6396_v24 = vadd.f32 %v1642_v3, %v1630_v14  ;;  %v4625_v14 = vld [vmem:[%s5849_s28 + $0x1b0] sm:$0xf0]  ;;  %v4631_v3 = vld [vmem:[%s5849_s28 + $0x1a8] sm:$0xf]  ;;  %2453 = vmatpush.bf16.msra.mxu1 %v4624_v11 }
 0x15d   : > { %2530 = vmatpush.bf16.msrb.mxu3 %v4648_v4 }
 0x15e   : > { %v1668_v10 = vpop.f32.mrf.mxu3 }
 0x15f   : > { %v1669_v17 = vadd.f32 %v1668_v10, %v1133_v13  ;;  %2442 = vmatpush.bf16.msra.mxu0 %v4464_v33  ;;  %v4767_v10 = vld [vmem:[%s5849_s28 + $0x2c0] sm:$0xf]  ;;  %v5436_v13 = vld [vmem:[%s5849_s28 + $0x1a4] sm:$0xf] }
 0x160   : > { %v1631_v12 = vpop.f32.mrf.mxu0  ;;  %v5432_v33 = vld [vmem:[%s5849_s28 + $0x184] sm:$0xf] }
 0x161   : > { %v5474_v12 = vld [vmem:[%s5849_s28 + $0x2cc] sm:$0xf0]  ;;  %v4612_v37 = vor.u32 %v5432_v33, %v4609_v34  ;;  %v5476_v33 = vld [vmem:[%s5849_s28 + $0x2e4] sm:$0xf]  ;;  %v4785_v34 = vld [vmem:[%s5849_s28 + $0x2f0] sm:$0xf0] }
 0x163   : > { %v1644_v28 = vpop.f32.mrf.mxu1  ;;  %2443 = vmatpush.bf16.msra.mxu0 %v4448_v39  ;;  %v4616_v39 = vor.u32 %v5435_v8, %v4615_v38  ;;  %v4548_v38 = vor.u32 %v5416_v30, %v4545_v32  ;;  %v4788_v8 = vor.u32 %v5476_v33, %v4785_v34  ;;  %v4503_v30 = vld [vmem:[%s5849_s28 + $0xa8] sm:$0xf] }
 0x166   : > { %v1670_v22 = vpop.f32.mrf.mxu3 }
 0x167   : > { %2444 = vmatpush.bf16.msra.mxu0 %v4432_v44  ;;  %v4628_v22 = vor.u32 %v5436_v13, %v4625_v14  ;;  %v5428_v44 = vld [vmem:[%s5849_s28 + $0x164] sm:$0xf]  ;;  %v4564_v13 = vor.u32 %v5420_v62, %v4561_v5  ;;  %v4759_v5 = vld [vmem:[%s5849_s28 + $0x2a8] sm:$0xf] }
 0x168   : > { %v1681_v25 = vpop.f32.mrf.mxu0  ;;  %v4596_v48 = vor.u32 %v5428_v44, %v4593_v45  ;;  %v5477_v45 = vld [vmem:[%s5849_s28 + $0x2ec] sm:$0xf] }
 0x169   : > { %v6398_v26 = vadd.f32 %v1681_v25, %v1669_v17  ;;  %v4768_v17 = vor.u32 %v5474_v12, %v4767_v10  ;;  %v5439_v25 = vld [vmem:[%s5849_s28 + $0x1b4] sm:$0xf0] }
 0x16a   : > { %v4632_v28 = vor.u32 %v5439_v25, %v4631_v3  ;;  %v5423_v10 = vld [vmem:[%s5849_s28 + $0x134] sm:$0xf0]  ;;  %v5418_v3 = vld [vmem:[%s5849_s28 + $0x10c] sm:$0xf0]  ;;  %v4687_v25 = vld [vmem:[%s5849_s28 + $0x220] sm:$0xf] }
 0x16b   : > { %2445 = vmatpush.bf16.msra.mxu0 %v4416_v1  ;;  %2465 = vmatpush.bf16.msra.mxu2 %v4768_v17  ;;  %v4600_v1 = vor.u32 %v5431_v50, %v4599_v49  ;;  %v4568_v14 = vor.u32 %v5423_v10, %v4567_v6  ;;  %v5450_v50 = vld [vmem:[%s5849_s28 + $0x20c] sm:$0xf0]  ;;  %v1135_v10 = vperm.slane %v6392_v9, 3 }
 0x16c   : > { %2531 = vmatpush.bf16.msrb.mxu3 %v4632_v28 }
 0x16e   : > { %v6400_v27 = vpop.f32.mrf.mxu3 }
 0x16f   : > { %2490 = vmatpush.bf16.msrb.mxu0 %v4660_v21  ;;  %2466 = vmatpush.bf16.msra.mxu2 %v4752_v36  ;;  %v5424_v21 = vld [vmem:[%s5849_s28 + $0x144] sm:$0xf] }
 0x170   : > { %v1683_v23 = vpop.f32.mrf.mxu0  ;;  %2532 = vmatpush.bf16.msrb.mxu3 %v4616_v39  ;;  %v4580_v7 = vor.u32 %v5424_v21, %v4577_v16  ;;  %v4551_v39 = vld [vmem:[%s5849_s28 + $0x108] sm:$0xf]  ;;  %v5415_v21 = vld [vmem:[%s5849_s28 + $0xf4] sm:$0xf0] }
 0x171   : > { %v4607_v23 = vld [vmem:[%s5849_s28 + $0x180] sm:$0xf]  ;;  %v4552_v35 = vor.u32 %v5419_v40, %v4551_v39  ;;  %v4775_v16 = vld [vmem:[%s5849_s28 + $0x2c8] sm:$0xf] }
 0x173   : > { %2491 = vmatpush.bf16.msrb.mxu0 %v4644_v61  ;;  %2467 = vmatpush.bf16.msra.mxu2 %v4736_v46  ;;  %v5458_v61 = vld [vmem:[%s5849_s28 + $0x24c] sm:$0xf0]  ;;  %v4793_v46 = vld [vmem:[%s5849_s28 + $0x2f8] sm:$0xf0] }
 0x174   : > { %2533 = vmatpush.bf16.msrb.mxu3 %v4600_v1  ;;  %v4704_v4 = vor.u32 %v5458_v61, %v4703_v47  ;;  %v5468_v47 = vld [vmem:[%s5849_s28 + $0x2a4] sm:$0xf]  ;;  %v4753_v61 = vld [vmem:[%s5849_s28 + $0x2b0] sm:$0xf0] }
 0x175   : > { %v4756_v62 = vor.u32 %v5468_v47, %v4753_v61 }
 0x176   : > { %v1722_v29 = vpop.f32.mrf.mxu3 }
 0x177   : > { %v5434_v29 = vld [vmem:[%s5849_s28 + $0x18c] sm:$0xf0]  ;;  %2492 = vmatpush.bf16.msrb.mxu0 %v4628_v22  ;;  %2468 = vmatpush.bf16.msra.mxu2 %v4720_v63  ;;  %v4543_v22 = vld [vmem:[%s5849_s28 + $0x100] sm:$0xf] }
 0x178   : > { %v4608_v31 = vor.u32 %v5434_v29, %v4607_v23  ;;  %v4544_v29 = vor.u32 %v5418_v3, %v4543_v22  ;;  %v5469_v22 = vld [vmem:[%s5849_s28 + $0x2ac] sm:$0xf]  ;;  %v4761_v3 = vld [vmem:[%s5849_s28 + $0x2b8] sm:$0xf0] }
 0x17a   : > { %2454 = vmatpush.bf16.msra.mxu1 %v4608_v31 }
 0x17b   : > { %2493 = vmatpush.bf16.msrb.mxu0 %v4612_v37  ;;  %2469 = vmatpush.bf16.msra.mxu2 %v4704_v4  ;;  %v6490_v37 = vld [vmem:[#allocation1] sm:$0xff] }
 0x17c   : > { %2446 = vmatmul.bf16.vlgmr.msra.gmra.mxu0 %v6490_v37  ;;  %2485 = vmatmul.bf16.vlgmr.msra.gmra.mxu3 %v6490_v37  ;;  %v5411_v4 = vld [vmem:[%s5849_s28 + $0xd4] sm:$0xf0] }
 0x17e   : > { %2455 = vmatpush.bf16.msra.mxu1 %v4592_v42  ;;  %v4791_v42 = vld [vmem:[%s5849_s28 + $0x2e8] sm:$0xf] }
 0x17f   : > { %2494 = vmatpush.bf16.msrb.mxu0 %v4596_v48  ;;  %v4792_v44 = vor.u32 %v5479_v20, %v4791_v42  ;;  %v4671_v48 = vld [vmem:[%s5849_s28 + $0x200] sm:$0xf]  ;;  %v5465_v42 = vld [vmem:[%s5849_s28 + $0x28c] sm:$0xf]  ;;  %v4745_v20 = vld [vmem:[%s5849_s28 + $0x298] sm:$0xf0] }
 0x180   : > { %v4672_v52 = vor.u32 %v5450_v50, %v4671_v48  ;;  %v4748_v48 = vor.u32 %v5465_v42, %v4745_v20  ;;  %v4721_v50 = vld [vmem:[%s5849_s28 + $0x270] sm:$0xf0]  ;;  %v5448_v20 = vld [vmem:[%s5849_s28 + $0x204] sm:$0xf] }
 0x182   : > { %2456 = vmatpush.bf16.msra.mxu1 %v4576_v56 }
 0x183   : > { %2495 = vmatpush.bf16.msrb.mxu0 %v4580_v7 }
 0x186   : > { %2457 = vmatpush.bf16.msra.mxu1 %v4560_v60 }
 0x187   : > { %2496 = vmatpush.bf16.msrb.mxu0 %v4564_v13 }
 0x18a   : > { %2458 = vmatpush.bf16.msra.mxu1 %v4544_v29  ;;  %v4764_v29 = vor.u32 %v5469_v22, %v4761_v3  ;;  %v5459_v3 = vld [vmem:[%s5849_s28 + $0x254] sm:$0xf0] }
 0x18b   : > { %2497 = vmatpush.bf16.msrb.mxu0 %v4548_v38  ;;  %v5407_v38 = vld [vmem:[%s5849_s28 + $0xb4] sm:$0xf0] }
 0x18c   : > { %v4504_v40 = vor.u32 %v5407_v38, %v4503_v30  ;;  %v4455_v30 = vld [vmem:[%s5849_s28 + $0x48] sm:$0xf] }
 0x18e   : > { %2503 = vmatpush.bf16.msrb.mxu1 %v4788_v8  ;;  %v4743_v8 = vld [vmem:[%s5849_s28 + $0x288] sm:$0xf] }
 0x18f   : > { %2542 = vmatpush.bf16.msra.mxu0 %v4792_v44 }
 0x192   : > { %2504 = vmatpush.bf16.msrb.mxu1 %v4772_v15  ;;  %v5449_v15 = vld [vmem:[%s5849_s28 + $0x20c] sm:$0xf] }
 0x196   : > { %2505 = vmatpush.bf16.msrb.mxu1 %v4756_v62  ;;  %v5456_v62 = vld [vmem:[%s5849_s28 + $0x244] sm:$0xf] }
 0x1b0   : > { %v1694_v18 = vpop.f32.mrf.mxu1 }
 0x1b1   : > { %v1695_v54 = vadd.f32 %v1694_v18, %v6398_v26  ;;  %v6460_v55 = vpop.f32.mrf.mxu0  ;;  %v4584_v26 = vor.u32 %v5427_v57, %v4583_v19  ;;  %v4796_v18 = vor.u32 %v5477_v45, %v4793_v46  ;;  %v5475_v19 = vld [vmem:[%s5849_s28 + $0x2d4] sm:$0xf0]  ;;  %v5473_v57 = vld [vmem:[%s5849_s28 + $0x2cc] sm:$0xf] }
 0x1b2   : > { %v4776_v59 = vor.u32 %v5475_v19, %v4775_v16  ;;  %v4729_v19 = vld [vmem:[%s5849_s28 + $0x278] sm:$0xf0] }
 0x1b3   : > { %v4410_v58 = vmul.f32 -1.442695, %v1695_v54  ;;  %2534 = vmatpush.bf16.msrb.mxu3 %v4584_v26  ;;  %v4535_v54 = vld [vmem:[%s5849_s28 + $0xe8] sm:$0xf] }
 0x1b4   : > { %v4536_v7 = vor.u32 %v5415_v21, %v4535_v54  ;;  %2543 = vmatpush.bf16.msra.mxu0 %v4776_v59  ;;  %v5463_v54 = vld [vmem:[%s5849_s28 + $0x274] sm:$0xf0] }
 0x1b5   : > { %5637 = vpow2.f32 %v4410_v58  ;;  %v4777_v58 = vld [vmem:[%s5849_s28 + $0x2d8] sm:$0xf0]  ;;  %v4728_v59 = vor.u32 %v5463_v54, %v4727_v53  ;;  %v4679_v53 = vld [vmem:[%s5849_s28 + $0x208] sm:$0xf]  ;;  %v5451_v54 = vld [vmem:[%s5849_s28 + $0x214] sm:$0xf0] }
 0x1b6   : > { %v1655_v2 = vpop.f32.mrf.mxu2  ;;  %v4780_v60 = vor.u32 %v5473_v57, %v4777_v58 }
 0x1b7   : > { %v1656_v11 = vadd.f32 %v1655_v2, %v6396_v24  ;;  %v6480_v12 = vpop.f32.mrf.mxu3  ;;  %v5454_v24 = vld [vmem:[%s5849_s28 + $0x22c] sm:$0xf0]  ;;  %2535 = vmatpush.bf16.msrb.mxu3 %v4568_v14  ;;  %v4519_v2 = vld [vmem:[%s5849_s28 + $0xc8] sm:$0xf] }
 0x1b8   : > { %v1696_v17 = vpop.f32.mrf.mxu1  ;;  %v4688_v31 = vor.u32 %v5454_v24, %v4687_v25  ;;  %v4520_v14 = vor.u32 %v5411_v4, %v4519_v2  ;;  %v5464_v25 = vld [vmem:[%s5849_s28 + $0x284] sm:$0xf]  ;;  %v4737_v24 = vld [vmem:[%s5849_s28 + $0x290] sm:$0xf0] }
 0x1b9   : > { %v4409_v28 = vmul.f32 -1.442695, %v1656_v11  ;;  %v1735_v23 = vpop.f32.mrf.mxu0  ;;  %v5471_v11 = vld [vmem:[%s5849_s28 + $0x2b4] sm:$0xf0]  ;;  %v4705_v2 = vld [vmem:[%s5849_s28 + $0x250] sm:$0xf0] }
 0x1ba   : > { %2470 = vmatpush.bf16.msra.mxu2 %v4688_v31  ;;  %v4760_v17 = vor.u32 %v5471_v11, %v4759_v5  ;;  %v2662_v31 = vld [vmem:[%s2661_s8] sm:$0x3]  ;;  %v4471_v5 = vld [vmem:[%s5849_s28 + $0x68] sm:$0xf] }
 0x1bb   : > { %v5638_v36 = vpop.eup %5637  ;;  %5639 = vpow2.f32 %v4409_v28  ;;  %2536 = vmatpush.bf16.msrb.mxu3 %v4552_v35  ;;  %v5467_v35 = vld [vmem:[%s5849_s28 + $0x294] sm:$0xf0] }
 0x1bc   : > { %v6494_v41 = vadd.f32 1.0, %v5638_v36  ;;  %v4740_v36 = vor.u32 %v5464_v25, %v4737_v24  ;;  %2544 = vmatpush.bf16.msra.mxu0 %v4760_v17  ;;  %v4744_v46 = vor.u32 %v5467_v35, %v4743_v8  ;;  %v5399_v11 = vld [vmem:[%s5849_s28 + $0x74] sm:$0xf0]  ;;  %v5457_v25 = vld [vmem:[%s5849_s28 + $0x24c] sm:$0xf] }
 0x1bd   : > { %v4472_v22 = vor.u32 %v5399_v11, %v4471_v5  ;;  %v4689_v24 = vld [vmem:[%s5849_s28 + $0x230] sm:$0xf0]  ;;  %v5453_v8 = vld [vmem:[%s5849_s28 + $0x22c] sm:$0xf]  ;;  %v4489_v11 = vld [vmem:[%s5849_s28 + $0x98] sm:$0xf0] }
 0x1be   : > { %5641 = vrcp.f32 %v6494_v41  ;;  %v1657_v49 = vpop.f32.mrf.mxu2  ;;  %2471 = vmatpush.bf16.msra.mxu2 %v4672_v52  ;;  %v1808_v28 = vand.u32 2147483647, %v6494_v41  ;;  %v1810_v33 = vand.u32 2147483648, %v6494_v41  ;;  %vm1804_vm12 = vweird.f32 %v6494_v41  ;;  %2506 = vmatpush.bf16.msrb.mxu1 %v4740_v36  ;;  %v5401_v5 = vld [vmem:[%s5849_s28 + $0x8c] sm:$0xf] }
 0x1bf   : > { %v1774_v1 = vpop.f32.mrf.mxu3  ;;  %2581 = vmatpush.bf16.msra.mxu3 %v4796_v18  ;;  %v5460_v49 = vld [vmem:[%s5849_s28 + $0x264] sm:$0xf] }
 0x1c0   : > { %v6509_v56 = vpop.f32.mrf.mxu1  ;;  %v4487_v1 = vld [vmem:[%s5849_s28 + $0x88] sm:$0xf]  ;;  %v4724_v52 = vor.u32 %v5460_v49, %v4721_v50  ;;  %vm6561_vm14 = vcmp.eq.f32.partialorder %v1808_v28, 8.507059e+37  ;;  %v1811_v57 = vor.u32 1.1754944e-38, %v1810_v33  ;;  %2545 = vmatpush.bf16.msra.mxu0 %v4744_v46  ;;  %v4713_v28 = vld [vmem:[%s5849_s28 + $0x258] sm:$0xf0] }
 0x1c1   : > { %v5640_v63 = vpop.eup %5639  ;;  %v4695_v33 = vld [vmem:[%s5849_s28 + $0x228] sm:$0xf]  ;;  %v1747_v46 = vadd.f32 %v6509_v56, %v1135_v10  ;;  %v5391_v50 = vld [vmem:[%s5849_s28 + $0x34] sm:$0xf0]  ;;  %v4681_v56 = vld [vmem:[%s5849_s28 + $0x218] sm:$0xf0] }
 0x1c2   : > { %v6516_v26 = vadd.f32 1.0, %v5640_v63  ;;  %2516 = vmatpush.bf16.msrb.mxu2 %v4536_v7  ;;  %v6568_v63 = vld [vmem:[#allocation1 + $0x9] sm:$0xff]  ;;  %v5461_v7 = vld [vmem:[%s5849_s28 + $0x26c] sm:$0xf]  ;;  %2507 = vmatpush.bf16.msrb.mxu1 %v4724_v52 }
 0x1c3   : > { %2582 = vmatpush.bf16.msra.mxu3 %v4780_v60  ;;  %2459 = vmatmul.bf16.vlgmr.msra.gmra.mxu1 %v6568_v63  ;;  %2665 = vst [vmem:[#allocation1] ss:$9 sm:$0xff] %v2662_v31  ;;  %v4732_v61 = vor.u32 %v5461_v7, %v4729_v19  ;;  %v4716_v31 = vor.u32 %v5457_v25, %v4713_v28  ;;  %v4439_v49 = vld [vmem:[%s5849_s28 + $0x28] sm:$0xf]  ;;  %v5393_v28 = vld [vmem:[%s5849_s28 + $0x4c] sm:$0xf] }
 0x1c4   : > { %v6524_v6 = vpop.eup %5641  ;;  %5643 = vrcp.f32 %v6516_v26  ;;  %v1789_v58 = vand.u32 2147483647, %v6516_v26  ;;  %v1791_v47 = vand.u32 2147483648, %v6516_v26  ;;  %2498 = vmatmul.bf16.vlgmr.msrb.gmra.mxu0 %v6568_v63  ;;  %2537 = vmatmul.bf16.vlgmr.msrb.gmra.mxu3 %v6568_v63  ;;  %vm1785_vm1 = vweird.f32 %v6516_v26 }
 0x1c5   : > { %v1800_v13 = vmul.f32 %v6524_v6, %v6494_v41  ;;  %vm1805_vm13 = vweird.f32 %v6524_v6  ;;  %v4708_v41 = vor.u32 %v5456_v62, %v4705_v2  ;;  %2546 = vmatpush.bf16.msra.mxu0 %v4728_v59  ;;  %v4680_v19 = vor.u32 %v5451_v54, %v4679_v53  ;;  %v5405_v2 = vld [vmem:[%s5849_s28 + $0xac] sm:$0xf]  ;;  %v4633_v53 = vld [vmem:[%s5849_s28 + $0x1b8] sm:$0xf0] }
 0x1c6   : > { %v1707_v23 = vpop.f32.mrf.mxu2  ;;  %2517 = vmatpush.bf16.msrb.mxu2 %v4520_v14  ;;  %vm6578_vm15 = vmor %vm1804_vm12, %vm1805_vm13  ;;  %v1792_v36 = vor.u32 1.1754944e-38, %v1791_v47  ;;  %vm1790_vm3 = vcmp.eq.f32.partialorder %v1789_v58, 8.507059e+37  ;;  %v4423_v58 = vld [vmem:[%s5849_s28 + $0x8] sm:$0xf]  ;;  %v4521_v47 = vld [vmem:[%s5849_s28 + $0xd8] sm:$0xf0] }
 0x1c7   : > { %v1801_v32 = vsub.f32 1.0, %v1800_v13  ;;  %v1708_v34 = vadd.f32 %v1707_v23, %v1134_v43  ;;  %2583 = vmatpush.bf16.msra.mxu3 %v4764_v29  ;;  %v4488_v43 = vor.u32 %v5403_v51, %v4487_v1  ;;  %v4711_v13 = vld [vmem:[%s5849_s28 + $0x248] sm:$0xf]  ;;  %v5452_v29 = vld [vmem:[%s5849_s28 + $0x224] sm:$0xf]  ;;  %2508 = vmatpush.bf16.msrb.mxu1 %v4708_v41 }
 0x1c8   : > { %v1748_v39 = vpop.f32.mrf.mxu1  ;;  %v4712_v23 = vor.u32 %v5459_v3, %v4711_v13  ;;  %v5413_v1 = vld [vmem:[%s5849_s28 + $0xec] sm:$0xf]  ;;  %v4492_v13 = vor.u32 %v5401_v5, %v4489_v11  ;;  %v4473_v3 = vld [vmem:[%s5849_s28 + $0x78] sm:$0xf0]  ;;  %v5504_v5 = vld [vmem:[%s5849_s28 + $0xc4] sm:$0xf] }
 0x1c9   : > { %v1802_v44 = vmul.f32 %v6524_v6, %v1801_v32  ;;  %v1721_v45 = vadd.f32 %v6400_v27, %v1708_v34  ;;  %v5395_v32 = vld [vmem:[%s5849_s28 + $0x54] sm:$0xf0]  ;;  %v4697_v39 = vld [vmem:[%s5849_s28 + $0x238] sm:$0xf0] }
 0x1ca   : > { %v6553_v18 = vpop.eup %5643  ;;  %2518 = vmatpush.bf16.msrb.mxu2 %v4504_v40  ;;  %v5455_v34 = vld [vmem:[%s5849_s28 + $0x234] sm:$0xf0]  ;;  %v4456_v42 = vor.u32 %v5395_v32, %v4455_v30  ;;  %2547 = vmatpush.bf16.msra.mxu0 %v4712_v23  ;;  %v4700_v51 = vor.u32 %v5453_v8, %v4697_v39  ;;  %v4457_v23 = vld [vmem:[%s5849_s28 + $0x58] sm:$0xf0] }
 0x1cb   : > { %v1803_v27 = vadd.f32 %v6524_v6, %v1802_v44  ;;  %v1781_v21 = vmul.f32 %v6553_v18, %v6516_v26  ;;  %v1734_v16 = vadd.f32 %v6460_v55, %v1721_v45  ;;  %2584 = vmatpush.bf16.msra.mxu3 %v4748_v48  ;;  %vm1786_vm0 = vweird.f32 %v6553_v18  ;;  %v4673_v44 = vld [vmem:[%s5849_s28 + $0x210] sm:$0xf0]  ;;  %v4425_v8 = vld [vmem:[%s5849_s28 + $0x18] sm:$0xf0] }
 0x1cc   : > { %vm1787_vm2 = vmor %vm1785_vm1, %vm1786_vm0  ;;  %v4692_v26 = vor.u32 %v5452_v29, %v4689_v24  ;;  %v4696_v48 = vor.u32 %v5455_v34, %v4695_v33  ;;  %v4676_v9 = vor.u32 %v5448_v20, %v4673_v44  ;;  %v4460_v29 = vor.u32 %v5393_v28, %v4457_v23  ;;  %v4867_v23 = vld [vmem:[%s5849_s28 + $0x80] sm:$0xf] }
 0x1cd   : > { %v1782_v60 = vsub.f32 1.0, %v1781_v21  ;;  %5645 = vtanh.f32 %v1734_v16  ;;  %v1807_v14 = vsel %vm6578_vm15, %v6524_v6, %v1803_v27  ;;  %v4537_v27 = vld [vmem:[%s5849_s28 + $0xf8] sm:$0xf0]  ;;  %v4440_v16 = vor.u32 %v5391_v50, %v4439_v49 }
 0x1ce   : > { %v1709_v4 = vpop.f32.mrf.mxu2  ;;  %2519 = vmatpush.bf16.msrb.mxu2 %v4488_v43  ;;  %v1812_v38 = vsel %vm6561_vm14, %v1811_v57, %v1807_v14  ;;  %2509 = vmatpush.bf16.msrb.mxu1 %v4692_v26  ;;  %v4684_v57 = vor.u32 %v5449_v15, %v4681_v56  ;;  %v5387_v43 = vld [vmem:[%s5849_s28 + $0x14] sm:$0xf0]  ;;  %v5385_v26 = vld [vmem:[%s5849_s28 + $0xc] sm:$0xf] }
 0x1cf   : > { %v1783_v17 = vmul.f32 %v6553_v18, %v1782_v60  ;;  %2585 = vmatpush.bf16.msra.mxu3 %v4732_v61  ;;  %2548 = vmatpush.bf16.msra.mxu0 %v4696_v48  ;;  %v4424_v55 = vor.u32 %v5387_v43, %v4423_v58  ;;  %v5409_v60 = vld [vmem:[%s5849_s28 + $0xcc] sm:$0xf]  ;;  %v4505_v4 = vld [vmem:[%s5849_s28 + $0xb8] sm:$0xf0]  ;;  %v4428_v39 = vor.u32 %v5385_v26, %v4425_v8 }
 0x1d0   : > { %v4524_v62 = vor.u32 %v5409_v60, %v4521_v47  ;;  %v5429_v56 = vld [vmem:[%s5849_s28 + $0x16c] sm:$0xf]  ;;  %v4569_v58 = vld [vmem:[%s5849_s28 + $0x138] sm:$0xf0]  ;;  %v5510_v47 = vld [vmem:[%s5849_s28 + $0xec] sm:$0xf0] }
 0x1d1   : > { %v1784_v6 = vadd.f32 %v6553_v18, %v1783_v17 }
 0x1d2   : > { %2520 = vmatpush.bf16.msrb.mxu2 %v4472_v22  ;;  %2510 = vmatpush.bf16.msrb.mxu1 %v4676_v9  ;;  %v5397_v22 = vld [vmem:[%s5849_s28 + $0x6c] sm:$0xf]  ;;  %v4617_v9 = vld [vmem:[%s5849_s28 + $0x198] sm:$0xf0] }
 0x1d3   : > { %v5646_v40 = vpop.eup %5645  ;;  %v1788_v35 = vsel %vm1787_vm2, %v6553_v18, %v1784_v6  ;;  %v1834_v18 = vmul.f32 %v1812_v38, %v6343_v0  ;;  %2586 = vmatpush.bf16.msra.mxu3 %v4716_v31  ;;  %v4540_v0 = vor.u32 %v5413_v1, %v4537_v27  ;;  %2549 = vmatpush.bf16.msra.mxu0 %v4680_v19  ;;  %v5389_v6 = vld [vmem:[%s5849_s28 + $0x2c] sm:$0xf]  ;;  %v4441_v31 = vld [vmem:[%s5849_s28 + $0x38] sm:$0xf0] }
 0x1d4   : > { %v1793_v45 = vsel %vm1790_vm3, %v1792_v36, %v1788_v35  ;;  %v4476_v25 = vor.u32 %v5397_v22, %v4473_v3  ;;  %v4444_v32 = vor.u32 %v5389_v6, %v4441_v31  ;;  %v5441_v1 = vld [vmem:[%s5849_s28 + $0x1cc] sm:$0xf]  ;;  %v5500_v22 = vld [vmem:[%s5849_s28 + $0xa4] sm:$0xf]  ;;  %v4885_v3 = vld [vmem:[%s5849_s28 + $0xb0] sm:$0xf0] }
 0x1d5   : > { %v1835_v52 = vmul.f32 %v5646_v40, %v1793_v45  ;;  %v5445_v45 = vld [vmem:[%s5849_s28 + $0x1ec] sm:$0xf]  ;;  %v4888_v28 = vor.u32 %v5500_v22, %v4885_v3  ;;  %v4869_v31 = vld [vmem:[%s5849_s28 + $0x90] sm:$0xf0]  ;;  %v5574_v3 = vld [vmem:[%s5849_s28 + $0x2ec] sm:$0xf0] }
 0x1d6   : > { %2521 = vmatpush.bf16.msrb.mxu2 %v4456_v42  ;;  %2555 = vmatpush.bf16.msra.mxu1 %v4540_v0  ;;  %v5433_v27 = vld [vmem:[%s5849_s28 + $0x18c] sm:$0xf] }
 0x1d7   : > { %v6627_v10 = vadd.f32 %v1835_v52, %v1834_v18  ;;  %v1759_v21 = vpop.f32.mrf.mxu2  ;;  %2587 = vmatpush.bf16.msra.mxu3 %v4700_v51  ;;  %v4649_v18 = vld [vmem:[%s5849_s28 + $0x1d8] sm:$0xf0]  ;;  %v5437_v51 = vld [vmem:[%s5849_s28 + $0x1ac] sm:$0xf]  ;;  %v4620_v15 = vor.u32 %v5433_v27, %v4617_v9  ;;  %v5490_v27 = vld [vmem:[%s5849_s28 + $0x4c] sm:$0xf0] }
 0x1d8   : > { %v1760_v7 = vadd.f32 %v1759_v21, %v1747_v46  ;;  %v4665_v46 = vld [vmem:[%s5849_s28 + $0x1f8] sm:$0xf0]  ;;  %v4652_v52 = vor.u32 %v5441_v1, %v4649_v18  ;;  %v4636_v54 = vor.u32 %v5437_v51, %v4633_v53  ;;  %v5425_v0 = vld [vmem:[%s5849_s28 + $0x14c] sm:$0xf]  ;;  %v5494_v1 = vld [vmem:[%s5849_s28 + $0x6c] sm:$0xf0] }
 0x1d9   : > { %v4668_v50 = vor.u32 %v5445_v45, %v4665_v46  ;;  %v4601_v21 = vld [vmem:[%s5849_s28 + $0x178] sm:$0xf0]  ;;  %v5492_v18 = vld [vmem:[%s5849_s28 + $0x64] sm:$0xf]  ;;  %v4853_v51 = vld [vmem:[%s5849_s28 + $0x70] sm:$0xf0] }
 0x1da   : > { %v1773_v59 = vadd.f32 %v6480_v12, %v1760_v7  ;;  %2522 = vmatpush.bf16.msrb.mxu2 %v4440_v16  ;;  %2556 = vmatpush.bf16.msra.mxu1 %v4524_v62  ;;  %v4508_v12 = vor.u32 %v5405_v2, %v4505_v4  ;;  %v4604_v16 = vor.u32 %v5429_v56, %v4601_v21  ;;  %v4585_v7 = vld [vmem:[%s5849_s28 + $0x158] sm:$0xf0]  ;;  %v4917_v2 = vld [vmem:[%s5849_s28 + $0xf0] sm:$0xf0]  ;;  %v5488_v9 = vld [vmem:[%s5849_s28 + $0x44] sm:$0xf] }
 0x1db   : > { %2588 = vmatpush.bf16.msra.mxu3 %v4684_v57  ;;  %v4588_v19 = vor.u32 %v5425_v0, %v4585_v7  ;;  %v5421_v57 = vld [vmem:[%s5849_s28 + $0x12c] sm:$0xf]  ;;  %v4856_v53 = vor.u32 %v5492_v18, %v4853_v51  ;;  %v4837_v56 = vld [vmem:[%s5849_s28 + $0x50] sm:$0xf0]  ;;  %v5486_v0 = vld [vmem:[%s5849_s28 + $0x2c] sm:$0xf0] }
 0x1dc   : > { %v4411_v61 = vmul.f32 -1.442695, %v1773_v59  ;;  %v4572_v43 = vor.u32 %v5421_v57, %v4569_v58  ;;  %v5417_v59 = vld [vmem:[%s5849_s28 + $0x10c] sm:$0xf]  ;;  %v4840_v21 = vor.u32 %v5488_v9, %v4837_v56  ;;  %v5484_v7 = vld [vmem:[%s5849_s28 + $0x24] sm:$0xf] }
 0x1dd   : > { %v4821_v57 = vld [vmem:[%s5849_s28 + $0x30] sm:$0xf0]  ;;  %v5566_v18 = vld [vmem:[%s5849_s28 + $0x2ac] sm:$0xf0]  ;;  %v5531_v9 = vld [vmem:[%s5849_s28 + $0x194] sm:$0xf0] }
 0x1de   : > { %5647 = vpow2.f32 %v4411_v61  ;;  %2523 = vmatpush.bf16.msrb.mxu2 %v4424_v55  ;;  %2557 = vmatpush.bf16.msra.mxu1 %v4508_v12  ;;  %v4553_v55 = vld [vmem:[%s5849_s28 + $0x118] sm:$0xf0]  ;;  %v5508_v61 = vld [vmem:[%s5849_s28 + $0xe4] sm:$0xf]  ;;  %v5506_v12 = vld [vmem:[%s5849_s28 + $0xcc] sm:$0xf0]  ;;  %v4824_v58 = vor.u32 %v5484_v7, %v4821_v57 }
 0x1df   : > { %v1761_v41 = vpop.f32.mrf.mxu2  ;;  %v4556_v60 = vor.u32 %v5417_v59, %v4553_v55  ;;  %v4920_v4 = vor.u32 %v5508_v61, %v4917_v2  ;;  %v5482_v59 = vld [vmem:[%s5849_s28 + $0xc] sm:$0xf0]  ;;  %v5043_v55 = vld [vmem:[%s5849_s28 + $0x1e0] sm:$0xf]  ;;  %v4805_v61 = vld [vmem:[%s5849_s28 + $0x10] sm:$0xf0] }
 0x1e0   : > { %v4899_v41 = vld [vmem:[%s5849_s28 + $0xc0] sm:$0xf]  ;;  %v4997_v51 = vld [vmem:[%s5849_s28 + $0x190] sm:$0xf0]  ;;  %v5562_v7 = vld [vmem:[%s5849_s28 + $0x28c] sm:$0xf0] }
 0x1e1   : > { %3295 = vmatpush.bf16.msrb.mxu3 %v4920_v4  ;;  %v4900_v11 = vor.u32 %v5506_v12, %v4899_v41  ;;  %v5540_v4 = vld [vmem:[%s5849_s28 + $0x1e4] sm:$0xf]  ;;  %v5045_v41 = vld [vmem:[%s5849_s28 + $0x1f0] sm:$0xf0]  ;;  %v5051_v12 = vld [vmem:[%s5849_s28 + $0x1e8] sm:$0xf] }
 0x1e2   : > { %2558 = vmatpush.bf16.msra.mxu1 %v4492_v13  ;;  %v4901_v13 = vld [vmem:[%s5849_s28 + $0xd0] sm:$0xf0]  ;;  %v4979_v56 = vld [vmem:[%s5849_s28 + $0x160] sm:$0xf] }
 0x1e3   : > { %v4981_v57 = vld [vmem:[%s5849_s28 + $0x170] sm:$0xf0] }
 0x1e4   : > { %v5648_v14 = vpop.eup %5647 }
 0x1e5   : > { %v1818_v17 = vadd.f32 1.0, %v5648_v14  ;;  %v4883_v14 = vld [vmem:[%s5849_s28 + $0xa0] sm:$0xf] }
 0x1e6   : > { %2559 = vmatpush.bf16.msra.mxu1 %v4476_v25 }
 0x1e7   : > { %5649 = vrcp.f32 %v1818_v17  ;;  %v1830_v34 = vand.u32 2147483648, %v1818_v17  ;;  %v1828_v38 = vand.u32 2147483647, %v1818_v17  ;;  %vm1824_vm5 = vweird.f32 %v1818_v17 }
 0x1e8   : > { %5651 = vtanh.f32 %v6627_v10 }
 0x1e9   : > { %v1831_v35 = vor.u32 1.1754944e-38, %v1830_v34  ;;  %vm1829_vm7 = vcmp.eq.f32.partialorder %v1828_v38, 8.507059e+37 }
 0x1ea   : > { %2560 = vmatpush.bf16.msra.mxu1 %v4460_v29  ;;  %v5498_v29 = vld [vmem:[%s5849_s28 + $0x8c] sm:$0xf0] }
 0x1eb   : > { %v4868_v6 = vor.u32 %v5498_v29, %v4867_v23 }
 0x1ed   : > { %v5650_v24 = vpop.eup %5649 }
 0x1ee   : > { %v1820_v30 = vmul.f32 %v5650_v24, %v1818_v17  ;;  %vm1825_vm4 = vweird.f32 %v5650_v24  ;;  %2561 = vmatpush.bf16.msra.mxu1 %v4444_v32  ;;  %v5652_v20 = vpop.eup %5651  ;;  %v4904_v17 = vor.u32 %v5504_v5, %v4901_v13  ;;  %v5048_v5 = vor.u32 %v5540_v4, %v5045_v41 }
 0x1ef   : > { %vm1826_vm6 = vmor %vm1824_vm5, %vm1825_vm4 }
 0x1f0   : > { %v1821_v33 = vsub.f32 1.0, %v1820_v30  ;;  %3296 = vmatpush.bf16.msrb.mxu3 %v4904_v17  ;;  %v5171_v17 = vld [vmem:[%s5849_s28 + $0x2e0] sm:$0xf] }
 0x1f1   : > { %v5172_v23 = vor.u32 %v5574_v3, %v5171_v17  ;;  %v5523_v17 = vld [vmem:[%s5849_s28 + $0x154] sm:$0xf0]  ;;  %v4947_v3 = vld [vmem:[%s5849_s28 + $0x120] sm:$0xf] }
 0x1f2   : > { %v1822_v36 = vmul.f32 %v5650_v24, %v1821_v33  ;;  %2562 = vmatpush.bf16.msra.mxu1 %v4428_v39  ;;  %v6686_v33 = vld [vmem:[%s6135_s18] sm:$0xf] }
 0x1f3   : > { %v1951_v26 = vperm.slane %v6686_v33, 1 }
 0x1f4   : > { %v1823_v40 = vadd.f32 %v5650_v24, %v1822_v36  ;;  %3297 = vmatpush.bf16.msrb.mxu3 %v4888_v28  ;;  %v1950_v36 = vperm.slane %v6686_v33, 0  ;;  %v5029_v28 = vld [vmem:[%s5849_s28 + $0x1d0] sm:$0xf0] }
 0x1f6   : > { %v1827_v42 = vsel %vm1826_vm6, %v5650_v24, %v1823_v40  ;;  %v5496_v24 = vld [vmem:[%s5849_s28 + $0x84] sm:$0xf] }
 0x1f7   : > { %v1832_v44 = vsel %vm1829_vm7, %v1831_v35, %v1827_v42  ;;  %v4872_v32 = vor.u32 %v5496_v24, %v4869_v31  ;;  %v5035_v24 = vld [vmem:[%s5849_s28 + $0x1c8] sm:$0xf]  ;;  %v5011_v31 = vld [vmem:[%s5849_s28 + $0x1a0] sm:$0xf] }
 0x1f8   : > { %v1838_v48 = vmul.f32 %v5652_v20, %v1832_v44 }
 0x1f9   : > { %v2447_v30 = vpop.f32.mrf.mxu0  ;;  %3298 = vmatpush.bf16.msrb.mxu3 %v4872_v32  ;;  %v5534_v32 = vld [vmem:[%s5849_s28 + $0x1ac] sm:$0xf0] }
 0x1fa   : > { %1840 = vst [vmem:[%s1839_s9] sm:$0x3] %v1838_v48  ;;  %v1845_v49 = vpack.c.bf16 %v1838_v48, %v1838_v48  ;;  %v2448_v8 = vadd.f32 %v2447_v30, %v1950_v36  ;;  %v5539_v30 = vld [vmem:[%s5849_s28 + $0x1d4] sm:$0xf0]  ;;  %v5012_v36 = vor.u32 %v5534_v32, %v5011_v31  ;;  %v4949_v31 = vld [vmem:[%s5849_s28 + $0x130] sm:$0xf0] }
 0x1fb   : > { %v4955_v32 = vld [vmem:[%s5849_s28 + $0x128] sm:$0xf] }
 0x1fc   : > { %2472 = vmatmul.bf16.vlgmr.msra.gmra.mxu2 %v1845_v49  ;;  %2511 = vmatmul.bf16.vlgmr.msrb.gmra.mxu1 %v1845_v49 }
 0x1fd   : > { %2550 = vmatmul.bf16.vlgmr.msra.gmra.mxu0 %v1845_v49  ;;  %2589 = vmatmul.bf16.vlgmr.msra.gmra.mxu3 %v1845_v49 }
 0x1fe   : > { %2568 = vmatpush.bf16.msra.mxu2 %v4668_v50  ;;  %v4851_v50 = vld [vmem:[%s5849_s28 + $0x60] sm:$0xf]  ;;  %3299 = vmatpush.bf16.msrb.mxu3 %v4856_v53 }
 0x1ff   : > { %v2486_v34 = vpop.f32.mrf.mxu3 }
 0x200   : > { %v2487_v39 = vadd.f32 %v2486_v34, %v1951_v26  ;;  %v5155_v34 = vld [vmem:[%s5849_s28 + $0x2c0] sm:$0xf]  ;;  %v5532_v26 = vld [vmem:[%s5849_s28 + $0x1a4] sm:$0xf] }
 0x201   : > { %v2449_v38 = vpop.f32.mrf.mxu0 }
 0x202   : > { %2569 = vmatpush.bf16.msra.mxu2 %v4652_v52  ;;  %v4852_v52 = vor.u32 %v5494_v1, %v4851_v50  ;;  %3300 = vmatpush.bf16.msrb.mxu3 %v4840_v21  ;;  %v5570_v38 = vld [vmem:[%s5849_s28 + $0x2cc] sm:$0xf0]  ;;  %v5139_v50 = vld [vmem:[%s5849_s28 + $0x2a0] sm:$0xf] }
 0x203   : > { %v5140_v53 = vor.u32 %v5566_v18, %v5139_v50  ;;  %v5526_v21 = vld [vmem:[%s5849_s28 + $0x16c] sm:$0xf0]  ;;  %v5512_v50 = vld [vmem:[%s5849_s28 + $0x104] sm:$0xf]  ;;  %v4933_v18 = vld [vmem:[%s5849_s28 + $0x110] sm:$0xf0] }
 0x206   : > { %2570 = vmatpush.bf16.msra.mxu2 %v4636_v54  ;;  %v4835_v54 = vld [vmem:[%s5849_s28 + $0x40] sm:$0xf]  ;;  %3301 = vmatpush.bf16.msrb.mxu3 %v4824_v58 }
 0x207   : > { %v2488_v40 = vpop.f32.mrf.mxu3 }
 0x20a   : > { %2571 = vmatpush.bf16.msra.mxu2 %v4620_v15  ;;  %v4836_v15 = vor.u32 %v5490_v27, %v4835_v54  ;;  %v5003_v27 = vld [vmem:[%s5849_s28 + $0x188] sm:$0xf] }
 0x20c   : > { %2524 = vmatmul.bf16.vlgmr.msrb.gmra.mxu2 %v6490_v37  ;;  %2563 = vmatmul.bf16.vlgmr.msra.gmra.mxu1 %v6490_v37  ;;  %v4915_v37 = vld [vmem:[%s5849_s28 + $0xe0] sm:$0xf] }
 0x20d   : > { %v4916_v62 = vor.u32 %v5510_v47, %v4915_v37  ;;  %v5542_v37 = vld [vmem:[%s5849_s28 + $0x1ec] sm:$0xf0]  ;;  %v5480_v47 = vld [vmem:[%s5849_s28 + $0x4] sm:$0xf] }
 0x20e   : > { %2572 = vmatpush.bf16.msra.mxu2 %v4604_v16  ;;  %v4819_v16 = vld [vmem:[%s5849_s28 + $0x20] sm:$0xf]  ;;  %v4808_v2 = vor.u32 %v5480_v47, %v4805_v61  ;;  %v5522_v61 = vld [vmem:[%s5849_s28 + $0x14c] sm:$0xf0] }
 0x20f   : > { %3256 = vmatpush.bf16.msrb.mxu0 %v4916_v62  ;;  %v5044_v62 = vor.u32 %v5542_v37, %v5043_v55  ;;  %v5527_v55 = vld [vmem:[%s5849_s28 + $0x174] sm:$0xf0]  ;;  %v4963_v47 = vld [vmem:[%s5849_s28 + $0x140] sm:$0xf] }
 0x210   : > { %3302 = vmatpush.bf16.msrb.mxu3 %v4808_v2  ;;  %v4964_v41 = vor.u32 %v5522_v61, %v4963_v47  ;;  %v5568_v61 = vld [vmem:[%s5849_s28 + $0x2c4] sm:$0xf] }
 0x211   : > { %3269 = vmatpush.bf16.msrb.mxu1 %v5044_v62  ;;  %v5107_v62 = vld [vmem:[%s5849_s28 + $0x260] sm:$0xf] }
 0x212   : > { %2573 = vmatpush.bf16.msra.mxu2 %v4588_v19  ;;  %v4820_v19 = vor.u32 %v5486_v0, %v4819_v16  ;;  %v5123_v16 = vld [vmem:[%s5849_s28 + $0x280] sm:$0xf]  ;;  %v4980_v0 = vor.u32 %v5526_v21, %v4979_v56  ;;  %v5515_v56 = vld [vmem:[%s5849_s28 + $0x114] sm:$0xf0] }
 0x213   : > { %3257 = vmatpush.bf16.msrb.mxu0 %v4900_v11  ;;  %v5543_v11 = vld [vmem:[%s5849_s28 + $0x1f4] sm:$0xf0]  ;;  %v5124_v58 = vor.u32 %v5562_v7, %v5123_v16 }
 0x214   : > { %v5052_v13 = vor.u32 %v5543_v11, %v5051_v12  ;;  %v5558_v12 = vld [vmem:[%s5849_s28 + $0x26c] sm:$0xf0]  ;;  %v4965_v11 = vld [vmem:[%s5849_s28 + $0x150] sm:$0xf0]  ;;  %v5575_v7 = vld [vmem:[%s5849_s28 + $0x2f4] sm:$0xf0] }
 0x216   : > { %2574 = vmatpush.bf16.msra.mxu2 %v4572_v43  ;;  %v4803_v43 = vld [vmem:[%s5849_s28] sm:$0xf]  ;;  %3347 = vmatpush.bf16.msra.mxu3 %v5052_v13  ;;  %v5108_v13 = vor.u32 %v5558_v12, %v5107_v62  ;;  %v5157_v62 = vld [vmem:[%s5849_s28 + $0x2d0] sm:$0xf0] }
 0x217   : > { %v5160_v12 = vor.u32 %v5568_v61, %v5157_v62  ;;  %v5115_v61 = vld [vmem:[%s5849_s28 + $0x268] sm:$0xf]  ;;  %v5559_v62 = vld [vmem:[%s5849_s28 + $0x274] sm:$0xf0] }
 0x21a   : > { %2575 = vmatpush.bf16.msra.mxu2 %v4556_v60  ;;  %v4804_v60 = vor.u32 %v5482_v59, %v4803_v43  ;;  %v4987_v59 = vld [vmem:[%s5849_s28 + $0x168] sm:$0xf] }
 0x21d   : > { %2576 = vmatmul.bf16.vlgmr.msra.gmra.mxu2 %v6568_v63  ;;  %v5502_v63 = vld [vmem:[%s5849_s28 + $0xac] sm:$0xf0] }
 0x21e   : > { %v4884_v25 = vor.u32 %v5502_v63, %v4883_v14  ;;  %v5027_v14 = vld [vmem:[%s5849_s28 + $0x1c0] sm:$0xf]  ;;  %v5538_v63 = vld [vmem:[%s5849_s28 + $0x1cc] sm:$0xf0]  ;;  %3282 = vmatpush.bf16.msrb.mxu2 %v5172_v23 }
 0x21f   : > { %v5028_v22 = vor.u32 %v5538_v63, %v5027_v14  ;;  %v4971_v63 = vld [vmem:[%s5849_s28 + $0x148] sm:$0xf]  ;;  %v5091_v23 = vld [vmem:[%s5849_s28 + $0x240] sm:$0xf] }
 0x220   : > { %3258 = vmatpush.bf16.msrb.mxu0 %v4884_v25  ;;  %v5536_v25 = vld [vmem:[%s5849_s28 + $0x1c4] sm:$0xf] }
 0x221   : > { %v5032_v29 = vor.u32 %v5536_v25, %v5029_v28  ;;  %3270 = vmatpush.bf16.msrb.mxu1 %v5028_v22  ;;  %v5518_v25 = vld [vmem:[%s5849_s28 + $0x12c] sm:$0xf0] }
 0x222   : > { %v4948_v28 = vor.u32 %v5518_v25, %v4947_v3  ;;  %v1952_v3 = vperm.slane %v6686_v33, 2 }
 0x224   : > { %3259 = vmatpush.bf16.msrb.mxu0 %v4868_v6  ;;  %v5036_v6 = vor.u32 %v5539_v30, %v5035_v24  ;;  %v5516_v24 = vld [vmem:[%s5849_s28 + $0x124] sm:$0xf] }
 0x225   : > { %3271 = vmatpush.bf16.msrb.mxu1 %v5012_v36 }
 0x226   : > { %3348 = vmatpush.bf16.msra.mxu3 %v5036_v6 }
 0x228   : > { %3260 = vmatpush.bf16.msrb.mxu0 %v4852_v52  ;;  %v5528_v52 = vld [vmem:[%s5849_s28 + $0x184] sm:$0xf] }
 0x229   : > { %v5000_v54 = vor.u32 %v5528_v52, %v4997_v51  ;;  %v5572_v52 = vld [vmem:[%s5849_s28 + $0x2e4] sm:$0xf]  ;;  %v5173_v51 = vld [vmem:[%s5849_s28 + $0x2f0] sm:$0xf0] }
 0x22c   : > { %3261 = vmatpush.bf16.msrb.mxu0 %v4836_v15  ;;  %v5004_v15 = vor.u32 %v5531_v9, %v5003_v27  ;;  %v4936_v27 = vor.u32 %v5512_v50, %v4933_v18  ;;  %v5176_v9 = vor.u32 %v5572_v52, %v5173_v51  ;;  %v4891_v50 = vld [vmem:[%s5849_s28 + $0xa8] sm:$0xf] }
 0x230   : > { %3262 = vmatpush.bf16.msrb.mxu0 %v4820_v19  ;;  %v5524_v19 = vld [vmem:[%s5849_s28 + $0x164] sm:$0xf] }
 0x231   : > { %v4984_v43 = vor.u32 %v5524_v19, %v4981_v57  ;;  %v5573_v57 = vld [vmem:[%s5849_s28 + $0x2ec] sm:$0xf] }
 0x234   : > { %3263 = vmatpush.bf16.msrb.mxu0 %v4804_v60  ;;  %v4988_v60 = vor.u32 %v5527_v55, %v4987_v59  ;;  %v5546_v55 = vld [vmem:[%s5849_s28 + $0x20c] sm:$0xf0] }
 0x238   : > { %3308 = vmatpush.bf16.msra.mxu0 %v5048_v5  ;;  %v5520_v5 = vld [vmem:[%s5849_s28 + $0x144] sm:$0xf] }
 0x239   : > { %v4968_v14 = vor.u32 %v5520_v5, %v4965_v11  ;;  %v5511_v5 = vld [vmem:[%s5849_s28 + $0xf4] sm:$0xf0]  ;;  %v5163_v11 = vld [vmem:[%s5849_s28 + $0x2c8] sm:$0xf] }
 0x23c   : > { %3309 = vmatpush.bf16.msra.mxu0 %v5032_v29  ;;  %v5554_v29 = vld [vmem:[%s5849_s28 + $0x24c] sm:$0xf0] }
 0x23d   : > { %v5092_v6 = vor.u32 %v5554_v29, %v5091_v23  ;;  %v5564_v23 = vld [vmem:[%s5849_s28 + $0x2a4] sm:$0xf]  ;;  %v5141_v29 = vld [vmem:[%s5849_s28 + $0x2b0] sm:$0xf0] }
 0x240   : > { %v2460_v35 = vpop.f32.mrf.mxu1 }
 0x241   : > { %v6690_v42 = vadd.f32 %v2460_v35, %v2448_v8  ;;  %v2499_v20 = vpop.f32.mrf.mxu0  ;;  %v5013_v8 = vld [vmem:[%s5849_s28 + $0x1b0] sm:$0xf0]  ;;  %v5019_v35 = vld [vmem:[%s5849_s28 + $0x1a8] sm:$0xf] }
 0x242   : > { %v6692_v44 = vadd.f32 %v2499_v20, %v2487_v39  ;;  %v5156_v39 = vor.u32 %v5570_v38, %v5155_v34  ;;  %v5016_v40 = vor.u32 %v5532_v26, %v5013_v8  ;;  %v5535_v20 = vld [vmem:[%s5849_s28 + $0x1b4] sm:$0xf0]  ;;  %v4952_v26 = vor.u32 %v5516_v24, %v4949_v31  ;;  %v5147_v31 = vld [vmem:[%s5849_s28 + $0x2a8] sm:$0xf] }
 0x243   : > { %v5519_v34 = vld [vmem:[%s5849_s28 + $0x134] sm:$0xf0]  ;;  %v5144_v24 = vor.u32 %v5564_v23, %v5141_v29  ;;  %v5552_v29 = vld [vmem:[%s5849_s28 + $0x244] sm:$0xf] }
 0x244   : > { %3283 = vmatpush.bf16.msrb.mxu2 %v5156_v39  ;;  %3310 = vmatpush.bf16.msra.mxu0 %v5016_v40  ;;  %v4956_v8 = vor.u32 %v5519_v34, %v4955_v32  ;;  %v4931_v40 = vld [vmem:[%s5849_s28 + $0x100] sm:$0xf]  ;;  %v1953_v34 = vperm.slane %v6686_v33, 3 }
 0x247   : > { %v6694_v45 = vpop.f32.mrf.mxu3 }
 0x248   : > { %v2462_v46 = vpop.f32.mrf.mxu1  ;;  %3284 = vmatpush.bf16.msrb.mxu2 %v5140_v53  ;;  %3311 = vmatpush.bf16.msra.mxu0 %v5000_v54  ;;  %v6780_v54 = vld [vmem:[#allocation1] sm:$0xff] }
 0x249   : > { %v2501_v48 = vpop.f32.mrf.mxu0  ;;  %v5020_v46 = vor.u32 %v5535_v20, %v5019_v35  ;;  %v5514_v35 = vld [vmem:[%s5849_s28 + $0x10c] sm:$0xf0]  ;;  %v5075_v20 = vld [vmem:[%s5849_s28 + $0x220] sm:$0xf]  ;;  %3264 = vmatmul.bf16.vlgmr.msrb.gmra.mxu0 %v6780_v54  ;;  %3303 = vmatmul.bf16.vlgmr.msrb.gmra.mxu3 %v6780_v54 }
 0x24a   : > { %v4995_v48 = vld [vmem:[%s5849_s28 + $0x180] sm:$0xf] }
 0x24b   : > { %3349 = vmatpush.bf16.msra.mxu3 %v5020_v46 }
 0x24c   : > { %3285 = vmatpush.bf16.msrb.mxu2 %v5124_v58  ;;  %3312 = vmatpush.bf16.msra.mxu0 %v4984_v43  ;;  %v5181_v58 = vld [vmem:[%s5849_s28 + $0x2f8] sm:$0xf0]  ;;  %v5059_v43 = vld [vmem:[%s5849_s28 + $0x200] sm:$0xf] }
 0x24d   : > { %v5060_v47 = vor.u32 %v5546_v55, %v5059_v43  ;;  %v5556_v43 = vld [vmem:[%s5849_s28 + $0x264] sm:$0xf]  ;;  %v4875_v55 = vld [vmem:[%s5849_s28 + $0x88] sm:$0xf] }
 0x24f   : > { %v2540_v49 = vpop.f32.mrf.mxu3  ;;  %3350 = vmatpush.bf16.msra.mxu3 %v5004_v15  ;;  %v4939_v15 = vld [vmem:[%s5849_s28 + $0x108] sm:$0xf] }
 0x250   : > { %v5530_v49 = vld [vmem:[%s5849_s28 + $0x18c] sm:$0xf0]  ;;  %3286 = vmatpush.bf16.msrb.mxu2 %v5108_v13  ;;  %3313 = vmatpush.bf16.msra.mxu0 %v4968_v14  ;;  %v4940_v16 = vor.u32 %v5515_v56, %v4939_v15  ;;  %v5563_v56 = vld [vmem:[%s5849_s28 + $0x294] sm:$0xf0] }
 0x251   : > { %v4996_v1 = vor.u32 %v5530_v49, %v4995_v48  ;;  %v4932_v49 = vor.u32 %v5514_v35, %v4931_v40  ;;  %v5565_v40 = vld [vmem:[%s5849_s28 + $0x2ac] sm:$0xf]  ;;  %v5149_v35 = vld [vmem:[%s5849_s28 + $0x2b8] sm:$0xf0] }
 0x253   : > { %3272 = vmatpush.bf16.msrb.mxu1 %v4996_v1  ;;  %3351 = vmatpush.bf16.msra.mxu3 %v4988_v60 }
 0x254   : > { %3287 = vmatpush.bf16.msrb.mxu2 %v5092_v6  ;;  %3314 = vmatpush.bf16.msra.mxu0 %v4952_v26  ;;  %v5507_v6 = vld [vmem:[%s5849_s28 + $0xd4] sm:$0xf0] }
 0x257   : > { %3273 = vmatpush.bf16.msrb.mxu1 %v4980_v0  ;;  %v5179_v0 = vld [vmem:[%s5849_s28 + $0x2e8] sm:$0xf] }
 0x258   : > { %v5180_v19 = vor.u32 %v5575_v7, %v5179_v0  ;;  %3315 = vmatpush.bf16.msra.mxu0 %v4936_v27  ;;  %v5131_v27 = vld [vmem:[%s5849_s28 + $0x288] sm:$0xf]  ;;  %v5133_v0 = vld [vmem:[%s5849_s28 + $0x298] sm:$0xf0] }
 0x25b   : > { %3274 = vmatpush.bf16.msrb.mxu1 %v4964_v41 }
 0x25c   : > { %3360 = vmatpush.bf16.msrb.mxu0 %v5180_v19 }
 0x25f   : > { %3275 = vmatpush.bf16.msrb.mxu1 %v4948_v28 }
 0x263   : > { %3276 = vmatpush.bf16.msrb.mxu1 %v4932_v49  ;;  %v5152_v49 = vor.u32 %v5565_v40, %v5149_v35  ;;  %v5555_v40 = vld [vmem:[%s5849_s28 + $0x254] sm:$0xf0]  ;;  %v5553_v35 = vld [vmem:[%s5849_s28 + $0x24c] sm:$0xf] }
 0x267   : > { %3321 = vmatpush.bf16.msra.mxu1 %v5176_v9 }
 0x26b   : > { %3322 = vmatpush.bf16.msra.mxu1 %v5160_v12 }
 0x26f   : > { %3323 = vmatpush.bf16.msra.mxu1 %v5144_v24  ;;  %v5093_v24 = vld [vmem:[%s5849_s28 + $0x250] sm:$0xf0] }
 0x279   : > { %v2512_v37 = vpop.f32.mrf.mxu1 }
 0x27a   : > { %v2513_v2 = vadd.f32 %v2512_v37, %v6692_v44  ;;  %v6754_v4 = vpop.f32.mrf.mxu0  ;;  %v4972_v44 = vor.u32 %v5523_v17, %v4971_v63  ;;  %v5184_v37 = vor.u32 %v5573_v57, %v5181_v58  ;;  %v5571_v63 = vld [vmem:[%s5849_s28 + $0x2d4] sm:$0xf0]  ;;  %v5569_v17 = vld [vmem:[%s5849_s28 + $0x2cc] sm:$0xf]  ;;  %v5132_v57 = vor.u32 %v5563_v56, %v5131_v27 }
 0x27b   : > { %v5164_v25 = vor.u32 %v5571_v63, %v5163_v11  ;;  %v6852_v11 = vld [vmem:[#allocation1 + $0x9] sm:$0xff]  ;;  %v5549_v27 = vld [vmem:[%s5849_s28 + $0x22c] sm:$0xf] }
 0x27c   : > { %v4798_v22 = vmul.f32 -1.442695, %v2513_v2  ;;  %3352 = vmatpush.bf16.msra.mxu3 %v4972_v44  ;;  %v4923_v2 = vld [vmem:[%s5849_s28 + $0xe8] sm:$0xf]  ;;  %3277 = vmatmul.bf16.vlgmr.msrb.gmra.mxu1 %v6852_v11 }
 0x27d   : > { %v4924_v14 = vor.u32 %v5511_v5, %v4923_v2  ;;  %3361 = vmatpush.bf16.msrb.mxu0 %v5164_v25  ;;  %v5545_v2 = vld [vmem:[%s5849_s28 + $0x20c] sm:$0xf] }
 0x27e   : > { %5653 = vpow2.f32 %v4798_v22  ;;  %v5165_v22 = vld [vmem:[%s5849_s28 + $0x2d8] sm:$0xf0]  ;;  %3316 = vmatmul.bf16.vlgmr.msra.gmra.mxu0 %v6852_v11 }
 0x27f   : > { %v2473_v30 = vpop.f32.mrf.mxu2  ;;  %v5168_v28 = vor.u32 %v5569_v17, %v5165_v22 }
 0x280   : > { %v2474_v36 = vadd.f32 %v2473_v30, %v6690_v42  ;;  %v6770_v38 = vpop.f32.mrf.mxu3  ;;  %v5550_v42 = vld [vmem:[%s5849_s28 + $0x22c] sm:$0xf0]  ;;  %3353 = vmatpush.bf16.msra.mxu3 %v4956_v8  ;;  %v4907_v30 = vld [vmem:[%s5849_s28 + $0xc8] sm:$0xf] }
 0x281   : > { %v2514_v39 = vpop.f32.mrf.mxu1  ;;  %v5076_v1 = vor.u32 %v5550_v42, %v5075_v20  ;;  %v4908_v8 = vor.u32 %v5507_v6, %v4907_v30  ;;  %v5560_v20 = vld [vmem:[%s5849_s28 + $0x284] sm:$0xf]  ;;  %v5125_v42 = vld [vmem:[%s5849_s28 + $0x290] sm:$0xf0]  ;;  %v4859_v6 = vld [vmem:[%s5849_s28 + $0x68] sm:$0xf] }
 0x282   : > { %v4797_v46 = vmul.f32 -1.442695, %v2474_v36  ;;  %v2553_v48 = vpop.f32.mrf.mxu0  ;;  %v5567_v36 = vld [vmem:[%s5849_s28 + $0x2b4] sm:$0xf0]  ;;  %v5128_v51 = vor.u32 %v5560_v20, %v5125_v42  ;;  %v5101_v20 = vld [vmem:[%s5849_s28 + $0x258] sm:$0xf0] }
 0x283   : > { %3288 = vmatpush.bf16.msrb.mxu2 %v5076_v1  ;;  %v5148_v39 = vor.u32 %v5567_v36, %v5147_v31  ;;  %v5495_v31 = vld [vmem:[%s5849_s28 + $0x74] sm:$0xf0]  ;;  %v5099_v36 = vld [vmem:[%s5849_s28 + $0x248] sm:$0xf] }
 0x284   : > { %v5654_v53 = vpop.eup %5653  ;;  %5655 = vpow2.f32 %v4797_v46  ;;  %3354 = vmatpush.bf16.msra.mxu3 %v4940_v16  ;;  %v5561_v16 = vld [vmem:[%s5849_s28 + $0x28c] sm:$0xf]  ;;  %3324 = vmatpush.bf16.msra.mxu1 %v5128_v51  ;;  %v4843_v42 = vld [vmem:[%s5849_s28 + $0x48] sm:$0xf] }
 0x285   : > { %v6784_v21 = vadd.f32 1.0, %v5654_v53  ;;  %v5503_v53 = vld [vmem:[%s5849_s28 + $0xb4] sm:$0xf0]  ;;  %3362 = vmatpush.bf16.msrb.mxu0 %v5148_v39  ;;  %v5136_v58 = vor.u32 %v5561_v16, %v5133_v0  ;;  %v4860_v39 = vor.u32 %v5495_v31, %v4859_v6  ;;  %v5544_v0 = vld [vmem:[%s5849_s28 + $0x204] sm:$0xf] }
 0x286   : > { %v4892_v15 = vor.u32 %v5503_v53, %v4891_v50  ;;  %v5104_v50 = vor.u32 %v5553_v35, %v5101_v20  ;;  %v5497_v6 = vld [vmem:[%s5849_s28 + $0x8c] sm:$0xf]  ;;  %v4877_v31 = vld [vmem:[%s5849_s28 + $0x98] sm:$0xf0] }
 0x287   : > { %5657 = vrcp.f32 %v6784_v21  ;;  %v2475_v59 = vpop.f32.mrf.mxu2  ;;  %3289 = vmatpush.bf16.msrb.mxu2 %v5060_v47  ;;  %v2626_v46 = vand.u32 2147483647, %v6784_v21  ;;  %v2628_v18 = vand.u32 2147483648, %v6784_v21  ;;  %vm2622_vm8 = vweird.f32 %v6784_v21  ;;  %v5499_v47 = vld [vmem:[%s5849_s28 + $0x94] sm:$0xf0]  ;;  %3355 = vmatmul.bf16.vlgmr.msra.gmra.mxu3 %v6852_v11 }
 0x288   : > { %v2592_v60 = vpop.f32.mrf.mxu3  ;;  %3399 = vmatpush.bf16.msrb.mxu3 %v5184_v37  ;;  %v5109_v59 = vld [vmem:[%s5849_s28 + $0x270] sm:$0xf0]  ;;  %v4876_v22 = vor.u32 %v5499_v47, %v4875_v55  ;;  %v5509_v55 = vld [vmem:[%s5849_s28 + $0xec] sm:$0xf] }
 0x289   : > { %v6798_v41 = vpop.f32.mrf.mxu1  ;;  %v5112_v37 = vor.u32 %v5556_v43, %v5109_v59  ;;  %vm6845_vm10 = vcmp.eq.f32.partialorder %v2626_v46, 8.507059e+37  ;;  %v2629_v63 = vor.u32 1.1754944e-38, %v2628_v18  ;;  %3363 = vmatpush.bf16.msrb.mxu0 %v5132_v57  ;;  %v5100_v46 = vor.u32 %v5555_v40, %v5099_v36  ;;  %v5083_v18 = vld [vmem:[%s5849_s28 + $0x228] sm:$0xf]  ;;  %v5487_v59 = vld [vmem:[%s5849_s28 + $0x34] sm:$0xf0] }
 0x28a   : > { %v5656_v13 = vpop.eup %5655  ;;  %v2565_v57 = vadd.f32 %v6798_v41, %v1953_v34  ;;  %v4827_v43 = vld [vmem:[%s5849_s28 + $0x28] sm:$0xf]  ;;  %v5069_v41 = vld [vmem:[%s5849_s28 + $0x218] sm:$0xf0]  ;;  %v4880_v36 = vor.u32 %v5497_v6, %v4877_v31  ;;  %v5489_v20 = vld [vmem:[%s5849_s28 + $0x4c] sm:$0xf] }
 0x28b   : > { %v6805_v44 = vadd.f32 1.0, %v5656_v13  ;;  %3334 = vmatpush.bf16.msra.mxu2 %v4924_v14  ;;  %v5557_v13 = vld [vmem:[%s5849_s28 + $0x26c] sm:$0xf]  ;;  %v5117_v14 = vld [vmem:[%s5849_s28 + $0x278] sm:$0xf0]  ;;  %3325 = vmatpush.bf16.msra.mxu1 %v5112_v37 }
 0x28c   : > { %3400 = vmatpush.bf16.msrb.mxu3 %v5168_v28  ;;  %v5120_v23 = vor.u32 %v5557_v13, %v5117_v14  ;;  %v4861_v40 = vld [vmem:[%s5849_s28 + $0x78] sm:$0xf0] }
 0x28d   : > { %v6813_v32 = vpop.eup %5657  ;;  %5659 = vrcp.f32 %v6805_v44  ;;  %v2607_v17 = vand.u32 2147483647, %v6805_v44  ;;  %v2609_v28 = vand.u32 2147483648, %v6805_v44  ;;  %vm2603_vm13 = vweird.f32 %v6805_v44 }
 0x28e   : > { %v2618_v26 = vmul.f32 %v6813_v32, %v6784_v21  ;;  %vm2623_vm9 = vweird.f32 %v6813_v32  ;;  %v5096_v21 = vor.u32 %v5552_v29, %v5093_v24  ;;  %v5501_v24 = vld [vmem:[%s5849_s28 + $0xac] sm:$0xf] }
 0x28f   : > { %v2525_v48 = vpop.f32.mrf.mxu2  ;;  %3335 = vmatpush.bf16.msra.mxu2 %v4908_v8  ;;  %vm6862_vm11 = vmor %vm2622_vm8, %vm2623_vm9  ;;  %v2610_v51 = vor.u32 1.1754944e-38, %v2609_v28  ;;  %vm2608_vm15 = vcmp.eq.f32.partialorder %v2607_v17, 8.507059e+37  ;;  %v4811_v17 = vld [vmem:[%s5849_s28 + $0x8] sm:$0xf]  ;;  %v4909_v28 = vld [vmem:[%s5849_s28 + $0xd8] sm:$0xf0] }
 0x290   : > { %v2619_v1 = vsub.f32 1.0, %v2618_v26  ;;  %v2526_v52 = vadd.f32 %v2525_v48, %v1952_v3  ;;  %3401 = vmatpush.bf16.msrb.mxu3 %v5152_v49  ;;  %v5116_v3 = vor.u32 %v5559_v62, %v5115_v61  ;;  %v5548_v48 = vld [vmem:[%s5849_s28 + $0x224] sm:$0xf]  ;;  %v5077_v49 = vld [vmem:[%s5849_s28 + $0x230] sm:$0xf0]  ;;  %3326 = vmatpush.bf16.msra.mxu1 %v5096_v21 }
 0x291   : > { %v2566_v9 = vpop.f32.mrf.mxu1  ;;  %v5067_v61 = vld [vmem:[%s5849_s28 + $0x208] sm:$0xf]  ;;  %v5547_v62 = vld [vmem:[%s5849_s28 + $0x214] sm:$0xf0] }
 0x292   : > { %v2620_v7 = vmul.f32 %v6813_v32, %v2619_v1  ;;  %v2539_v19 = vadd.f32 %v6694_v45, %v2526_v52  ;;  %3364 = vmatpush.bf16.msrb.mxu0 %v5116_v3  ;;  %v5491_v1 = vld [vmem:[%s5849_s28 + $0x54] sm:$0xf0]  ;;  %v5085_v9 = vld [vmem:[%s5849_s28 + $0x238] sm:$0xf0]  ;;  %v5068_v14 = vor.u32 %v5547_v62, %v5067_v61 }
 0x293   : > { %v6837_v60 = vpop.eup %5659  ;;  %3336 = vmatpush.bf16.msra.mxu2 %v4892_v15  ;;  %v5551_v52 = vld [vmem:[%s5849_s28 + $0x234] sm:$0xf0]  ;;  %v4844_v16 = vor.u32 %v5491_v1, %v4843_v42  ;;  %v5088_v47 = vor.u32 %v5549_v27, %v5085_v9  ;;  %v4813_v27 = vld [vmem:[%s5849_s28 + $0x18] sm:$0xf0] }
 0x294   : > { %v2621_v45 = vadd.f32 %v6813_v32, %v2620_v7  ;;  %v2599_v12 = vmul.f32 %v6837_v60, %v6805_v44  ;;  %v2552_v5 = vadd.f32 %v6754_v4, %v2539_v19  ;;  %3402 = vmatpush.bf16.msrb.mxu3 %v5136_v58  ;;  %vm2604_vm12 = vweird.f32 %v6837_v60  ;;  %v5061_v7 = vld [vmem:[%s5849_s28 + $0x210] sm:$0xf0]  ;;  %v5021_v61 = vld [vmem:[%s5849_s28 + $0x1b8] sm:$0xf0] }
 0x295   : > { %vm2605_vm14 = vmor %vm2603_vm13, %vm2604_vm12  ;;  %v5080_v44 = vor.u32 %v5548_v48, %v5077_v49  ;;  %v5084_v58 = vor.u32 %v5551_v52, %v5083_v18  ;;  %v5064_v33 = vor.u32 %v5544_v0, %v5061_v7 }
 0x296   : > { %v2600_v25 = vsub.f32 1.0, %v2599_v12  ;;  %5661 = vtanh.f32 %v2552_v5  ;;  %v2625_v26 = vsel %vm6862_vm11, %v6813_v32, %v2621_v45  ;;  %3365 = vmatpush.bf16.msrb.mxu0 %v5100_v46  ;;  %v4925_v45 = vld [vmem:[%s5849_s28 + $0xf8] sm:$0xf0]  ;;  %v4828_v5 = vor.u32 %v5487_v59, %v4827_v43 }
 0x297   : > { %v2527_v30 = vpop.f32.mrf.mxu2  ;;  %3337 = vmatpush.bf16.msra.mxu2 %v4876_v22  ;;  %v2630_v53 = vsel %vm6845_vm10, %v2629_v63, %v2625_v26  ;;  %3327 = vmatpush.bf16.msra.mxu1 %v5080_v44  ;;  %v5072_v63 = vor.u32 %v5545_v2, %v5069_v41  ;;  %v5483_v22 = vld [vmem:[%s5849_s28 + $0x14] sm:$0xf0]  ;;  %v4845_v46 = vld [vmem:[%s5849_s28 + $0x58] sm:$0xf0]  ;;  %v5481_v44 = vld [vmem:[%s5849_s28 + $0xc] sm:$0xf] }
 0x298   : > { %v2601_v8 = vmul.f32 %v6837_v60, %v2600_v25  ;;  %3403 = vmatpush.bf16.msrb.mxu3 %v5120_v23  ;;  %v4812_v4 = vor.u32 %v5483_v22, %v4811_v17  ;;  %v5505_v25 = vld [vmem:[%s5849_s28 + $0xcc] sm:$0xf]  ;;  %v4893_v30 = vld [vmem:[%s5849_s28 + $0xb8] sm:$0xf0]  ;;  %v4848_v48 = vor.u32 %v5489_v20, %v4845_v46  ;;  %v4816_v9 = vor.u32 %v5481_v44, %v4813_v27 }
 0x299   : > { %v4912_v29 = vor.u32 %v5505_v25, %v4909_v28  ;;  %v5525_v41 = vld [vmem:[%s5849_s28 + $0x16c] sm:$0xf]  ;;  %v4957_v17 = vld [vmem:[%s5849_s28 + $0x138] sm:$0xf0] }
 0x29a   : > { %v2602_v32 = vadd.f32 %v6837_v60, %v2601_v8  ;;  %3366 = vmatpush.bf16.msrb.mxu0 %v5084_v58 }
 0x29b   : > { %3338 = vmatpush.bf16.msra.mxu2 %v4860_v39  ;;  %3328 = vmatpush.bf16.msra.mxu1 %v5064_v33  ;;  %v5493_v39 = vld [vmem:[%s5849_s28 + $0x6c] sm:$0xf]  ;;  %v5005_v33 = vld [vmem:[%s5849_s28 + $0x198] sm:$0xf0] }
 0x29c   : > { %v5662_v15 = vpop.eup %5661  ;;  %v2606_v56 = vsel %vm2605_vm14, %v6837_v60, %v2602_v32  ;;  %v2652_v60 = vmul.f32 %v2630_v53, %v6627_v10  ;;  %3404 = vmatpush.bf16.msrb.mxu3 %v5104_v50  ;;  %v4928_v10 = vor.u32 %v5509_v55, %v4925_v45  ;;  %v4864_v35 = vor.u32 %v5493_v39, %v4861_v40  ;;  %v5485_v32 = vld [vmem:[%s5849_s28 + $0x2c] sm:$0xf]  ;;  %v4829_v50 = vld [vmem:[%s5849_s28 + $0x38] sm:$0xf0] }
 0x29d   : > { %v2611_v19 = vsel %vm2608_vm15, %v2610_v51, %v2606_v56  ;;  %v4832_v1 = vor.u32 %v5485_v32, %v4829_v50  ;;  %v5537_v55 = vld [vmem:[%s5849_s28 + $0x1cc] sm:$0xf] }
 0x29e   : > { %v2653_v37 = vmul.f32 %v5662_v15, %v2611_v19  ;;  %3367 = vmatpush.bf16.msrb.mxu0 %v5068_v14  ;;  %v5541_v19 = vld [vmem:[%s5849_s28 + $0x1ec] sm:$0xf] }
 0x29f   : > { %3339 = vmatpush.bf16.msra.mxu2 %v4844_v16  ;;  %3373 = vmatpush.bf16.msrb.mxu1 %v4928_v10  ;;  %v5529_v45 = vld [vmem:[%s5849_s28 + $0x18c] sm:$0xf] }
 0x2a0   : > { %v6911_v34 = vadd.f32 %v2653_v37, %v2652_v60  ;;  %v2577_v12 = vpop.f32.mrf.mxu2  ;;  %3405 = vmatpush.bf16.msrb.mxu3 %v5088_v47  ;;  %v5037_v60 = vld [vmem:[%s5849_s28 + $0x1d8] sm:$0xf0]  ;;  %v5533_v47 = vld [vmem:[%s5849_s28 + $0x1ac] sm:$0xf]  ;;  %v5008_v2 = vor.u32 %v5529_v45, %v5005_v33 }
 0x2a1   : > { %v2578_v13 = vadd.f32 %v2577_v12, %v2565_v57  ;;  %v5053_v57 = vld [vmem:[%s5849_s28 + $0x1f8] sm:$0xf0]  ;;  %v5040_v37 = vor.u32 %v5537_v55, %v5037_v60  ;;  %v5024_v62 = vor.u32 %v5533_v47, %v5021_v61  ;;  %v5521_v10 = vld [vmem:[%s5849_s28 + $0x14c] sm:$0xf] }
 0x2a2   : > { %v5056_v59 = vor.u32 %v5541_v19, %v5053_v57  ;;  %v4989_v12 = vld [vmem:[%s5849_s28 + $0x178] sm:$0xf0] }
 0x2a3   : > { %v2591_v3 = vadd.f32 %v6770_v38, %v2578_v13  ;;  %3340 = vmatpush.bf16.msra.mxu2 %v4828_v5  ;;  %3374 = vmatpush.bf16.msrb.mxu1 %v4912_v29  ;;  %v4896_v38 = vor.u32 %v5501_v24, %v4893_v30  ;;  %v4992_v5 = vor.u32 %v5525_v41, %v4989_v12  ;;  %v4973_v13 = vld [vmem:[%s5849_s28 + $0x158] sm:$0xf0] }
 0x2a4   : > { %3406 = vmatpush.bf16.msrb.mxu3 %v5072_v63  ;;  %v4976_v14 = vor.u32 %v5521_v10, %v4973_v13  ;;  %v5517_v63 = vld [vmem:[%s5849_s28 + $0x12c] sm:$0xf] }
 0x2a5   : > { %v4799_v23 = vmul.f32 -1.442695, %v2591_v3  ;;  %v4960_v22 = vor.u32 %v5517_v63, %v4957_v17  ;;  %v5513_v3 = vld [vmem:[%s5849_s28 + $0x10c] sm:$0xf] }
 0x2a7   : > { %5663 = vpow2.f32 %v4799_v23  ;;  %3341 = vmatpush.bf16.msra.mxu2 %v4812_v4  ;;  %3375 = vmatpush.bf16.msrb.mxu1 %v4896_v38  ;;  %v4941_v4 = vld [vmem:[%s5849_s28 + $0x118] sm:$0xf0]  ;;  %v6954_v23 = vld [vmem:[%s6135_s18] sm:$0xf]  ;;  %s3475_s28 = scalar_lea.vmem %s6351_s24, %s4800_s21 [#allocation4] }
 0x2a8   : > { %v2579_v21 = vpop.f32.mrf.mxu2  ;;  %v4944_v25 = vor.u32 %v5513_v3, %v4941_v4  ;;  %v2768_v24 = vperm.slane %v6954_v23, 0  ;;  %v2769_v30 = vperm.slane %v6954_v23, 1 }
 0x2ab   : > { %3376 = vmatpush.bf16.msrb.mxu1 %v4880_v36 }
 0x2ad   : > { %v5664_v26 = vpop.eup %5663 }
 0x2ae   : > { %v2636_v8 = vadd.f32 1.0, %v5664_v26 }
 0x2af   : > { %3377 = vmatpush.bf16.msrb.mxu1 %v4864_v35 }
 0x2b0   : > { %5665 = vrcp.f32 %v2636_v8  ;;  %v2648_v52 = vand.u32 2147483648, %v2636_v8  ;;  %v2646_v53 = vand.u32 2147483647, %v2636_v8  ;;  %vm2642_vm1 = vweird.f32 %v2636_v8 }
 0x2b1   : > { %5667 = vtanh.f32 %v6911_v34 }
 0x2b2   : > { %v2649_v56 = vor.u32 1.1754944e-38, %v2648_v52  ;;  %vm2647_vm3 = vcmp.eq.f32.partialorder %v2646_v53, 8.507059e+37 }
 0x2b3   : > { %3378 = vmatpush.bf16.msrb.mxu1 %v4848_v48 }
 0x2b6   : > { %v5666_v49 = vpop.eup %5665 }
 0x2b7   : > { %v2638_v42 = vmul.f32 %v5666_v49, %v2636_v8  ;;  %vm2643_vm0 = vweird.f32 %v5666_v49  ;;  %3379 = vmatpush.bf16.msrb.mxu1 %v4832_v1  ;;  %v5668_v0 = vpop.eup %5667 }
 0x2b8   : > { %vm2644_vm2 = vmor %vm2642_vm1, %vm2643_vm0 }
 0x2b9   : > { %v2639_v18 = vsub.f32 1.0, %v2638_v42 }
 0x2bb   : > { %v2640_v51 = vmul.f32 %v5666_v49, %v2639_v18  ;;  %3380 = vmatpush.bf16.msrb.mxu1 %v4816_v9 }
 0x2bd   : > { %v2641_v15 = vadd.f32 %v5666_v49, %v2640_v51 }
 0x2bf   : > { %v2645_v16 = vsel %vm2644_vm2, %v5666_v49, %v2641_v15 }
 0x2c0   : > { %v2650_v7 = vsel %vm2647_vm3, %v2649_v56, %v2645_v16  ;;  %v2770_v16 = vperm.slane %v6954_v23, 2 }
 0x2c1   : > { %v2656_v58 = vmul.f32 %v5668_v0, %v2650_v7 }
 0x2c3   : > { %2658 = vst [vmem:[%s2657_s26] sm:$0x3] %v2656_v58  ;;  %v2663_v43 = vpack.c.bf16 %v2656_v58, %v2656_v58 }
 0x2c5   : > { %3290 = vmatmul.bf16.vlgmr.msrb.gmra.mxu2 %v2663_v43  ;;  %3329 = vmatmul.bf16.vlgmr.msra.gmra.mxu1 %v2663_v43 }
 0x2c6   : > { %3368 = vmatmul.bf16.vlgmr.msrb.gmra.mxu0 %v2663_v43  ;;  %3407 = vmatmul.bf16.vlgmr.msrb.gmra.mxu3 %v2663_v43  ;;  %v3265_v28 = vpop.f32.mrf.mxu0 }
 0x2c7   : > { %3386 = vmatpush.bf16.msrb.mxu2 %v5056_v59  ;;  %v3266_v21 = vadd.f32 %v3265_v28, %v2768_v24 }
 0x2cb   : > { %3387 = vmatpush.bf16.msrb.mxu2 %v5040_v37 }
 0x2cc   : > { %v3304_v29 = vpop.f32.mrf.mxu3 }
 0x2cd   : > { %v3305_v38 = vadd.f32 %v3304_v29, %v2769_v30 }
 0x2cf   : > { %3388 = vmatpush.bf16.msrb.mxu2 %v5024_v62 }
 0x2d3   : > { %3389 = vmatpush.bf16.msrb.mxu2 %v5008_v2 }
 0x2d4   : > { %v3306_v6 = vpop.f32.mrf.mxu3 }
 0x2d5   : > { %3342 = vmatmul.bf16.vlgmr.msra.gmra.mxu2 %v6780_v54  ;;  %3381 = vmatmul.bf16.vlgmr.msrb.gmra.mxu1 %v6780_v54  ;;  %v3267_v54 = vpop.f32.mrf.mxu0 }
 0x2d7   : > { %3390 = vmatpush.bf16.msrb.mxu2 %v4992_v5 }
 0x2db   : > { %3391 = vmatpush.bf16.msrb.mxu2 %v4976_v14  ;;  %v2771_v14 = vperm.slane %v6954_v23, 3 }
 0x2df   : > { %3392 = vmatpush.bf16.msrb.mxu2 %v4960_v22 }
 0x2e3   : > { %3393 = vmatpush.bf16.msrb.mxu2 %v4944_v25 }
 0x2e6   : > { %3394 = vmatmul.bf16.vlgmr.msrb.gmra.mxu2 %v6852_v11 }
 0x2f9   : > { %v3278_v31 = vpop.f32.mrf.mxu1 }
 0x2fa   : > { %v3279_v36 = vadd.f32 %v3278_v31, %v3266_v21 }
 0x2fb   : > { %v3317_v26 = vpop.f32.mrf.mxu0 }
 0x2fc   : > { %v3318_v8 = vadd.f32 %v3317_v26, %v3305_v38 }
 0x301   : > { %v3280_v40 = vpop.f32.mrf.mxu1 }
 0x303   : > { %v3319_v35 = vpop.f32.mrf.mxu0 }
 0x30a   : > { %v3356_v39 = vpop.f32.mrf.mxu3 }
 0x312   : > { %v3358_v11 = vpop.f32.mrf.mxu3 }
 0x342   : > { %v3330_v20 = vpop.f32.mrf.mxu1 }
 0x343   : > { %v3331_v46 = vadd.f32 %v3330_v20, %v3318_v8  ;;  %v3369_v48 = vpop.f32.mrf.mxu0 }
 0x345   : > { %v5186_v49 = vmul.f32 -1.442695, %v3331_v46 }
 0x347   : > { %5669 = vpow2.f32 %v5186_v49 }
 0x348   : > { %v3291_v42 = vpop.f32.mrf.mxu2 }
 0x349   : > { %v3292_v32 = vadd.f32 %v3291_v42, %v3279_v36  ;;  %v3408_v50 = vpop.f32.mrf.mxu3 }
 0x34a   : > { %v3332_v1 = vpop.f32.mrf.mxu1 }
 0x34b   : > { %v5185_v18 = vmul.f32 -1.442695, %v3292_v32  ;;  %v3371_v52 = vpop.f32.mrf.mxu0 }
 0x34d   : > { %v5670_v51 = vpop.eup %5669  ;;  %5671 = vpow2.f32 %v5185_v18 }
 0x34e   : > { %v3434_v53 = vadd.f32 1.0, %v5670_v51 }
 0x350   : > { %5673 = vrcp.f32 %v3434_v53  ;;  %v3293_v44 = vpop.f32.mrf.mxu2  ;;  %v3446_v62 = vand.u32 2147483648, %v3434_v53  ;;  %vm3440_vm5 = vweird.f32 %v3434_v53  ;;  %v3444_v45 = vand.u32 2147483647, %v3434_v53 }
 0x351   : > { %v3410_v27 = vpop.f32.mrf.mxu3 }
 0x352   : > { %v3382_v9 = vpop.f32.mrf.mxu1  ;;  %v3447_v13 = vor.u32 1.1754944e-38, %v3446_v62  ;;  %vm3445_vm8 = vcmp.eq.f32.partialorder %v3444_v45, 8.507059e+37 }
 0x353   : > { %v5672_v15 = vpop.eup %5671  ;;  %v3383_v28 = vadd.f32 %v3382_v9, %v2771_v14 }
 0x354   : > { %v3415_v56 = vadd.f32 1.0, %v5672_v15 }
 0x356   : > { %v5674_v0 = vpop.eup %5673  ;;  %5675 = vrcp.f32 %v3415_v56  ;;  %v3427_v2 = vand.u32 2147483648, %v3415_v56  ;;  %v3425_v10 = vand.u32 2147483647, %v3415_v56  ;;  %vm3421_vm9 = vweird.f32 %v3415_v56 }
 0x357   : > { %v3436_v7 = vmul.f32 %v5674_v0, %v3434_v53  ;;  %vm3441_vm4 = vweird.f32 %v5674_v0 }
 0x358   : > { %v3343_v19 = vpop.f32.mrf.mxu2  ;;  %vm3442_vm6 = vmor %vm3440_vm5, %vm3441_vm4  ;;  %v3428_v17 = vor.u32 1.1754944e-38, %v3427_v2  ;;  %vm3426_vm11 = vcmp.eq.f32.partialorder %v3425_v10, 8.507059e+37 }
 0x359   : > { %v3437_v57 = vsub.f32 1.0, %v3436_v7  ;;  %v3344_v58 = vadd.f32 %v3343_v19, %v2770_v16 }
 0x35a   : > { %v3384_v43 = vpop.f32.mrf.mxu1 }
 0x35b   : > { %v3438_v59 = vmul.f32 %v5674_v0, %v3437_v57  ;;  %v3357_v55 = vadd.f32 %v3356_v39, %v3344_v58 }
 0x35c   : > { %v5676_v60 = vpop.eup %5675 }
 0x35d   : > { %v3439_v37 = vadd.f32 %v5674_v0, %v3438_v59  ;;  %v3417_v47 = vmul.f32 %v5676_v60, %v3415_v56  ;;  %v3370_v61 = vadd.f32 %v3369_v48, %v3357_v55  ;;  %vm3422_vm7 = vweird.f32 %v5676_v60 }
 0x35e   : > { %vm3423_vm10 = vmor %vm3421_vm9, %vm3422_vm7 }
 0x35f   : > { %v3418_v33 = vsub.f32 1.0, %v3417_v47  ;;  %5677 = vtanh.f32 %v3370_v61  ;;  %v3443_v12 = vsel %vm3442_vm6, %v5674_v0, %v3439_v37 }
 0x360   : > { %v3345_v41 = vpop.f32.mrf.mxu2  ;;  %v3448_v22 = vsel %vm3445_vm8, %v3447_v13, %v3443_v12 }
 0x361   : > { %v3419_v5 = vmul.f32 %v5676_v60, %v3418_v33  ;;  %v3470_v29 = vmul.f32 %v3448_v22, %v6911_v34 }
 0x363   : > { %v3420_v63 = vadd.f32 %v5676_v60, %v3419_v5 }
 0x365   : > { %v5678_v3 = vpop.eup %5677  ;;  %v3424_v4 = vsel %vm3423_vm10, %v5676_v60, %v3420_v63 }
 0x366   : > { %v3429_v25 = vsel %vm3426_vm11, %v3428_v17, %v3424_v4 }
 0x367   : > { %v3471_v24 = vmul.f32 %v5678_v3, %v3429_v25 }
 0x369   : > { %v3472_v54 = vadd.f32 %v3471_v24, %v3470_v29  ;;  %v3395_v30 = vpop.f32.mrf.mxu2 }
 0x36a   : > { %v3396_v21 = vadd.f32 %v3395_v30, %v3383_v28 }
 0x36c   : > { %v3409_v38 = vadd.f32 %v3408_v50, %v3396_v21 }
 0x36e   : > { %v5187_v6 = vmul.f32 -1.442695, %v3409_v38 }
 0x370   : > { %5679 = vpow2.f32 %v5187_v6 }
 0x371   : > { %v3397_v23 = vpop.f32.mrf.mxu2 }
 0x376   : > { %v5680_v31 = vpop.eup %5679 }
 0x377   : > { %v3454_v36 = vadd.f32 1.0, %v5680_v31 }
 0x379   : > { %5681 = vrcp.f32 %v3454_v36  ;;  %v3466_v40 = vand.u32 2147483648, %v3454_v36  ;;  %v3464_v34 = vand.u32 2147483647, %v3454_v36  ;;  %vm3460_vm13 = vweird.f32 %v3454_v36 }
 0x37a   : > { %5683 = vtanh.f32 %v3472_v54 }
 0x37b   : > { %v3467_v20 = vor.u32 1.1754944e-38, %v3466_v40  ;;  %vm3465_vm15 = vcmp.eq.f32.partialorder %v3464_v34, 8.507059e+37 }
 0x37f   : > { %v5682_v26 = vpop.eup %5681 }
 0x380   : > { %v3456_v8 = vmul.f32 %v5682_v26, %v3454_v36  ;;  %vm3461_vm12 = vweird.f32 %v5682_v26  ;;  %v5684_v48 = vpop.eup %5683 }
 0x381   : > { %vm3462_vm14 = vmor %vm3460_vm13, %vm3461_vm12 }
 0x382   : > { %v3457_v39 = vsub.f32 1.0, %v3456_v8 }
 0x384   : > { %v3458_v35 = vmul.f32 %v5682_v26, %v3457_v39 }
 0x386   : > { %v3459_v11 = vadd.f32 %v5682_v26, %v3458_v35 }
 0x388   : > { %v3463_v46 = vsel %vm3462_vm14, %v5682_v26, %v3459_v11  ;;  %3483 = sbr.rel (!%p5817_p9) target bundleno = 920 (0x398), region = 40 }
 0x389   : > { %v3468_v49 = vsel %vm3465_vm15, %v3467_v20, %v3463_v46 }
 0x38a   : > { %v3474_v42 = vmul.f32 %v5684_v48, %v3468_v49 }
 0x38c   : > { %3476 = vst [vmem:[%s3475_s28] sm:$0x3] %v3474_v42 }
 0x393   : > { %v3502_v32 = vld [vmem:[%s6351_s24] sm:$0x3]  ;;  %v3504_v50 = vld [vmem:[%s6351_s24 + $0x2] sm:$0x3]  ;;  %v3506_v1 = vld [vmem:[%s6351_s24 + $0x4] sm:$0x3] }
 0x394   : > { %3503 = vst [vmem:[%s3485_s12] sm:$0x3] %v3502_v32  ;;  %v3508_v18 = vld [vmem:[%s6351_s24 + $0x6] sm:$0x3] }
 0x395   : > { %3505 = vst [vmem:[%s3485_s12 + $0x4] sm:$0x3] %v3504_v50 }
 0x396   : > { %3507 = vst [vmem:[%s3485_s12 + $0x8] sm:$0x3] %v3506_v1 }
 0x397   : > { %3509 = vst [vmem:[%s3485_s12 + $0xc] sm:$0x3] %v3508_v18 }
 0x398 PF: > { %p13_p6 = scmp.ge.s32.totalorder %s5796_s17, 4   ;;  %s7004_s12 = smov %s5741_s13 }
 0x399   : > { %s7005_s13 = smov %s5745_s14  ;;  %s7006_s14 = smov %s5806_s20 }
 0x39a   : > { %s7007_s15 = smov %s5796_s17  ;;  %15 = sbr.rel (!%p13_p6) target bundleno = 3 (0x3), region = 124 }
 0x39f   :  { %3551 = vsyncpa [#allocation3], 1 }
 0x3a0   :  { %3553 = vsyncpa [#allocation3 + $0x1], 1 }

</bundles_post_ra>
